<compile_context>
chip_gen: v5e
topology: v5e:2x2
jax: 0.10.0
libtpu: 0.0.40
codegen_flags: <defaults>
</compile_context>

<pallas_src>
import math

import jax
import jax.numpy as jnp
from jax.experimental import pallas as pl
from jax.experimental.pallas import tpu as pltpu


def _round_up(n, m):
    return -(-n // m) * m


def _tensorcores_per_chip():
    """Best-effort TensorCore count per chip (v7x=2, v5e/v6e=1); safe fallback = 1."""
    try:
        info = pltpu.get_tpu_info()
    except Exception:
        return 1
    for name in ("num_tensorcores", "tensorcore_count", "num_cores",
                 "cores_per_chip", "core_count"):
        v = getattr(info, name, None)
        if isinstance(v, int) and v > 0:
            return v
    return 1


def _graphfunc_kernel(key_row_ref, key_col_ref, inv_deg_ref, x_ref,
                      w1_ref, b1_ref, w2_ref, b2_ref, o_ref):
    # Per-grid-step refs (one tile of TB graphs, M = TB * S rows):
    #   key_row_ref: (1, 1, M) int32    key_col_ref: (1, M, 1) int32
    #   inv_deg_ref: (1, M, 1) f32      x_ref: (M, Dp) f32
    #   w1_ref: (Dp, Hp) f32  b1_ref: (1, Hp) f32
    #   w2_ref: (Hp, Dp) f32  b2_ref: (1, Dp) f32
    #   o_ref:  (M, Dp) f32
    key_row = key_row_ref[0]                                   # (1, M)
    key_col = key_col_ref[0]                                   # (M, 1)
    inv_deg = inv_deg_ref[0]                                   # (M, 1) f32

    # Block-diagonal 0/1 adjacency over the whole tile, built directly in bf16
    # (exact for 0/1) so both big matmuls run with bf16 MXU operands.
    adj = (key_col == key_row).astype(jnp.bfloat16)            # (M, M)

    x = x_ref[...]                                             # (M, Dp) f32

    # Layer 1 (aggregate-then-project): A_hat @ (x @ W1) == ((adj @ x) * inv_deg) @ W1
    agg1 = jnp.dot(adj, x.astype(jnp.bfloat16),
                   preferred_element_type=jnp.float32)         # (M, Dp)
    ax = agg1 * inv_deg                                        # row-normalized, f32
    h = jnp.maximum(
        jnp.dot(ax, w1_ref[...], preferred_element_type=jnp.float32) + b1_ref[...],
        0.0)                                                   # (M, Hp)

    # Layer 2 + residual: x + (adj @ (h @ W2)) * inv_deg + b2
    s2 = jnp.dot(h, w2_ref[...], preferred_element_type=jnp.float32)     # (M, Dp)
    agg2 = jnp.dot(adj, s2.astype(jnp.bfloat16),
                   preferred_element_type=jnp.float32)         # (M, Dp)

    o_ref[...] = x + agg2 * inv_deg + b2_ref[...]


def graph_func_forward(x, labels, w1, b1, w2, b2, *, target_rows=512):
    """x: (L, S, D) f32, labels: (L, S) int. Returns (L, S, D) f32.

    target_rows: rows (TB*S) per grid step; sweep 512/1024 — per-step fixed overhead
    amortizes with bigger tiles, adjacency cost grows as M^2.
    """
    L, S, D = x.shape
    H = w1.shape[1]
    Dp = _round_up(D, 128)                   # lane-dense feature dims
    Hp = _round_up(H, 128)

    # --- grid-step policy (generation aware) ---
    n_tc = _tensorcores_per_chip()
    TB = max(1, min(L, target_rows // max(S, 1)))    # graphs batched per grid step
    if n_tc > 1 and L > 1:
        TB = min(TB, -(-L // n_tc))          # keep >= n_tc steps only on multi-TC chips
    if (TB * S) % 8 != 0:                    # keep block shapes (8,128)-legal
        TB = L                               # single full-extent step is always legal
    NB = -(-L // TB)                         # number of grid steps
    L_pad = NB * TB
    M = TB * S                               # rows per tile

    x = x.astype(jnp.float32)
    labels = labels.astype(jnp.int32)
    if Dp != D:
        x = jnp.pad(x, ((0, 0), (0, 0), (0, Dp - D)))
    if L_pad != L:
        pad = L_pad - L
        x = jnp.concatenate([x, jnp.zeros((pad, S, Dp), jnp.float32)], axis=0)
        labels = jnp.concatenate([labels, jnp.full((pad, S), -1, jnp.int32)], axis=0)

    # Node key = (graph id, label) folded into one int so the in-kernel equality test
    # yields a block-diagonal adjacency over the multi-graph tile (no cross-graph edges).
    # NOTE: int32 keys; fine unless L_pad * n_classes approaches 2**31.
    lab_min = jnp.min(labels)
    n_classes = jnp.max(labels) - lab_min + 1
    gidx = jnp.arange(L_pad, dtype=jnp.int32)[:, None]         # (L_pad, 1)
    key = (labels - lab_min) + gidx * n_classes                # (L_pad, S)

    # 1 / degree per node (degree >= 1 via the self loop), precomputed once on-host-graph.
    deg = jnp.sum(labels[:, :, None] == labels[:, None, :], axis=-1)     # (L_pad, S)
    inv_deg = (1.0 / deg.astype(jnp.float32)).reshape(NB, M, 1)

    key_row = key.reshape(NB, 1, M)
    key_col = key.reshape(NB, M, 1)
    x2 = x.reshape(NB * M, Dp)

    # Zero-padded weights/biases (padded rows/cols contribute exact zeros).
    w1p = jnp.zeros((Dp, Hp), jnp.float32).at[:D, :H].set(w1.astype(jnp.float32))
    b1p = jnp.zeros((1, Hp), jnp.float32).at[:, :H].set(b1.astype(jnp.float32).reshape(1, H))
    w2p = jnp.zeros((Hp, Dp), jnp.float32).at[:H, :D].set(w2.astype(jnp.float32))
    b2p = jnp.zeros((1, Dp), jnp.float32).at[:, :D].set(b2.astype(jnp.float32).reshape(1, D))

    grid_spec = pltpu.PrefetchScalarGridSpec(
        num_scalar_prefetch=0,
        grid=(NB,),
        in_specs=[
            pl.BlockSpec((1, 1, M), lambda i: (i, 0, 0)),   # node keys, row orientation (lane-dense)
            pl.BlockSpec((1, M, 1), lambda i: (i, 0, 0)),   # node keys, column orientation
            pl.BlockSpec((1, M, 1), lambda i: (i, 0, 0)),   # 1/degree per node
            pl.BlockSpec((M, Dp), lambda i: (i, 0)),        # x tile (TB graphs flattened)
            pl.BlockSpec((Dp, Hp), lambda i: (0, 0)),       # W1 (VMEM-resident)
            pl.BlockSpec((1, Hp), lambda i: (0, 0)),        # b1
            pl.BlockSpec((Hp, Dp), lambda i: (0, 0)),       # W2
            pl.BlockSpec((1, Dp), lambda i: (0, 0)),        # b2
        ],
        out_specs=pl.BlockSpec((M, Dp), lambda i: (i, 0)),
    )

    # Advisory cost hint so XLA can schedule wrapper-side ops around the custom call.
    flops = NB * (4 * M * M * Dp + 4 * M * Dp * Hp)
    bytes_accessed = NB * M * (2 * Dp * 4 + 3 * 4) + 4 * (2 * Dp * Hp + Hp + Dp)

    out2 = pl.pallas_call(
        _graphfunc_kernel,
        out_shape=jax.ShapeDtypeStruct((NB * M, Dp), jnp.float32),
        grid_spec=grid_spec,
        compiler_params=pltpu.CompilerParams(
            dimension_semantics=("parallel",),
            vmem_limit_bytes=32 * 1024 * 1024),
        cost_estimate=pl.CostEstimate(
            flops=flops, transcendentals=0, bytes_accessed=bytes_accessed),
    )(key_row, key_col, inv_deg, x2, w1p, b1p, w2p, b2p)

    return out2[: L * S, :D].reshape(L, S, D)


def graph_func_reference(x, labels, w1, b1, w2, b2):
    """Pure-JAX f32 reference mirroring the PyTorch forward (eval mode)."""
    def one(xg, lg):
        adj = (lg[:, None] == lg[None, :]).astype(jnp.float32)
        norm_adj = adj / jnp.sum(adj, axis=1, keepdims=True)
        h = jax.nn.relu(norm_adj @ (xg @ w1) + b1)
        out = norm_adj @ (h @ w2) + b2
        return xg + out
    return jax.vmap(one)(x, labels)


def init_params(key, z_dim):
    """Deterministic init matching GraphConvolution.reset_parameters."""
    k1, k2, k3, k4 = jax.random.split(key, 4)
    h = z_dim * 4
    stdv1 = 1.0 / math.sqrt(h)        # gc1: out_features = 4*z_dim
    stdv2 = 1.0 / math.sqrt(z_dim)    # gc2: out_features = z_dim
    w1 = jax.random.uniform(k1, (z_dim, h), jnp.float32, -stdv1, stdv1)
    b1 = jax.random.uniform(k2, (h,), jnp.float32, -stdv1, stdv1)
    w2 = jax.random.uniform(k3, (h, z_dim), jnp.float32, -stdv2, stdv2)
    b2 = jax.random.uniform(k4, (z_dim,), jnp.float32, -stdv2, stdv2)
    return w1, b1, w2, b2


if __name__ == "__main__":
    # (set_length, set_size, dim) — small, but enough graphs to exercise multi-graph
    # tiles, the feature-padding path (D=32 -> 128), and (on v7x) a 2-step parallel grid.
    set_length, set_size, z_dim = 40, 8, 32

    key = jax.random.PRNGKey(0)
    k_x, k_lab, k_p = jax.random.split(key, 3)

    x = jax.random.normal(k_x, (set_length, set_size, z_dim), dtype=jnp.float32)
    labels = jax.random.randint(k_lab, (set_length, set_size), 0, 3, dtype=jnp.int32)
    w1, b1, w2, b2 = init_params(k_p, z_dim)

    out = graph_func_forward(x, labels, w1, b1, w2, b2)
    out = jax.block_until_ready(out)

    ref = graph_func_reference(x, labels, w1, b1, w2, b2)
    assert out.shape == (set_length, set_size, z_dim)
    # bf16 MXU operands on the adjacency matmuls introduce ~1e-3-level deviation from
    # the pure-f32 reference; 2e-2 tolerance validates semantics with ample margin.
    assert jnp.allclose(out, ref, atol=2e-2, rtol=2e-2), "mismatch vs reference"

    print("KERNEL_OK")
</pallas_src>

<mosaic_0001>
module attributes {stable_mosaic.version = 11 : i64} {
  func.func @_graphfunc_kernel(%arg0: i32, %arg1: memref<1x1x320xi32, #tpu.memory_space<vmem>>, %arg2: memref<1x320x1xi32, #tpu.memory_space<vmem>>, %arg3: memref<1x320x1xf32, #tpu.memory_space<vmem>>, %arg4: memref<320x128xf32, #tpu.memory_space<vmem>>, %arg5: memref<128x128xf32, #tpu.memory_space<vmem>>, %arg6: memref<1x128xf32, #tpu.memory_space<vmem>>, %arg7: memref<128x128xf32, #tpu.memory_space<vmem>>, %arg8: memref<1x128xf32, #tpu.memory_space<vmem>>, %arg9: memref<320x128xf32, #tpu.memory_space<vmem>>) attributes {dimension_semantics = [#tpu.dimension_semantics<parallel>], iteration_bounds = array<i64: 1>, scalar_prefetch = 0 : i64, scratch_operands = 0 : i64, tpu.core_type = #tpu.core_type<tc>, window_params = [{transform_indices = @transform_0, window_bounds = array<i64: 1, 1, 320>}, {transform_indices = @transform_1, window_bounds = array<i64: 1, 320, 1>}, {transform_indices = @transform_2, window_bounds = array<i64: 1, 320, 1>}, {transform_indices = @transform_3, window_bounds = array<i64: 320, 128>}, {pipeline_mode = #tpu.pipeline_mode<synchronous>, transform_indices = @transform_4, window_bounds = array<i64: 128, 128>}, {pipeline_mode = #tpu.pipeline_mode<synchronous>, transform_indices = @transform_5, window_bounds = array<i64: 1, 128>}, {pipeline_mode = #tpu.pipeline_mode<synchronous>, transform_indices = @transform_6, window_bounds = array<i64: 128, 128>}, {pipeline_mode = #tpu.pipeline_mode<synchronous>, transform_indices = @transform_7, window_bounds = array<i64: 1, 128>}, {transform_indices = @transform_8, window_bounds = array<i64: 320, 128>}]} {
    %c0 = arith.constant 0 : index
    %c0_0 = arith.constant 0 : index
    %c0_1 = arith.constant 0 : index
    %0 = vector.load %arg1[%c0, %c0_0, %c0_1] : memref<1x1x320xi32, #tpu.memory_space<vmem>>, vector<1x1x320xi32>
    %1 = vector.shape_cast %0 : vector<1x1x320xi32> to vector<1x320xi32>
    %c0_2 = arith.constant 0 : index
    %c0_3 = arith.constant 0 : index
    %c0_4 = arith.constant 0 : index
    %2 = vector.load %arg2[%c0_2, %c0_3, %c0_4] : memref<1x320x1xi32, #tpu.memory_space<vmem>>, vector<1x320x1xi32>
    %3 = vector.shape_cast %2 : vector<1x320x1xi32> to vector<320x1xi32>
    %c0_5 = arith.constant 0 : index
    %c0_6 = arith.constant 0 : index
    %c0_7 = arith.constant 0 : index
    %4 = vector.load %arg3[%c0_5, %c0_6, %c0_7] : memref<1x320x1xf32, #tpu.memory_space<vmem>>, vector<1x320x1xf32>
    %5 = vector.shape_cast %4 : vector<1x320x1xf32> to vector<320x1xf32>
    %6 = vector.broadcast %3 : vector<320x1xi32> to vector<320x320xi32>
    %7 = vector.broadcast %1 : vector<1x320xi32> to vector<320x320xi32>
    %8 = arith.cmpi eq, %6, %7 : vector<320x320xi32>
    %9 = arith.extui %8 : vector<320x320xi1> to vector<320x320xi32>
    %10 = arith.sitofp %9 : vector<320x320xi32> to vector<320x320xf32>
    %11 = arith.truncf %10 : vector<320x320xf32> to vector<320x320xbf16>
    %c0_8 = arith.constant 0 : index
    %c0_9 = arith.constant 0 : index
    %12 = vector.load %arg4[%c0_8, %c0_9] : memref<320x128xf32, #tpu.memory_space<vmem>>, vector<320x128xf32>
    %13 = arith.truncf %12 : vector<320x128xf32> to vector<320x128xbf16>
    %cst = arith.constant dense<0.000000e+00> : vector<320x128xf32>
    %14 = tpu.matmul %11, %13, %cst {dimension_numbers = #tpu.dot_dimension_numbers<[1], [0], [0], [1], [0, 0, 1, 1], [], []>} : vector<320x320xbf16>, vector<320x128xbf16>, vector<320x128xf32> -> vector<320x128xf32>
    %15 = vector.broadcast %5 : vector<320x1xf32> to vector<320x128xf32>
    %16 = arith.mulf %14, %15 : vector<320x128xf32>
    %c0_10 = arith.constant 0 : index
    %c0_11 = arith.constant 0 : index
    %17 = vector.load %arg5[%c0_10, %c0_11] : memref<128x128xf32, #tpu.memory_space<vmem>>, vector<128x128xf32>
    %cst_12 = arith.constant dense<0.000000e+00> : vector<320x128xf32>
    %18 = tpu.matmul %16, %17, %cst_12 {dimension_numbers = #tpu.dot_dimension_numbers<[1], [0], [0], [1], [0, 0, 1, 1], [], []>} : vector<320x128xf32>, vector<128x128xf32>, vector<320x128xf32> -> vector<320x128xf32>
    %c0_13 = arith.constant 0 : index
    %c0_14 = arith.constant 0 : index
    %19 = vector.load %arg6[%c0_13, %c0_14] : memref<1x128xf32, #tpu.memory_space<vmem>>, vector<1x128xf32>
    %20 = vector.broadcast %19 : vector<1x128xf32> to vector<320x128xf32>
    %21 = arith.addf %18, %20 : vector<320x128xf32>
    %cst_15 = arith.constant 0.000000e+00 : f32
    %22 = vector.broadcast %cst_15 : f32 to vector<320x128xf32>
    %23 = arith.maximumf %21, %22 : vector<320x128xf32>
    %c0_16 = arith.constant 0 : index
    %c0_17 = arith.constant 0 : index
    %24 = vector.load %arg7[%c0_16, %c0_17] : memref<128x128xf32, #tpu.memory_space<vmem>>, vector<128x128xf32>
    %cst_18 = arith.constant dense<0.000000e+00> : vector<320x128xf32>
    %25 = tpu.matmul %23, %24, %cst_18 {dimension_numbers = #tpu.dot_dimension_numbers<[1], [0], [0], [1], [0, 0, 1, 1], [], []>} : vector<320x128xf32>, vector<128x128xf32>, vector<320x128xf32> -> vector<320x128xf32>
    %26 = arith.truncf %25 : vector<320x128xf32> to vector<320x128xbf16>
    %cst_19 = arith.constant dense<0.000000e+00> : vector<320x128xf32>
    %27 = tpu.matmul %11, %26, %cst_19 {dimension_numbers = #tpu.dot_dimension_numbers<[1], [0], [0], [1], [0, 0, 1, 1], [], []>} : vector<320x320xbf16>, vector<320x128xbf16>, vector<320x128xf32> -> vector<320x128xf32>
    %28 = vector.broadcast %5 : vector<320x1xf32> to vector<320x128xf32>
    %29 = arith.mulf %27, %28 : vector<320x128xf32>
    %30 = arith.addf %12, %29 : vector<320x128xf32>
    %c0_20 = arith.constant 0 : index
    %c0_21 = arith.constant 0 : index
    %31 = vector.load %arg8[%c0_20, %c0_21] : memref<1x128xf32, #tpu.memory_space<vmem>>, vector<1x128xf32>
    %32 = vector.broadcast %31 : vector<1x128xf32> to vector<320x128xf32>
    %33 = arith.addf %30, %32 : vector<320x128xf32>
    %c0_22 = arith.constant 0 : index
    %c0_23 = arith.constant 0 : index
    %34 = vector.load %arg9[%c0_22, %c0_23] : memref<320x128xf32, #tpu.memory_space<vmem>>, vector<320x128xf32>
    tpu.vector_store %arg9[%c0_22, %c0_23], %33 {strides = array<i32>} : memref<320x128xf32, #tpu.memory_space<vmem>>, vector<320x128xf32>,
    return
  }
  func.func @transform_0(%arg0: i32) -> (i32, i32, i32) {
    %c0_i32 = arith.constant 0 : i32
    %c0_i32_0 = arith.constant 0 : i32
    %c0_i32_1 = arith.constant 0 : i32
    return %arg0, %c0_i32, %c0_i32_0 : i32, i32, i32
  }
  func.func @transform_1(%arg0: i32) -> (i32, i32, i32) {
    %c0_i32 = arith.constant 0 : i32
    %c0_i32_0 = arith.constant 0 : i32
    %c0_i32_1 = arith.constant 0 : i32
    return %arg0, %c0_i32, %c0_i32_0 : i32, i32, i32
  }
  func.func @transform_2(%arg0: i32) -> (i32, i32, i32) {
    %c0_i32 = arith.constant 0 : i32
    %c0_i32_0 = arith.constant 0 : i32
    %c0_i32_1 = arith.constant 0 : i32
    return %arg0, %c0_i32, %c0_i32_0 : i32, i32, i32
  }
  func.func @transform_3(%arg0: i32) -> (i32, i32) {
    %c0_i32 = arith.constant 0 : i32
    %c0_i32_0 = arith.constant 0 : i32
    return %arg0, %c0_i32 : i32, i32
  }
  func.func @transform_4(%arg0: i32) -> (i32, i32) {
    %c0_i32 = arith.constant 0 : i32
    %c0_i32_0 = arith.constant 0 : i32
    %c0_i32_1 = arith.constant 0 : i32
    return %c0_i32, %c0_i32_0 : i32, i32
  }
  func.func @transform_5(%arg0: i32) -> (i32, i32) {
    %c0_i32 = arith.constant 0 : i32
    %c0_i32_0 = arith.constant 0 : i32
    %c0_i32_1 = arith.constant 0 : i32
    return %c0_i32, %c0_i32_0 : i32, i32
  }
  func.func @transform_6(%arg0: i32) -> (i32, i32) {
    %c0_i32 = arith.constant 0 : i32
    %c0_i32_0 = arith.constant 0 : i32
    %c0_i32_1 = arith.constant 0 : i32
    return %c0_i32, %c0_i32_0 : i32, i32
  }
  func.func @transform_7(%arg0: i32) -> (i32, i32) {
    %c0_i32 = arith.constant 0 : i32
    %c0_i32_0 = arith.constant 0 : i32
    %c0_i32_1 = arith.constant 0 : i32
    return %c0_i32, %c0_i32_0 : i32, i32
  }
  func.func @transform_8(%arg0: i32) -> (i32, i32) {
    %c0_i32 = arith.constant 0 : i32
    %c0_i32_0 = arith.constant 0 : i32
    return %arg0, %c0_i32 : i32, i32
  }
}

</mosaic_0001>

<bundles_post_ra>
// kernel: tpu_custom_call.1
= control target key start
LH: loop header
LB: loop body
LE: loop exit
PB: predicated region body
PF: predicated region fallthrough
CT: control target
= control target key end

     0   :  { %v2619_v3 = vmov 0   ;;  %s4465_s0 = inlined_call_operand.vmem [shape: s32[1,1,320], index: 0, kind: input, shape index: {}]   ;;  %s4466_s1 = inlined_call_operand.vmem [shape: s32[1,320,1], index: 1, kind: input, shape index: {}]   ;;  %s4467_s2 = inlined_call_operand.vmem [shape: f32[1,320,1], index: 2, kind: input, shape index: {}]   ;;  %s4468_s3 = inlined_call_operand.vmem [shape: f32[320,128], index: 3, kind: input, shape index: {}]   ;;  %s4469_s4 = inlined_call_operand.vmem [shape: f32[128,128], index: 4, kind: input, shape index: {}]   ;;  %s4470_s5 = inlined_call_operand.vmem [shape: f32[1,128], index: 5, kind: input, shape index: {}]   ;;  %s4471_s6 = inlined_call_operand.vmem [shape: f32[128,128], index: 6, kind: input, shape index: {}]   ;;  %s4472_s7 = inlined_call_operand.vmem [shape: f32[1,128], index: 7, kind: input, shape index: {}]   ;;  %s4473_s8 = inlined_call_operand.hbm [shape: f32[320,128], index: 8, kind: output, shape index: {}]  }
   0x1   :  { %v36_v0 = vld [vmem:[%s4466_s1 + $0x20] sm:$0xff]  ;;  %v34_v1 = vld [vmem:[%s4466_s1 + $0x10] sm:$0xff]  ;;  %2550 = vset.pattern.permute.xlu2 %v2619_v3  ;;  %2549 = vset.pattern.permute.xlu1 %v2619_v3 }
   0x2   :  { %v32_v2 = vld [vmem:[%s4466_s1] sm:$0xff]  ;;  %2548 = vset.pattern.permute.xlu0 %v2619_v3  ;;  %125 = vperm.xlu2 %2550, %v36_v0  }
   0x3   :  { %119 = vperm.xlu1 %2549, %v34_v1   ;;  %113 = vperm.xlu0 %2548, %v32_v2  }
   0x4   :  { %13 = vsyncpa [#allocation3], 0  ;;  %v37_v4 = vld [vmem:[%s4466_s1 + $0x28] sm:$0xff]  ;;  %v35_v5 = vld [vmem:[%s4466_s1 + $0x18] sm:$0xff]  ;;  %vm4474_vm4 = vcmask 523264   ;;  %s2210_s30 = sshll.u32 %s4473_s8, 4  ;;  %s2211_s30 = int_to_ptr.hbm [resolvable:$true] %s2210_s30 }
   0x5   :  { %v33_v6 = vld [vmem:[%s4466_s1 + $0x8] sm:$0xff]  ;;  %v40_v7 = vld [vmem:[%s4466_s1 + $0x40] sm:$0xff]  ;;  %v39_v8 = vld [vmem:[%s4466_s1 + $0x38] sm:$0xff]  ;;  %s2624_s10 = smov 8  }
   0x6   :  { %v38_v9 = vld [vmem:[%s4466_s1 + $0x30] sm:$0xff]  ;;  %v43_v10 = vld [vmem:[%s4466_s1 + $0x58] sm:$0xff]  ;;  %v41_v12 = vld [vmem:[%s4466_s1 + $0x48] sm:$0xff] }
   0x7   :  { %v42_v11 = vld [vmem:[%s4466_s1 + $0x50] sm:$0xff]  ;;  %v45_v14 = vld [vmem:[%s4466_s1 + $0x68] sm:$0xff]  ;;  %v44_v15 = vld [vmem:[%s4466_s1 + $0x60] sm:$0xff] }
   0x8   :  { %v46_v13 = vld [vmem:[%s4466_s1 + $0x70] sm:$0xff]  ;;  %v49_v16 = vld [vmem:[%s4466_s1 + $0x88] sm:$0xff]  ;;  %v48_v17 = vld [vmem:[%s4466_s1 + $0x80] sm:$0xff] }
   0x9   :  { %v47_v18 = vld [vmem:[%s4466_s1 + $0x78] sm:$0xff]  ;;  %v52_v19 = vld [vmem:[%s4466_s1 + $0xa0] sm:$0xff]  ;;  %v50_v21 = vld [vmem:[%s4466_s1 + $0x90] sm:$0xff] }
   0xa   :  { %128 = vperm.xlu2 %2550, %v37_v4   ;;  %v51_v20 = vld [vmem:[%s4466_s1 + $0x98] sm:$0xff]  ;;  %v54_v23 = vld [vmem:[%s4466_s1 + $0xb0] sm:$0xff]  ;;  %v53_v24 = vld [vmem:[%s4466_s1 + $0xa8] sm:$0xff] }
   0xb   :  { %122 = vperm.xlu1 %2549, %v35_v5   ;;  %116 = vperm.xlu0 %2548, %v33_v6   ;;  %v55_v22 = vld [vmem:[%s4466_s1 + $0xb8] sm:$0xff]  ;;  %v669_v25 = vld [vmem:[%s4468_s3 + $0x70] sm:$0xff]  ;;  %v57_v28 = vld [vmem:[%s4466_s1 + $0xc8] sm:$0xff] }
   0xc   :  { %v670_v26 = vld [vmem:[%s4468_s3 + $0x78] sm:$0xff]  ;;  %v685_v27 = vld [vmem:[%s4468_s3 + $0xf0] sm:$0xff]  ;;  %v56_v31 = vld [vmem:[%s4466_s1 + $0xc0] sm:$0xff] }
   0xd   :  { %v702_v29 = vpack.c.bf16 %v670_v26, %v669_v25  ;;  %v686_v30 = vld [vmem:[%s4468_s3 + $0xf8] sm:$0xff]  ;;  %v72_v32 = vld [vmem:[%s4467_s2] sm:$0xff]  ;;  %v668_v35 = vld [vmem:[%s4468_s3 + $0x68] sm:$0xff] }
   0xe   :  { %v710_v33 = vpack.c.bf16 %v686_v30, %v685_v27  ;;  %v667_v34 = vld [vmem:[%s4468_s3 + $0x60] sm:$0xff]  ;;  %v684_v37 = vld [vmem:[%s4468_s3 + $0xe8] sm:$0xff]  ;;  %v665_v40 = vld [vmem:[%s4468_s3 + $0x50] sm:$0xff] }
   0xf   :  { %776 = vmatpush.bf16.msra.mxu0 %v702_v29  ;;  %v683_v36 = vld [vmem:[%s4468_s3 + $0xe0] sm:$0xff]  ;;  %v701_v38 = vpack.c.bf16 %v668_v35, %v667_v34  ;;  %v666_v41 = vld [vmem:[%s4468_s3 + $0x58] sm:$0xff]  ;;  %v681_v42 = vld [vmem:[%s4468_s3 + $0xd0] sm:$0xff] }
  0x10   :  { %885 = vmatpush.bf16.msra.mxu1 %v710_v33  ;;  %v709_v39 = vpack.c.bf16 %v684_v37, %v683_v36  ;;  %v58_v43 = vld [vmem:[%s4466_s1 + $0xd0] sm:$0xff]  ;;  %v700_v44 = vpack.c.bf16 %v666_v41, %v665_v40  ;;  %v682_v45 = vld [vmem:[%s4468_s3 + $0xd8] sm:$0xff]  ;;  %v73_v47 = vld [vmem:[%s4467_s2 + $0x8] sm:$0xff] }
  0x11   :  { %v74_v46 = vld [vmem:[%s4467_s2 + $0x10] sm:$0xff]  ;;  %v708_v48 = vpack.c.bf16 %v682_v45, %v681_v42  ;;  %v663_v49 = vld [vmem:[%s4468_s3 + $0x40] sm:$0xff]  ;;  %v664_v50 = vld [vmem:[%s4468_s3 + $0x48] sm:$0xff] }
  0x12   :  { %137 = vperm.xlu2 %2550, %v40_v7   ;;  %v679_v51 = vld [vmem:[%s4468_s3 + $0xc0] sm:$0xff]  ;;  %v680_v52 = vld [vmem:[%s4468_s3 + $0xc8] sm:$0xff]  ;;  %v699_v53 = vpack.c.bf16 %v664_v50, %v663_v49  ;;  %v661_v56 = vld [vmem:[%s4468_s3 + $0x30] sm:$0xff] }
  0x13   :  { %134 = vperm.xlu1 %2549, %v39_v8   ;;  %131 = vperm.xlu0 %2548, %v38_v9   ;;  %v707_v54 = vpack.c.bf16 %v680_v52, %v679_v51  ;;  %v76_v55 = vld [vmem:[%s4467_s2 + $0x20] sm:$0xff]  ;;  %v662_v57 = vld [vmem:[%s4468_s3 + $0x38] sm:$0xff]  ;;  %v677_v58 = vld [vmem:[%s4468_s3 + $0xb0] sm:$0xff]  ;;  %v4493_v52 = vmov 0.0  }
  0x14   :  { %777 = vmatpush.bf16.msra.mxu0 %v701_v38  ;;  %886 = vmatpush.bf16.msra.mxu1 %v709_v39  ;;  %v698_v59 = vpack.c.bf16 %v662_v57, %v661_v56  ;;  %v678_v60 = vld [vmem:[%s4468_s3 + $0xb8] sm:$0xff]  ;;  %v693_v61 = vld [vmem:[%s4468_s3 + $0x130] sm:$0xff]  ;;  %v659_v3 = vld [vmem:[%s4468_s3 + $0x20] sm:$0xff]  ;;  %v4490_v57 = vmov 1.0|1.0  }
  0x15   :  { %v694_v62 = vld [vmem:[%s4468_s3 + $0x138] sm:$0xff]  ;;  %v706_v1 = vpack.c.bf16 %v678_v60, %v677_v58  ;;  %v660_v4 = vld [vmem:[%s4468_s3 + $0x28] sm:$0xff]  ;;  %v675_v5 = vld [vmem:[%s4468_s3 + $0xa0] sm:$0xff]  ;;  %v4577_v58 = vmov 0 }
  0x16   :  { %v75_v63 = vld [vmem:[%s4467_s2 + $0x18] sm:$0xff]  ;;  %v714_v2 = vpack.c.bf16 %v694_v62, %v693_v61  ;;  %v676_v6 = vld [vmem:[%s4468_s3 + $0xa8] sm:$0xff]  ;;  %v697_v7 = vpack.c.bf16 %v660_v4, %v659_v3  ;;  %v691_v9 = vld [vmem:[%s4468_s3 + $0x120] sm:$0xff] }
  0x17   :  { %v59_v0 = vld [vmem:[%s4466_s1 + $0xd8] sm:$0xff]  ;;  %v705_v8 = vpack.c.bf16 %v676_v6, %v675_v5  ;;  %v656_v25 = vld [vmem:[%s4468_s3 + $0x8] sm:$0xff]  ;;  %v671_v26 = vld [vmem:[%s4468_s3 + $0x80] sm:$0xff] }
  0x18   :  { %778 = vmatpush.bf16.msra.mxu0 %v700_v44  ;;  %887 = vmatpush.bf16.msra.mxu1 %v708_v48  ;;  %v672_v27 = vld [vmem:[%s4468_s3 + $0x88] sm:$0xff]  ;;  %v687_v30 = vld [vmem:[%s4468_s3 + $0x100] sm:$0xff]  ;;  %v63_v33 = vld [vmem:[%s4466_s1 + $0xf8] sm:$0xff] }
  0x19   :  { %998 = vmatpush.bf16.msra.mxu2 %v714_v2  ;;  %v703_v29 = vpack.c.bf16 %v672_v27, %v671_v26  ;;  %v62_v34 = vld [vmem:[%s4466_s1 + $0xf0] sm:$0xff]  ;;  %v64_v36 = vld [vmem:[%s4466_s1 + $0x100] sm:$0xff]  ;;  %v79_v38 = vld [vmem:[%s4467_s2 + $0x38] sm:$0xff] }
  0x1a   :  { %146 = vperm.xlu2 %2550, %v43_v10   ;;  %v692_v10 = vld [vmem:[%s4468_s3 + $0x128] sm:$0xff]  ;;  %v78_v35 = vld [vmem:[%s4467_s2 + $0x30] sm:$0xff]  ;;  %v80_v37 = vld [vmem:[%s4467_s2 + $0x40] sm:$0xff] }
  0x1b   :  { %143 = vperm.xlu1 %2549, %v42_v11   ;;  %140 = vperm.xlu0 %2548, %v41_v12   ;;  %v77_v11 = vld [vmem:[%s4467_s2 + $0x28] sm:$0xff]  ;;  %v713_v12 = vpack.c.bf16 %v692_v10, %v691_v9  ;;  %v82_v39 = vld [vmem:[%s4467_s2 + $0x50] sm:$0xff]  ;;  %v31_v42 = vld [vmem:[%s4465_s0] sm:$0x7] }
  0x1c   :  { %779 = vmatpush.bf16.msra.mxu0 %v699_v53  ;;  %888 = vmatpush.bf16.msra.mxu1 %v707_v54  ;;  %v81_v40 = vld [vmem:[%s4467_s2 + $0x48] sm:$0xff]  ;;  %v83_v44 = vld [vmem:[%s4467_s2 + $0x58] sm:$0xff]  ;;  %v2931_v45 = vperm.slane %v31_v42, 2  ;;  %v2939_v48 = vperm.slane %v31_v42, 0  ;;  %v2941_v49 = vperm.slane %v31_v42, 1  ;;  %v68_v60 = vld [vmem:[%s4466_s1 + $0x120] sm:$0xff] }
  0x1d   :  { %999 = vmatpush.bf16.msra.mxu2 %v713_v12  ;;  %v65_v41 = vld [vmem:[%s4466_s1 + $0x108] sm:$0xff]  ;;  %v84_v61 = vld [vmem:[%s4467_s2 + $0x60] sm:$0xff]  ;;  %v70_v62 = vld [vmem:[%s4466_s1 + $0x130] sm:$0xff] }
  0x1e   :  { %v69_v56 = vld [vmem:[%s4466_s1 + $0x128] sm:$0xff]  ;;  %v88_v6 = vld [vmem:[%s4467_s2 + $0x80] sm:$0xff]  ;;  %v87_v9 = vld [vmem:[%s4467_s2 + $0x78] sm:$0xff] }
  0x1f   :  { %v71_v10 = vld [vmem:[%s4466_s1 + $0x138] sm:$0xff]  ;;  %v90_v12 = vld [vmem:[%s4467_s2 + $0x90] sm:$0xff]  ;;  %v96_v26 = vld [vmem:[%s4467_s2 + $0xc0] sm:$0xff] }
  0x20   :  { %780 = vmatpush.bf16.msra.mxu0 %v698_v59  ;;  %889 = vmatpush.bf16.msra.mxu1 %v706_v1  ;;  %v95_v27 = vld [vmem:[%s4467_s2 + $0xb8] sm:$0xff] }
  0x22   :  { %155 = vperm.xlu2 %2550, %v46_v13   ;;  %v657_v13 = vld [vmem:[%s4468_s3 + $0x10] sm:$0xff] }
  0x23   :  { %152 = vperm.xlu1 %2549, %v45_v14   ;;  %149 = vperm.xlu0 %2548, %v44_v15   ;;  %v658_v14 = vld [vmem:[%s4468_s3 + $0x18] sm:$0xff]  ;;  %v673_v15 = vld [vmem:[%s4468_s3 + $0x90] sm:$0xff] }
  0x24   :  { %781 = vmatpush.bf16.msra.mxu0 %v697_v7  ;;  %890 = vmatpush.bf16.msra.mxu1 %v705_v8  ;;  %v4581_v7 = vmov 0 }
  0x2a   :  { %164 = vperm.xlu2 %2550, %v49_v16   ;;  %v696_v16 = vpack.c.bf16 %v658_v14, %v657_v13  ;;  %v89_v13 = vld [vmem:[%s4467_s2 + $0x88] sm:$0xff] }
  0x2b   :  { %161 = vperm.xlu1 %2549, %v48_v17   ;;  %158 = vperm.xlu0 %2548, %v47_v18   ;;  %v674_v17 = vld [vmem:[%s4468_s3 + $0x98] sm:$0xff]  ;;  %v689_v18 = vld [vmem:[%s4468_s3 + $0x110] sm:$0xff] }
  0x2c   :  { %782 = vmatpush.bf16.msra.mxu0 %v696_v16 }
  0x32   :  { %173 = vperm.xlu2 %2550, %v52_v19   ;;  %v690_v19 = vld [vmem:[%s4468_s3 + $0x118] sm:$0xff] }
  0x33   :  { %170 = vperm.xlu1 %2549, %v51_v20   ;;  %167 = vperm.xlu0 %2548, %v50_v21   ;;  %v61_v20 = vld [vmem:[%s4466_s1 + $0xe8] sm:$0xff]  ;;  %v60_v21 = vld [vmem:[%s4466_s1 + $0xe0] sm:$0xff] }
  0x3a   :  { %182 = vperm.xlu2 %2550, %v55_v22   ;;  %v704_v22 = vpack.c.bf16 %v674_v17, %v673_v15 }
  0x3b   :  { %179 = vperm.xlu1 %2549, %v54_v23   ;;  %176 = vperm.xlu0 %2548, %v53_v24   ;;  %v712_v23 = vpack.c.bf16 %v690_v19, %v689_v18  ;;  %v655_v24 = vld [vmem:[%s4468_s3] sm:$0xff]  ;;  %v94_v18 = vld [vmem:[%s4467_s2 + $0xb0] sm:$0xff]  ;;  %v4585_v19 = vmov 0 }
  0x3c   :  { %891 = vmatpush.bf16.msra.mxu1 %v704_v22  ;;  %v92_v22 = vld [vmem:[%s4467_s2 + $0xa0] sm:$0xff] }
  0x3d   :  { %1000 = vmatpush.bf16.msra.mxu2 %v712_v23 }
  0x40   :  { %892 = vmatpush.bf16.msra.mxu1 %v703_v29 }
  0x42   :  { %188 = vperm.xlu2 %2550, %v57_v28   ;;  %v695_v28 = vpack.c.bf16 %v656_v25, %v655_v24  ;;  %v97_v25 = vld [vmem:[%s4467_s2 + $0xc8] sm:$0xff] }
  0x43   :  { %185 = vperm.xlu1 %2549, %v56_v31   ;;  %1105 = vperm.xlu0 %2548, %v72_v32   ;;  %v688_v31 = vld [vmem:[%s4468_s3 + $0x108] sm:$0xff] }
  0x44   :  { %v711_v32 = vpack.c.bf16 %v688_v31, %v687_v30  ;;  %783 = vmatpush.bf16.msra.mxu0 %v695_v28  ;;  %v100_v31 = vld [vmem:[%s4467_s2 + $0xe0] sm:$0xff] }
  0x46   :  { %1001 = vmatpush.bf16.msra.mxu2 %v711_v32  ;;  %v4589_v32 = vmov 0 }
  0x4a   :  { %191 = vperm.xlu2 %2550, %v58_v43  }
  0x4b   :  { %1115 = vperm.xlu1 %2549, %v74_v46   ;;  %1110 = vperm.xlu0 %2548, %v73_v47   ;;  %v67_v46 = vld [vmem:[%s4466_s1 + $0x118] sm:$0xff]  ;;  %v66_v47 = vld [vmem:[%s4466_s1 + $0x110] sm:$0xff]  ;;  %s2622_s1 = smov [#allocation2]  }
  0x4c   :  { %s2208_s0 = sshll.u32 %s2622_s1, 4  ;;  %s2209_s0 = int_to_ptr.vmem [resolvable:$true] %s2208_s0 }
  0x52   :  { %1125 = vperm.xlu2 %2550, %v76_v55  }
  0x53   :  { %1120 = vperm.xlu1 %2549, %v75_v63   ;;  %194 = vperm.xlu0 %2548, %v59_v0   ;;  %v86_v63 = vld [vmem:[%s4467_s2 + $0x70] sm:$0xff]  ;;  %v85_v0 = vld [vmem:[%s4467_s2 + $0x68] sm:$0xff] }
  0x5a   :  { %1130 = vperm.xlu2 %2550, %v77_v11   ;;  %v91_v11 = vld [vmem:[%s4467_s2 + $0x98] sm:$0xff] }
  0x5b   :  { %200 = vperm.xlu1 %2549, %v61_v20   ;;  %197 = vperm.xlu0 %2548, %v60_v21   ;;  %v93_v21 = vld [vmem:[%s4467_s2 + $0xa8] sm:$0xff] }
  0x5c   :  { %v126_v4 = vpop.permute.xlu2 %125 }
  0x62   :  { %206 = vperm.xlu2 %2550, %v63_v33  }
  0x63   :  { %203 = vperm.xlu1 %2549, %v62_v34   ;;  %1135 = vperm.xlu0 %2548, %v78_v35   ;;  %v99_v34 = vld [vmem:[%s4467_s2 + $0xd8] sm:$0xff]  ;;  %v98_v35 = vld [vmem:[%s4467_s2 + $0xd0] sm:$0xff] }
  0x64   :  { %v129_v14 = vpop.permute.xlu2 %128 }
  0x6a   :  { %209 = vperm.xlu2 %2550, %v64_v36  }
  0x6b   :  { %1145 = vperm.xlu1 %2549, %v80_v37   ;;  %1140 = vperm.xlu0 %2548, %v79_v38   ;;  %v103_v37 = vld [vmem:[%s4467_s2 + $0xf8] sm:$0xff]  ;;  %v102_v38 = vld [vmem:[%s4467_s2 + $0xf0] sm:$0xff] }
  0x72   :  { %1155 = vperm.xlu2 %2550, %v82_v39   ;;  %v101_v39 = vld [vmem:[%s4467_s2 + $0xe8] sm:$0xff] }
  0x73   :  { %1150 = vperm.xlu1 %2549, %v81_v40   ;;  %212 = vperm.xlu0 %2548, %v65_v41   ;;  %v138_v40 = vpop.permute.xlu2 %137 }
  0x75   :  { %v114_v43 = vpop.permute.xlu0 %113  ;;  %v120_v51 = vpop.permute.xlu1 %119 }
  0x76   :  { %vm237_vm0 = vcmp.eq.s32.totalorder %v114_v43, %v2931_v45  ;;  %vm235_vm2 = vcmp.eq.s32.totalorder %v114_v43, %v2939_v48  ;;  %vm236_vm6 = vcmp.eq.s32.totalorder %v114_v43, %v2941_v49  ;;  %vm243_vm9 = vcmp.eq.s32.totalorder %v120_v51, %v2931_v45 }
  0x77   :  { %v2224_v53 = vsel %vm237_vm0, 1.0, %v4493_v52  ;;  %vm241_vm11 = vcmp.eq.s32.totalorder %v120_v51, %v2939_v48  ;;  %v2230_v2 = vsel %vm243_vm9, 1.0, %v4493_v52  ;;  %vm242_vm13 = vcmp.eq.s32.totalorder %v120_v51, %v2941_v49  ;;  %v104_v51 = vld [vmem:[%s4467_s2 + $0x100] sm:$0xff] }
  0x78   :  { %vm251_vm9 = vcmp.eq.s32.totalorder %v129_v14, %v2941_v49 }
  0x7a   :  { %1160 = vperm.xlu2 %2550, %v83_v44   ;;  %v106_v44 = vld [vmem:[%s4467_s2 + $0x110] sm:$0xff] }
  0x7b   :  { %218 = vperm.xlu1 %2549, %v67_v46   ;;  %215 = vperm.xlu0 %2548, %v66_v47   ;;  %v4593_v46 = vmov 0 }
  0x7d   :  { %v117_v50 = vpop.permute.xlu0 %116  ;;  %v123_v1 = vpop.permute.xlu1 %122 }
  0x7e   :  { %vm240_vm1 = vcmp.eq.s32.totalorder %v117_v50, %v2931_v45  ;;  %vm238_vm3 = vcmp.eq.s32.totalorder %v117_v50, %v2939_v48  ;;  %vm239_vm7 = vcmp.eq.s32.totalorder %v117_v50, %v2941_v49  ;;  %vm246_vm10 = vcmp.eq.s32.totalorder %v123_v1, %v2931_v45  ;;  %v105_v50 = vld [vmem:[%s4467_s2 + $0x108] sm:$0xff] }
  0x7f   :  { %v2227_v54 = vsel %vm240_vm1, 1.0, %v4493_v52  ;;  %vm2949_vm5 = vmpackc.low %vm238_vm3, %vm235_vm2  ;;  %vm244_vm12 = vcmp.eq.s32.totalorder %v123_v1, %v2939_v48  ;;  %v2233_v3 = vsel %vm246_vm10, 1.0, %v4493_v52  ;;  %vm245_vm14 = vcmp.eq.s32.totalorder %v123_v1, %v2941_v49 }
  0x80   :  { %2343 = vmatmul.msk.bf16.vlgmr.msra.gmra.mxu0 %vm2949_vm5, %v4490_v57  ;;  %vm2961_vm8 = vmpackc.low %vm239_vm7, %vm236_vm6  ;;  %v2965_v59 = vpack.c.bf16 %v2227_v54, %v2224_v53  ;;  %v3009_v8 = vpack.c.bf16 %v2233_v3, %v2230_v2  ;;  %vm249_vm1 = vcmp.eq.s32.totalorder %v126_v4, %v2931_v45  ;;  %vm252_vm2 = vcmp.eq.s32.totalorder %v129_v14, %v2931_v45  ;;  %v109_v54 = vld [vmem:[%s4467_s2 + $0x128] sm:$0xff] }
  0x81   :  { %v4578_v58 = vsel %vm2961_vm8, 4294967295, %v4577_v58  ;;  %2383 = vmatmul.msk.bf16.vlgmr.msra.gmra.mxu1 %vm2961_vm8, %v4490_v57  ;;  %vm2995_vm15 = vmpackc.low %vm244_vm12, %vm241_vm11  ;;  %vm247_vm3 = vcmp.eq.s32.totalorder %v126_v4, %v2939_v48  ;;  %vm250_vm6 = vcmp.eq.s32.totalorder %v129_v14, %v2939_v48  ;;  %v2236_v15 = vsel %vm249_vm1, 1.0, %v4493_v52 }
  0x82   :  { %2422 = vmatmul.msk.bf16.vlgmr.msra.gmra.mxu2 %vm4474_vm4, %v2965_v59  ;;  %224 = vperm.xlu2 %2550, %v69_v56   ;;  %vm3005_vm0 = vmpackc.low %vm245_vm14, %vm242_vm13  ;;  %v2239_v16 = vsel %vm252_vm2, 1.0, %v4493_v52  ;;  %vm248_vm7 = vcmp.eq.s32.totalorder %v126_v4, %v2941_v49  ;;  %v108_v56 = vld [vmem:[%s4467_s2 + $0x120] sm:$0xff]  ;;  %v4598_v3 = vmov 0 }
  0x83   :  { %221 = vperm.xlu1 %2549, %v68_v60   ;;  %1165 = vperm.xlu0 %2548, %v84_v61   ;;  %v4582_v7 = vsel %vm3005_vm0, 4294967295, %v4581_v7  ;;  %vm3039_vm10 = vmpackc.low %vm250_vm6, %vm247_vm3  ;;  %v3053_v20 = vpack.c.bf16 %v2239_v16, %v2236_v15  ;;  %v107_v60 = vld [vmem:[%s4467_s2 + $0x118] sm:$0xff]  ;;  %v1352_v16 = vld [vmem:[%s4469_s4 + $0x48] sm:$0xff] }
  0x84   :  { %vm3049_vm11 = vmpackc.low %vm251_vm9, %vm248_vm7  ;;  %vm261_vm9 = vcmp.eq.s32.totalorder %v138_v40, %v2931_v45  ;;  %v1358_v61 = vld [vmem:[%s4469_s4 + $0x78] sm:$0xff] }
  0x85   :  { %v4586_v19 = vsel %vm3049_vm11, 4294967295, %v4585_v19  ;;  %v135_v23 = vpop.permute.xlu1 %134  ;;  %v132_v24 = vpop.permute.xlu0 %131  ;;  %v2248_v41 = vsel %vm261_vm9, 1.0, %v4493_v52  ;;  %vm4595_vm9 = vcmask 523264   ;;  %1363 = vmatpush.msra.mxu3 %v1358_v61 }
  0x86   :  { %vm258_vm12 = vcmp.eq.s32.totalorder %v135_v23, %v2931_v45  ;;  %vm255_vm13 = vcmp.eq.s32.totalorder %v132_v24, %v2931_v45  ;;  %vm253_vm14 = vcmp.eq.s32.totalorder %v132_v24, %v2939_v48  ;;  %vm256_vm1 = vcmp.eq.s32.totalorder %v135_v23, %v2939_v48 }
  0x87   :  { %v2245_v28 = vsel %vm258_vm12, 1.0, %v4493_v52  ;;  %v2242_v29 = vsel %vm255_vm13, 1.0, %v4493_v52  ;;  %vm254_vm2 = vcmp.eq.s32.totalorder %v132_v24, %v2941_v49  ;;  %vm257_vm3 = vcmp.eq.s32.totalorder %v135_v23, %v2941_v49  ;;  %vm3083_vm6 = vmpackc.low %vm256_vm1, %vm253_vm14  ;;  %v1349_v24 = vld [vmem:[%s4469_s4 + $0x30] sm:$0xff] }
  0x88   :  { %vm3093_vm7 = vmpackc.low %vm257_vm3, %vm254_vm2  ;;  %v3097_v33 = vpack.c.bf16 %v2245_v28, %v2242_v29  ;;  %vm259_vm13 = vcmp.eq.s32.totalorder %v138_v40, %v2939_v48  ;;  %vm260_vm1 = vcmp.eq.s32.totalorder %v138_v40, %v2941_v49  ;;  %v1347_v29 = vld [vmem:[%s4469_s4 + $0x20] sm:$0xff] }
  0x89   :  { %v4590_v32 = vsel %vm3093_vm7, 4294967295, %v4589_v32 }
  0x8a   :  { %227 = vperm.xlu2 %2550, %v70_v62   ;;  %v147_v62 = vpop.permute.xlu2 %146 }
  0x8b   :  { %1175 = vperm.xlu1 %2549, %v86_v63   ;;  %1170 = vperm.xlu0 %2548, %v85_v0   ;;  %v1357_v63 = vld [vmem:[%s4469_s4 + $0x70] sm:$0xff] }
  0x8c   :  { %1364 = vmatpush.msra.mxu3 %v1357_v63 }
  0x8d   :  { %v141_v36 = vpop.permute.xlu0 %140  ;;  %v144_v53 = vpop.permute.xlu1 %143 }
  0x8e   :  { %vm264_vm12 = vcmp.eq.s32.totalorder %v141_v36, %v2931_v45  ;;  %vm262_vm14 = vcmp.eq.s32.totalorder %v141_v36, %v2939_v48  ;;  %vm263_vm2 = vcmp.eq.s32.totalorder %v141_v36, %v2941_v49  ;;  %v1344_v36 = vld [vmem:[%s4469_s4 + $0x8] sm:$0xff] }
  0x8f   :  { %v2251_v42 = vsel %vm264_vm12, 1.0, %v4493_v52  ;;  %vm3127_vm3 = vmpackc.low %vm262_vm14, %vm259_vm13  ;;  %vm270_vm12 = vcmp.eq.s32.totalorder %v147_v62, %v2931_v45  ;;  %vm267_vm13 = vcmp.eq.s32.totalorder %v144_v53, %v2931_v45  ;;  %vm265_vm14 = vcmp.eq.s32.totalorder %v144_v53, %v2939_v48 }
  0x90   :  { %2345 = vmatmul.msk.bf16.gmra.mxu0 %vm2995_vm15, %v4490_v57  ;;  %v3141_v47 = vpack.c.bf16 %v2251_v42, %v2248_v41  ;;  %v2257_v0 = vsel %vm270_vm12, 1.0, %v4493_v52  ;;  %v2254_v1 = vsel %vm267_vm13, 1.0, %v4493_v52  ;;  %vm4600_vm12 = vcmask 523264  }
  0x91   :  { %2385 = vmatmul.msk.bf16.gmra.mxu1 %vm3005_vm0, %v4490_v57  ;;  %v3188_v4 = vpack.c.bf16 %v2257_v0, %v2254_v1 }
  0x92   :  { %2423 = vmatmul.msk.bf16.gmra.mxu2 %vm4474_vm4, %v3009_v8  ;;  %1185 = vperm.xlu2 %2550, %v88_v6   ;;  %v111_v6 = vld [vmem:[%s4467_s2 + $0x138] sm:$0xff] }
  0x93   :  { %1180 = vperm.xlu1 %2549, %v87_v9   ;;  %230 = vperm.xlu0 %2548, %v71_v10   ;;  %v110_v9 = vld [vmem:[%s4467_s2 + $0x130] sm:$0xff]  ;;  %v1356_v10 = vld [vmem:[%s4469_s4 + $0x68] sm:$0xff] }
  0x94   :  { %1365 = vmatpush.msra.mxu3 %v1356_v10 }
  0x95   :  { %v153_v14 = vpop.permute.xlu1 %152  ;;  %v150_v15 = vpop.permute.xlu0 %149 }
  0x96   :  { %vm276_vm13 = vcmp.eq.s32.totalorder %v153_v14, %v2931_v45 }
  0x9a   :  { %1200 = vperm.xlu2 %2550, %v91_v11   ;;  %v1355_v11 = vld [vmem:[%s4469_s4 + $0x60] sm:$0xff] }
  0x9b   :  { %1195 = vperm.xlu1 %2549, %v90_v12   ;;  %1190 = vperm.xlu0 %2548, %v89_v13   ;;  %v1354_v12 = vld [vmem:[%s4469_s4 + $0x58] sm:$0xff]  ;;  %v1353_v13 = vld [vmem:[%s4469_s4 + $0x50] sm:$0xff] }
  0x9c   :  { %1366 = vmatpush.msra.mxu3 %v1355_v11 }
  0x9d   :  { %v162_v41 = vpop.permute.xlu1 %161 }
  0x9e   :  { %1367 = vmatpush.msra.mxu3 %v1354_v12 }
  0xa0   :  { %2347 = vmatmul.msk.bf16.gmra.mxu0 %vm3039_vm10, %v4490_v57  ;;  %1368 = vmatpush.msra.mxu3 %v1353_v13 }
  0xa1   :  { %2387 = vmatmul.msk.bf16.gmra.mxu1 %vm3049_vm11, %v4490_v57 }
  0xa2   :  { %2424 = vmatmul.msk.bf16.gmra.mxu2 %vm4474_vm4, %v3053_v20  ;;  %1215 = vperm.xlu2 %2550, %v94_v18   ;;  %v1351_v18 = vld [vmem:[%s4469_s4 + $0x40] sm:$0xff] }
  0xa3   :  { %1210 = vperm.xlu1 %2549, %v93_v21   ;;  %1205 = vperm.xlu0 %2548, %v92_v22   ;;  %v1350_v21 = vld [vmem:[%s4469_s4 + $0x38] sm:$0xff]  ;;  %v2263_v22 = vsel %vm276_vm13, 1.0, %v4493_v52 }
  0xa4   :  { %1369 = vmatpush.msra.mxu3 %v1352_v16 }
  0xa6   :  { %1370 = vmatpush.msra.mxu3 %v1351_v18 }
  0xa8   :  { %1371 = vmatpush.msra.mxu3 %v1350_v21 }
  0xaa   :  { %1230 = vperm.xlu2 %2550, %v97_v25   ;;  %1372 = vmatpush.msra.mxu3 %v1349_v24 }
  0xab   :  { %1225 = vperm.xlu1 %2549, %v96_v26   ;;  %1220 = vperm.xlu0 %2548, %v95_v27   ;;  %v1348_v26 = vld [vmem:[%s4469_s4 + $0x28] sm:$0xff]  ;;  %v4603_v27 = vmov 0 }
  0xac   :  { %1373 = vmatpush.msra.mxu3 %v1348_v26 }
  0xae   :  { %1374 = vmatpush.msra.mxu3 %v1347_v29 }
  0xb0   :  { %2349 = vmatmul.msk.bf16.gmra.mxu0 %vm3083_vm6, %v4490_v57 }
  0xb1   :  { %2389 = vmatmul.msk.bf16.gmra.mxu1 %vm3093_vm7, %v4490_v57 }
  0xb2   :  { %2425 = vmatmul.msk.bf16.gmra.mxu2 %vm4474_vm4, %v3097_v33  ;;  %1245 = vperm.xlu2 %2550, %v100_v31   ;;  %vm3137_vm4 = vmpackc.low %vm263_vm2, %vm260_vm1  ;;  %vm268_vm1 = vcmp.eq.s32.totalorder %v147_v62, %v2939_v48  ;;  %vm266_vm2 = vcmp.eq.s32.totalorder %v144_v53, %v2941_v49  ;;  %v1346_v31 = vld [vmem:[%s4469_s4 + $0x18] sm:$0xff] }
  0xb3   :  { %1240 = vperm.xlu1 %2549, %v99_v34   ;;  %1235 = vperm.xlu0 %2548, %v98_v35   ;;  %v4594_v46 = vsel %vm3137_vm4, 4294967295, %v4593_v46  ;;  %v1345_v34 = vld [vmem:[%s4469_s4 + $0x10] sm:$0xff]  ;;  %v159_v35 = vpop.permute.xlu0 %158 }
  0xb4   :  { %1375 = vmatpush.msra.mxu3 %v1346_v31 }
  0xb6   :  { %1376 = vmatpush.msra.mxu3 %v1345_v34 }
  0xb8   :  { %1377 = vmatpush.msra.mxu3 %v1344_v36 }
  0xba   :  { %1260 = vperm.xlu2 %2550, %v103_v37   ;;  %v1343_v37 = vld [vmem:[%s4469_s4] sm:$0xff] }
  0xbb   :  { %1255 = vperm.xlu1 %2549, %v102_v38   ;;  %1250 = vperm.xlu0 %2548, %v101_v39   ;;  %v156_v38 = vpop.permute.xlu2 %155 }
  0xbc   :  { %1378 = vmatpush.msra.mxu3 %v1343_v37  ;;  %vm278_vm11 = vcmp.eq.s32.totalorder %v156_v38, %v2941_v49  ;;  %v4622_v37 = vmov 0 }
  0xc0   :  { %2351 = vmatmul.msk.bf16.gmra.mxu0 %vm3127_vm3, %v4490_v57 }
  0xc1   :  { %2391 = vmatmul.msk.bf16.gmra.mxu1 %vm3137_vm4, %v4490_v57  ;;  %vm3177_vm4 = vmpackc.low %vm268_vm1, %vm265_vm14  ;;  %vm273_vm14 = vcmp.eq.s32.totalorder %v150_v15, %v2931_v45  ;;  %vm271_vm1 = vcmp.eq.s32.totalorder %v150_v15, %v2939_v48 }
  0xc2   :  { %2426 = vmatmul.msk.bf16.gmra.mxu2 %vm4595_vm9, %v3141_v47  ;;  %1275 = vperm.xlu2 %2550, %v106_v44   ;;  %vm269_vm9 = vcmp.eq.s32.totalorder %v147_v62, %v2941_v49  ;;  %v2260_v23 = vsel %vm273_vm14, 1.0, %v4493_v52  ;;  %vm4606_vm14 = vcmask 523264   ;;  %v4609_v44 = vmov 0 }
  0xc3   :  { %1270 = vperm.xlu1 %2549, %v105_v50   ;;  %1265 = vperm.xlu0 %2548, %v104_v51   ;;  %vm3184_vm7 = vmpackc.low %vm269_vm9, %vm266_vm2  ;;  %vm274_vm2 = vcmp.eq.s32.totalorder %v153_v14, %v2939_v48  ;;  %vm272_vm9 = vcmp.eq.s32.totalorder %v150_v15, %v2941_v49  ;;  %v3247_v28 = vpack.c.bf16 %v2263_v22, %v2260_v23  ;;  %v168_v51 = vpop.permute.xlu0 %167  ;;  %v165_v53 = vpop.permute.xlu2 %164 }
  0xc4   :  { %v4599_v3 = vsel %vm3184_vm7, 4294967295, %v4598_v3 }
  0xc5   :  { %4605 = vst [vmem:[#allocation5_spill] sm:$0xff] %v3247_v28 }
  0xca   :  { %1290 = vperm.xlu2 %2550, %v109_v54   ;;  %v171_v54 = vpop.permute.xlu1 %170 }
  0xcb   :  { %1285 = vperm.xlu1 %2549, %v108_v56   ;;  %1280 = vperm.xlu0 %2548, %v107_v60   ;;  %v3299_v60 = vpop.permute.xlu0 %176  ;;  %v3304_v0 = vpop.permute.xlu2 %173 }
  0xd0   :  { %2353 = vmatmul.msk.bf16.gmra.mxu0 %vm3177_vm4, %v4490_v57 }
  0xd1   :  { %2393 = vmatmul.msk.bf16.gmra.mxu1 %vm3184_vm7, %v4490_v57  ;;  %vm3233_vm7 = vmpackc.low %vm274_vm2, %vm271_vm1  ;;  %vm282_vm1 = vcmp.eq.s32.totalorder %v159_v35, %v2931_v45  ;;  %vm279_vm2 = vcmp.eq.s32.totalorder %v156_v38, %v2931_v45 }
  0xd2   :  { %2427 = vmatmul.msk.bf16.gmra.mxu2 %vm4600_vm12, %v3188_v4  ;;  %vm275_vm12 = vcmp.eq.s32.totalorder %v153_v14, %v2941_v49  ;;  %v2269_v39 = vsel %vm282_vm1, 1.0, %v4493_v52  ;;  %v2266_v40 = vsel %vm279_vm2, 1.0, %v4493_v52  ;;  %vm4612_vm1 = vcmask 523264   ;;  %v3325_v10 = vpop.permute.xlu1 %179 }
  0xd3   :  { %1300 = vperm.xlu1 %2549, %v111_v6   ;;  %1295 = vperm.xlu0 %2548, %v110_v9   ;;  %vm3243_vm13 = vmpackc.low %vm275_vm12, %vm272_vm9  ;;  %vm280_vm9 = vcmp.eq.s32.totalorder %v159_v35, %v2939_v48  ;;  %vm281_vm12 = vcmp.eq.s32.totalorder %v159_v35, %v2941_v49  ;;  %v3288_v50 = vpack.c.bf16 %v2269_v39, %v2266_v40  ;;  %v4615_v6 = vmov 0  ;;  %v3327_v14 = vpop.permute.xlu0 %1105  ;;  %v3329_v18 = vpop.permute.xlu2 %182 }
  0xd4   :  { %v4604_v27 = vsel %vm3243_vm13, 4294967295, %v4603_v27  ;;  %vm3284_vm0 = vmpackc.low %vm281_vm12, %vm278_vm11  ;;  %vm285_vm2 = vcmp.eq.s32.totalorder %v162_v41, %v2931_v45  ;;  %vm283_vm11 = vcmp.eq.s32.totalorder %v162_v41, %v2939_v48  ;;  %vm284_vm12 = vcmp.eq.s32.totalorder %v162_v41, %v2941_v49  ;;  %4619 = vst [vmem:[#allocation8_spill] sm:$0xff] %v3327_v14 }
  0xd5   :  { %v4610_v44 = vsel %vm3284_vm0, 4294967295, %v4609_v44  ;;  %4611 = vst [vmem:[#allocation6_spill] sm:$0xff] %v3288_v50  ;;  %v2272_v56 = vsel %vm285_vm2, 1.0, %v4493_v52  ;;  %v4620_v35 = vmov 0 }
  0xda   :  { %v3338_v24 = vpop.permute.xlu1 %185 }
  0xdb   :  { %v3355_v39 = vpop.permute.xlu0 %1110  ;;  %v3363_v41 = vpop.permute.xlu2 %188 }
  0xdc   :  { %4626 = vst [vmem:[#allocation11_spill] sm:$0xff] %v3355_v39 }
  0xe0   :  { %2355 = vmatmul.msk.bf16.gmra.mxu0 %vm3233_vm7, %v4490_v57 }
  0xe1   :  { %2395 = vmatmul.msk.bf16.gmra.mxu1 %vm3243_vm13, %v4490_v57 }
  0xe2   :  { %2428 = vmatmul.msk.bf16.gmra.mxu2 %vm4606_vm14, %v3247_v28  ;;  %vm277_vm14 = vcmp.eq.s32.totalorder %v156_v38, %v2939_v48 }
  0xe3   :  { %vm3276_vm13 = vmpackc.low %vm280_vm9, %vm277_vm14  ;;  %vm288_vm9 = vcmp.eq.s32.totalorder %v165_v53, %v2931_v45  ;;  %vm286_vm14 = vcmp.eq.s32.totalorder %v165_v53, %v2939_v48 }
  0xe4   :  { %v2275_v63 = vsel %vm288_vm9, 1.0, %v4493_v52  ;;  %vm4618_vm9 = vcmask 523264  }
  0xe5   :  { %v3318_v9 = vpack.c.bf16 %v2275_v63, %v2272_v56  ;;  %v3365_v56 = vpop.permute.xlu1 %1115 }
  0xe6   :  { %4628 = vst [vmem:[#allocation12_spill] sm:$0xff] %v3365_v56 }
  0xe7   :  { %4617 = vst [vmem:[#allocation7_spill] sm:$0xff] %v3318_v9 }
  0xf0   :  { %2357 = vmatmul.msk.bf16.gmra.mxu0 %vm3276_vm13, %v4490_v57 }
  0xf1   :  { %2397 = vmatmul.msk.bf16.gmra.mxu1 %vm3284_vm0, %v4490_v57  ;;  %vm287_vm0 = vcmp.eq.s32.totalorder %v165_v53, %v2941_v49 }
  0xf2   :  { %2429 = vmatmul.msk.bf16.gmra.mxu2 %vm4612_vm1, %v3288_v50  ;;  %vm3306_vm1 = vmpackc.low %vm286_vm14, %vm283_vm11  ;;  %vm291_vm11 = vcmp.eq.s32.totalorder %v168_v51, %v2931_v45  ;;  %vm292_vm14 = vcmp.eq.s32.totalorder %v171_v54, %v2939_v48 }
  0xf3   :  { %vm3314_vm2 = vmpackc.low %vm287_vm0, %vm284_vm12  ;;  %vm294_vm0 = vcmp.eq.s32.totalorder %v171_v54, %v2931_v45  ;;  %vm289_vm12 = vcmp.eq.s32.totalorder %v168_v51, %v2939_v48  ;;  %v2278_v23 = vsel %vm291_vm11, 1.0, %v4493_v52  ;;  %vm4627_vm11 = vcmask 523264  }
  0xf4   :  { %v4616_v6 = vsel %vm3314_vm2, 4294967295, %v4615_v6  ;;  %v2281_v22 = vsel %vm294_vm0, 1.0, %v4493_v52  ;;  %vm3342_vm8 = vmpackc.low %vm292_vm14, %vm289_vm12  ;;  %vm297_vm12 = vcmp.eq.s32.totalorder %v3304_v0, %v2931_v45  ;;  %vm298_vm14 = vcmp.eq.s32.totalorder %v3299_v60, %v2939_v48 }
  0xf5   :  { %v4621_v35 = vsel %vm3342_vm8, 4294967295, %v4620_v35  ;;  %v3353_v38 = vpack.c.bf16 %v2281_v22, %v2278_v23  ;;  %v4629_v23 = vmov 0 }
  0xf7   :  { %4625 = vst [vmem:[#allocation10_spill] sm:$0xff] %v3353_v38 }
  0xfd   :  { %v785_v61 = vpop.f32.mrf.mxu0 }
  0xfe   :  { %v894_v62 = vpop.f32.mrf.mxu1 }
  0xff   :  { %v895_v11 = vadd.f32 %v894_v62, %v785_v61 }
 0x100   :  { %2359 = vmatmul.msk.bf16.gmra.mxu0 %vm3306_vm1, %v4490_v57 }
 0x101   :  { %2399 = vmatmul.msk.bf16.gmra.mxu1 %vm3314_vm2, %v4490_v57  ;;  %vm293_vm2 = vcmp.eq.s32.totalorder %v171_v54, %v2941_v49 }
 0x102   :  { %2430 = vmatmul.msk.bf16.gmra.mxu2 %vm4618_vm9, %v3318_v9  ;;  %vm290_vm9 = vcmp.eq.s32.totalorder %v168_v51, %v2941_v49 }
 0x103   :  { %vm3349_vm0 = vmpackc.low %vm293_vm2, %vm290_vm9  ;;  %vm300_vm2 = vcmp.eq.s32.totalorder %v3299_v60, %v2931_v45  ;;  %vm299_vm9 = vcmp.eq.s32.totalorder %v3299_v60, %v2941_v49  ;;  %v4631_v60 = vmov 0 }
 0x104   :  { %v4623_v37 = vsel %vm3349_vm0, 4294967295, %v4622_v37 }
 0x105   :  { %v787_v12 = vpop.f32.mrf.mxu0  ;;  %v1003_v15 = vpop.f32.mrf.mxu2  ;;  %4624 = vst [vmem:[#allocation9_spill] sm:$0xff] %v4623_v37 }
 0x106   :  { %v896_v13 = vpop.f32.mrf.mxu1  ;;  %v1004_v16 = vadd.f32 %v1003_v15, %v895_v11  ;;  %v3374_v11 = vpop.permute.xlu2 %191 }
 0x107   :  { %v897_v26 = vadd.f32 %v896_v13, %v787_v12  ;;  %v2287_v12 = vsel %vm300_vm2, 1.0, %v4493_v52 }
 0x108   :  { %v1303_v21 = vmul.f32 %v3327_v14, %v1004_v16 }
 0x10a   :  { %1379 = vmatmul.f32.vlgmr.msra.gmra.mxu3 %v1303_v21  ;;  %v2284_v21 = vsel %vm297_vm12, 1.0, %v4493_v52  ;;  %vm4636_vm12 = vcmask 523264  }
 0x10d   :  { %v790_v29 = vpop.f32.mrf.mxu0  ;;  %v1005_v34 = vpop.f32.mrf.mxu2 }
 0x10e   :  { %v899_v31 = vpop.f32.mrf.mxu1  ;;  %v1006_v36 = vadd.f32 %v1005_v34, %v897_v26  ;;  %v3405_v34 = vpop.permute.xlu0 %194 }
 0x10f   :  { %v900_v51 = vadd.f32 %v899_v31, %v790_v29  ;;  %v3395_v29 = vpack.c.bf16 %v2287_v12, %v2284_v21  ;;  %v3397_v31 = vpop.permute.xlu1 %1120 }
 0x110   :  { %2361 = vmatmul.msk.bf16.gmra.mxu0 %vm3342_vm8, %v4490_v57  ;;  %v1304_v40 = vmul.f32 %v3355_v39, %v1006_v36  ;;  %vm296_vm8 = vcmp.eq.s32.totalorder %v3304_v0, %v2941_v49  ;;  %4635 = vst [vmem:[#allocation15_spill] sm:$0xff] %v3397_v31 }
 0x111   :  { %2401 = vmatmul.msk.bf16.gmra.mxu1 %vm3349_vm0, %v4490_v57  ;;  %vm3391_vm2 = vmpackc.low %vm299_vm9, %vm296_vm8  ;;  %4634 = vst [vmem:[#allocation14_spill] sm:$0xff] %v3395_v29  ;;  %vm303_vm8 = vcmp.eq.s32.totalorder %v3325_v10, %v2931_v45  ;;  %vm301_vm9 = vcmp.eq.s32.totalorder %v3325_v10, %v2939_v48 }
 0x112   :  { %2431 = vmatmul.msk.bf16.gmra.mxu2 %vm4627_vm11, %v3353_v38  ;;  %1382 = vmatmul.f32.gmra.mxu3 %v1304_v40  ;;  %vm295_vm11 = vcmp.eq.s32.totalorder %v3304_v0, %v2939_v48  ;;  %v4632_v60 = vsel %vm3391_vm2, 4294967295, %v4631_v60 }
 0x113   :  { %vm3382_vm0 = vmpackc.low %vm298_vm14, %vm295_vm11  ;;  %4633 = vst [vmem:[#allocation13_spill] sm:$0xff] %v4632_v60  ;;  %vm306_vm14 = vcmp.eq.s32.totalorder %v3329_v18, %v2931_v45  ;;  %vm302_vm11 = vcmp.eq.s32.totalorder %v3325_v10, %v2941_v49  ;;  %v4640_v10 = vmov 0 }
 0x114   :  { %v4630_v23 = vsel %vm3382_vm0, 4294967295, %v4629_v23  ;;  %v2293_v21 = vsel %vm306_vm14, 1.0, %v4493_v52  ;;  %vm4645_vm14 = vcmask 523264  }
 0x115   :  { %v792_v53 = vpop.f32.mrf.mxu0  ;;  %v1008_v61 = vpop.f32.mrf.mxu2 }
 0x116   :  { %v901_v54 = vpop.f32.mrf.mxu1  ;;  %v1009_v62 = vadd.f32 %v1008_v61, %v900_v51  ;;  %v3417_v12 = vpop.permute.xlu0 %197 }
 0x117   :  { %v902_v13 = vadd.f32 %v901_v54, %v792_v53  ;;  %v3407_v53 = vpop.permute.xlu2 %1125 }
 0x118   :  { %v1305_v63 = vmul.f32 %v3365_v56, %v1009_v62  ;;  %4637 = vst [vmem:[#allocation16_spill] sm:$0xff] %v3407_v53 }
 0x11a   :  { %1385 = vmatmul.f32.gmra.mxu3 %v1305_v63  ;;  %v2290_v63 = vsel %vm303_vm8, 1.0, %v4493_v52  ;;  %vm305_vm8 = vcmp.eq.s32.totalorder %v3329_v18, %v2941_v49 }
 0x11d   :  { %v795_v15 = vpop.f32.mrf.mxu0  ;;  %v1010_v22 = vpop.f32.mrf.mxu2 }
 0x11e   :  { %v904_v16 = vpop.f32.mrf.mxu1  ;;  %v1011_v26 = vadd.f32 %v1010_v22, %v902_v13 }
 0x11f   :  { %v905_v36 = vadd.f32 %v904_v16, %v795_v15 }
 0x120   :  { %2363 = vmatmul.msk.bf16.gmra.mxu0 %vm3382_vm0, %v4490_v57  ;;  %v1306_v0 = vmul.f32 %v3397_v31, %v1011_v26  ;;  %v4638_v26 = vmov 0  ;;  %vm3433_vm0 = vmpackc.low %vm305_vm8, %vm302_vm11  ;;  %vm312_vm11 = vcmp.eq.s32.totalorder %v3363_v41, %v2931_v45  ;;  %vm308_vm8 = vcmp.eq.s32.totalorder %v3338_v24, %v2941_v49 }
 0x121   :  { %2403 = vmatmul.msk.bf16.gmra.mxu1 %vm3391_vm2, %v4490_v57  ;;  %v4641_v10 = vsel %vm3433_vm0, 4294967295, %v4640_v10 }
 0x122   :  { %2432 = vmatmul.msk.bf16.gmra.mxu2 %vm4636_vm12, %v3395_v29  ;;  %1388 = vmatmul.f32.gmra.mxu3 %v1306_v0  ;;  %vm304_vm12 = vcmp.eq.s32.totalorder %v3329_v18, %v2939_v48  ;;  %4642 = vst [vmem:[#allocation17_spill] sm:$0xff] %v4641_v10 }
 0x123   :  { %vm3424_vm2 = vmpackc.low %vm304_vm12, %vm301_vm9  ;;  %vm309_vm9 = vcmp.eq.s32.totalorder %v3338_v24, %v2931_v45  ;;  %vm307_vm12 = vcmp.eq.s32.totalorder %v3338_v24, %v2939_v48 }
 0x124   :  { %v4639_v26 = vsel %vm3424_vm2, 4294967295, %v4638_v26 }
 0x125   :  { %v797_v40 = vpop.f32.mrf.mxu0  ;;  %v1013_v54 = vpop.f32.mrf.mxu2 }
 0x126   :  { %v906_v51 = vpop.f32.mrf.mxu1  ;;  %v1014_v61 = vadd.f32 %v1013_v54, %v905_v36  ;;  %v3437_v36 = vpack.c.bf16 %v2293_v21, %v2290_v63 }
 0x127   :  { %v907_v13 = vadd.f32 %v906_v51, %v797_v40  ;;  %v3439_v40 = vpop.permute.xlu2 %1130  ;;  %v3447_v51 = vpop.permute.xlu1 %200 }
 0x128   :  { %v1307_v62 = vmul.f32 %v3407_v53, %v1014_v61  ;;  %4643 = vst [vmem:[#allocation18_spill] sm:$0xff] %v3437_v36 }
 0x129   :  { %4644 = vst [vmem:[#allocation19_spill] sm:$0xff] %v3439_v40 }
 0x12a   :  { %1391 = vmatmul.f32.gmra.mxu3 %v1307_v62 }
 0x12d   :  { %v800_v15 = vpop.f32.mrf.mxu0  ;;  %v1015_v22 = vpop.f32.mrf.mxu2 }
 0x12e   :  { %v909_v16 = vpop.f32.mrf.mxu1  ;;  %v1016_v0 = vadd.f32 %v1015_v22, %v907_v13  ;;  %v3449_v13 = vpop.permute.xlu0 %1135 }
 0x12f   :  { %v910_v54 = vadd.f32 %v909_v16, %v800_v15  ;;  %4646 = vst [vmem:[#allocation20_spill] sm:$0xff] %v3449_v13  ;;  %v2296_v15 = vsel %vm309_vm9, 1.0, %v4493_v52  ;;  %v3461_v16 = vpop.permute.xlu1 %203 }
 0x130   :  { %2365 = vmatmul.msk.bf16.gmra.mxu0 %vm3424_vm2, %v4490_v57  ;;  %v1308_v18 = vmul.f32 %v3439_v40, %v1016_v0 }
 0x131   :  { %2405 = vmatmul.msk.bf16.gmra.mxu1 %vm3433_vm0, %v4490_v57  ;;  %vm311_vm0 = vcmp.eq.s32.totalorder %v3363_v41, %v2941_v49 }
 0x132   :  { %2433 = vmatmul.msk.bf16.gmra.mxu2 %vm4645_vm14, %v3437_v36  ;;  %1394 = vmatmul.f32.gmra.mxu3 %v1308_v18  ;;  %vm310_vm14 = vcmp.eq.s32.totalorder %v3363_v41, %v2939_v48  ;;  %vm3477_vm9 = vmpackc.low %vm311_vm0, %vm308_vm8  ;;  %vm318_vm0 = vcmp.eq.s32.totalorder %v3405_v34, %v2931_v45  ;;  %vm316_vm8 = vcmp.eq.s32.totalorder %v3405_v34, %v2939_v48 }
 0x133   :  { %vm3468_vm2 = vmpackc.low %vm310_vm14, %vm307_vm12  ;;  %vm315_vm12 = vcmp.eq.s32.totalorder %v3374_v11, %v2931_v45  ;;  %vm317_vm14 = vcmp.eq.s32.totalorder %v3405_v34, %v2941_v49 }
 0x135   :  { %v802_v61 = vpop.f32.mrf.mxu0  ;;  %v1018_v63 = vpop.f32.mrf.mxu2 }
 0x136   :  { %v911_v62 = vpop.f32.mrf.mxu1  ;;  %v1019_v21 = vadd.f32 %v1018_v63, %v910_v54  ;;  %v2299_v63 = vsel %vm312_vm11, 1.0, %v4493_v52  ;;  %vm4655_vm11 = vcmask 523264  }
 0x137   :  { %v912_v0 = vadd.f32 %v911_v62, %v802_v61  ;;  %v3472_v24 = vpack.c.bf16 %v2299_v63, %v2296_v15  ;;  %v4651_v61 = vmov 0  ;;  %v3481_v62 = vpop.permute.xlu0 %1140  ;;  %v3489_v15 = vpop.permute.xlu2 %206 }
 0x138   :  { %v1309_v22 = vmul.f32 %v3449_v13, %v1019_v21  ;;  %v4650_v13 = vmov 1.0|1.0   ;;  %v4652_v61 = vsel %vm3477_vm9, 4294967295, %v4651_v61  ;;  %4654 = vst [vmem:[#allocation23_spill] sm:$0xff] %v3481_v62  ;;  %v3491_v52 = vpop.permute.xlu1 %1145 }
 0x139   :  { %4649 = vst [vmem:[#allocation21_spill] sm:$0xff] %v3472_v24 }
 0x13a   :  { %1397 = vmatmul.f32.gmra.mxu3 %v1309_v22  ;;  %v4647_v22 = vmov 0  ;;  %4653 = vst [vmem:[#allocation22_spill] sm:$0xff] %v4652_v61 }
 0x13b   :  { %v4648_v22 = vsel %vm3468_vm2, 4294967295, %v4647_v22  ;;  %4656 = vst [vmem:[#allocation24_spill] sm:$0xff] %v3491_v52 }
 0x13d   :  { %v805_v18 = vpop.f32.mrf.mxu0  ;;  %v1020_v21 = vpop.f32.mrf.mxu2 }
 0x13e   :  { %v914_v54 = vpop.f32.mrf.mxu1  ;;  %v1021_v57 = vadd.f32 %v1020_v21, %v912_v0 }
 0x13f   :  { %v915_v0 = vadd.f32 %v914_v54, %v805_v18  ;;  %v4657_v18 = vmov 0.0  }
 0x140   :  { %2367 = vmatmul.msk.bf16.gmra.mxu0 %vm3468_vm2, %v4650_v13  ;;  %v1310_v41 = vmul.f32 %v3481_v62, %v1021_v57  ;;  %v3500_v57 = vpop.permute.xlu2 %209  ;;  %v2305_v54 = vsel %vm318_vm0, 1.0, %v4657_v18 }
 0x141   :  { %2407 = vmatmul.msk.bf16.gmra.mxu1 %vm3477_vm9, %v4650_v13  ;;  %vm314_vm9 = vcmp.eq.s32.totalorder %v3374_v11, %v2941_v49 }
 0x142   :  { %2434 = vmatmul.msk.bf16.gmra.mxu2 %vm4655_vm11, %v3472_v24  ;;  %1400 = vmatmul.f32.gmra.mxu3 %v1310_v41  ;;  %vm313_vm11 = vcmp.eq.s32.totalorder %v3374_v11, %v2939_v48  ;;  %vm3519_vm0 = vmpackc.low %vm317_vm14, %vm314_vm9  ;;  %vm324_vm9 = vcmp.eq.s32.totalorder %v3447_v51, %v2931_v45  ;;  %vm322_vm14 = vcmp.eq.s32.totalorder %v3447_v51, %v2939_v48 }
 0x143   :  { %vm3510_vm2 = vmpackc.low %vm316_vm8, %vm313_vm11  ;;  %vm321_vm8 = vcmp.eq.s32.totalorder %v3417_v12, %v2931_v45  ;;  %vm319_vm11 = vcmp.eq.s32.totalorder %v3417_v12, %v2939_v48 }
 0x145   :  { %v807_v63 = vpop.f32.mrf.mxu0  ;;  %v1023_v36 = vpop.f32.mrf.mxu2 }
 0x146   :  { %v916_v21 = vpop.f32.mrf.mxu1  ;;  %v1024_v40 = vadd.f32 %v1023_v36, %v915_v0  ;;  %v2302_v0 = vsel %vm315_vm12, 1.0, %v4657_v18  ;;  %vm4665_vm12 = vcmask 523264  }
 0x147   :  { %v917_v36 = vadd.f32 %v916_v21, %v807_v63  ;;  %v3514_v24 = vpack.c.bf16 %v2305_v54, %v2302_v0  ;;  %v4661_v63 = vmov 0  ;;  %v3523_v21 = vpop.permute.xlu1 %1150 }
 0x148   :  { %v1311_v53 = vmul.f32 %v3491_v52, %v1024_v40  ;;  %v4662_v63 = vsel %vm3519_vm0, 4294967295, %v4661_v63  ;;  %4664 = vst [vmem:[#allocation27_spill] sm:$0xff] %v3523_v21  ;;  %v3533_v62 = vpop.permute.xlu2 %1155 }
 0x149   :  { %4660 = vst [vmem:[#allocation25_spill] sm:$0xff] %v3514_v24 }
 0x14a   :  { %1403 = vmatmul.f32.gmra.mxu3 %v1311_v53  ;;  %v4658_v53 = vmov 0  ;;  %4663 = vst [vmem:[#allocation26_spill] sm:$0xff] %v4662_v63 }
 0x14b   :  { %v4659_v53 = vsel %vm3510_vm2, 4294967295, %v4658_v53  ;;  %4666 = vst [vmem:[#allocation28_spill] sm:$0xff] %v3533_v62 }
 0x14d   :  { %v810_v41 = vpop.f32.mrf.mxu0  ;;  %v1025_v52 = vpop.f32.mrf.mxu2 }
 0x14e   :  { %v919_v40 = vpop.f32.mrf.mxu1  ;;  %v1026_v34 = vadd.f32 %v1025_v52, %v917_v36  ;;  %v3531_v52 = vpop.permute.xlu0 %212 }
 0x14f   :  { %v920_v54 = vadd.f32 %v919_v40, %v810_v41  ;;  %v2308_v41 = vsel %vm321_vm8, 1.0, %v4657_v18  ;;  %vm4674_vm8 = vcmask 523264  }
 0x150   :  { %2369 = vmatmul.msk.bf16.gmra.mxu0 %vm3510_vm2, %v4650_v13  ;;  %v1312_v11 = vmul.f32 %v3523_v21, %v1026_v34  ;;  %vm3552_vm2 = vmpackc.low %vm322_vm14, %vm319_vm11  ;;  %v3565_v21 = vpop.permute.xlu2 %1160  ;;  %vm330_vm14 = vcmp.eq.s32.totalorder %v3489_v15, %v2931_v45  ;;  %vm325_vm11 = vcmp.eq.s32.totalorder %v3461_v16, %v2939_v48 }
 0x151   :  { %2409 = vmatmul.msk.bf16.gmra.mxu1 %vm3519_vm0, %v4650_v13  ;;  %vm320_vm0 = vcmp.eq.s32.totalorder %v3417_v12, %v2941_v49  ;;  %v4670_v12 = vmov 0  ;;  %4673 = vst [vmem:[#allocation31_spill] sm:$0xff] %v3565_v21 }
 0x152   :  { %2435 = vmatmul.msk.bf16.gmra.mxu2 %vm4665_vm12, %v3514_v24  ;;  %1406 = vmatmul.f32.gmra.mxu3 %v1312_v11  ;;  %vm323_vm12 = vcmp.eq.s32.totalorder %v3447_v51, %v2941_v49 }
 0x155   :  { %v812_v36 = vpop.f32.mrf.mxu0  ;;  %v1028_v29 = vpop.f32.mrf.mxu2 }
 0x156   :  { %v921_v0 = vpop.f32.mrf.mxu1  ;;  %v1029_v31 = vadd.f32 %v1028_v29, %v920_v54  ;;  %v2311_v29 = vsel %vm324_vm9, 1.0, %v4657_v18  ;;  %v3550_v40 = vpop.permute.xlu0 %215  ;;  %vm3561_vm9 = vmpackc.low %vm323_vm12, %vm320_vm0  ;;  %vm327_vm0 = vcmp.eq.s32.totalorder %v3461_v16, %v2931_v45  ;;  %vm326_vm12 = vcmp.eq.s32.totalorder %v3461_v16, %v2941_v49 }
 0x157   :  { %v4671_v12 = vsel %vm3561_vm9, 4294967295, %v4670_v12 }
 0x158   :  { %v1313_v24 = vmul.f32 %v3533_v62, %v1029_v31  ;;  %v922_v31 = vadd.f32 %v921_v0, %v812_v36  ;;  %v4667_v62 = vmov 0  ;;  %4672 = vst [vmem:[#allocation30_spill] sm:$0xff] %v4671_v12  ;;  %v3573_v0 = vpop.permute.xlu1 %218 }
 0x159   :  { %v4668_v62 = vsel %vm3552_vm2, 4294967295, %v4667_v62 }
 0x15a   :  { %1409 = vmatmul.f32.gmra.mxu3 %v1313_v24  ;;  %v3556_v24 = vpack.c.bf16 %v2311_v29, %v2308_v41 }
 0x15c   :  { %4669 = vst [vmem:[#allocation29_spill] sm:$0xff] %v3556_v24 }
 0x15d   :  { %v815_v34 = vpop.f32.mrf.mxu0  ;;  %v1030_v54 = vpop.f32.mrf.mxu2 }
 0x15e   :  { %v924_v11 = vpop.f32.mrf.mxu1  ;;  %v1031_v51 = vadd.f32 %v1030_v54, %v922_v31  ;;  %v3575_v54 = vpop.permute.xlu0 %1165 }
 0x15f   :  { %v925_v29 = vadd.f32 %v924_v11, %v815_v34  ;;  %4675 = vst [vmem:[#allocation32_spill] sm:$0xff] %v3575_v54  ;;  %v2314_v34 = vsel %vm327_vm0, 1.0, %v4657_v18 }
 0x160   :  { %2371 = vmatmul.msk.bf16.gmra.mxu0 %vm3552_vm2, %v4650_v13  ;;  %v1314_v36 = vmul.f32 %v3565_v21, %v1031_v51  ;;  %v3587_v11 = vpop.permute.xlu1 %221 }
 0x161   :  { %2411 = vmatmul.msk.bf16.gmra.mxu1 %vm3561_vm9, %v4650_v13  ;;  %vm329_vm9 = vcmp.eq.s32.totalorder %v3489_v15, %v2941_v49 }
 0x162   :  { %2436 = vmatmul.msk.bf16.gmra.mxu2 %vm4674_vm8, %v3556_v24  ;;  %1412 = vmatmul.f32.gmra.mxu3 %v1314_v36  ;;  %vm328_vm8 = vcmp.eq.s32.totalorder %v3489_v15, %v2939_v48  ;;  %v2317_v36 = vsel %vm330_vm14, 1.0, %v4657_v18  ;;  %vm3603_vm0 = vmpackc.low %vm329_vm9, %vm326_vm12  ;;  %vm4683_vm14 = vcmask 523264   ;;  %vm336_vm9 = vcmp.eq.s32.totalorder %v3531_v52, %v2931_v45 }
 0x163   :  { %vm3594_vm2 = vmpackc.low %vm328_vm8, %vm325_vm11  ;;  %v3598_v16 = vpack.c.bf16 %v2317_v36, %v2314_v34  ;;  %v3615_v34 = vpop.permute.xlu2 %224  ;;  %vm333_vm11 = vcmp.eq.s32.totalorder %v3500_v57, %v2931_v45  ;;  %vm334_vm12 = vcmp.eq.s32.totalorder %v3531_v52, %v2939_v48  ;;  %vm335_vm8 = vcmp.eq.s32.totalorder %v3531_v52, %v2941_v49 }
 0x165   :  { %v817_v41 = vpop.f32.mrf.mxu0  ;;  %v1033_v63 = vpop.f32.mrf.mxu2  ;;  %4678 = vst [vmem:[#allocation33_spill] sm:$0xff] %v3598_v16 }
 0x166   :  { %v926_v31 = vpop.f32.mrf.mxu1  ;;  %v1034_v56 = vadd.f32 %v1033_v63, %v925_v29 }
 0x167   :  { %v927_v63 = vadd.f32 %v926_v31, %v817_v41  ;;  %v4679_v41 = vmov 0  ;;  %v3607_v31 = vpop.permute.xlu0 %1170 }
 0x168   :  { %v1315_v12 = vmul.f32 %v3575_v54, %v1034_v56  ;;  %v4680_v41 = vsel %vm3603_vm0, 4294967295, %v4679_v41  ;;  %4682 = vst [vmem:[#allocation35_spill] sm:$0xff] %v3607_v31  ;;  %v3617_v24 = vpop.permute.xlu1 %1175 }
 0x169   :  { %4681 = vst [vmem:[#allocation34_spill] sm:$0xff] %v4680_v41 }
 0x16a   :  { %1415 = vmatmul.f32.gmra.mxu3 %v1315_v12  ;;  %v4676_v12 = vmov 0  ;;  %4684 = vst [vmem:[#allocation36_spill] sm:$0xff] %v3617_v24 }
 0x16b   :  { %v4677_v12 = vsel %vm3594_vm2, 4294967295, %v4676_v12 }
 0x16d   :  { %v820_v51 = vpop.f32.mrf.mxu0  ;;  %v1035_v29 = vpop.f32.mrf.mxu2 }
 0x16e   :  { %v929_v56 = vpop.f32.mrf.mxu1  ;;  %v1036_v54 = vadd.f32 %v1035_v29, %v927_v63 }
 0x16f   :  { %v930_v63 = vadd.f32 %v929_v56, %v820_v51 }
 0x170   :  { %2373 = vmatmul.msk.bf16.gmra.mxu0 %vm3594_vm2, %v4650_v13  ;;  %v1316_v15 = vmul.f32 %v3607_v31, %v1036_v54  ;;  %v2323_v54 = vsel %vm336_vm9, 1.0, %v4657_v18 }
 0x171   :  { %2413 = vmatmul.msk.bf16.gmra.mxu1 %vm3603_vm0, %v4650_v13  ;;  %vm332_vm0 = vcmp.eq.s32.totalorder %v3500_v57, %v2941_v49 }
 0x172   :  { %2437 = vmatmul.msk.bf16.gmra.mxu2 %vm4683_vm14, %v3598_v16  ;;  %1418 = vmatmul.f32.gmra.mxu3 %v1316_v15  ;;  %vm331_vm14 = vcmp.eq.s32.totalorder %v3500_v57, %v2939_v48  ;;  %v3634_v15 = vpop.permute.xlu2 %227  ;;  %vm3645_vm9 = vmpackc.low %vm335_vm8, %vm332_vm0  ;;  %v3649_v57 = vpop.permute.xlu1 %1180  ;;  %vm342_vm0 = vcmp.eq.s32.totalorder %v3573_v0, %v2931_v45  ;;  %vm340_vm8 = vcmp.eq.s32.totalorder %v3573_v0, %v2939_v48 }
 0x173   :  { %vm3636_vm2 = vmpackc.low %vm334_vm12, %vm331_vm14  ;;  %4691 = vst [vmem:[#allocation39_spill] sm:$0xff] %v3649_v57  ;;  %v3660_v16 = vpop.permute.xlu0 %230  ;;  %vm339_vm12 = vcmp.eq.s32.totalorder %v3550_v40, %v2931_v45  ;;  %vm337_vm14 = vcmp.eq.s32.totalorder %v3550_v40, %v2939_v48 }
 0x175   :  { %v822_v36 = vpop.f32.mrf.mxu0  ;;  %v1038_v21 = vpop.f32.mrf.mxu2 }
 0x176   :  { %v931_v29 = vpop.f32.mrf.mxu1  ;;  %v1039_v38 = vadd.f32 %v1038_v21, %v930_v63 }
 0x177   :  { %v932_v21 = vadd.f32 %v931_v29, %v822_v36  ;;  %v4688_v36 = vmov 0 }
 0x178   :  { %v1317_v41 = vmul.f32 %v3617_v24, %v1039_v38  ;;  %v2320_v38 = vsel %vm333_vm11, 1.0, %v4657_v18  ;;  %v4689_v36 = vsel %vm3645_vm9, 4294967295, %v4688_v36  ;;  %vm4692_vm11 = vcmask 523264  }
 0x179   :  { %v3640_v52 = vpack.c.bf16 %v2323_v54, %v2320_v38  ;;  %4690 = vst [vmem:[#allocation38_spill] sm:$0xff] %v4689_v36  ;;  %v1555_v54 = vld [vmem:[%s4471_s6 + $0x78] sm:$0xff]  ;;  %v1554_v36 = vld [vmem:[%s4471_s6 + $0x70] sm:$0xff] }
 0x17a   :  { %1421 = vmatmul.f32.gmra.mxu3 %v1317_v41  ;;  %v4685_v41 = vmov 0  ;;  %1556 = vmatpush.msrb.mxu2 %v1555_v54 }
 0x17b   :  { %v4686_v41 = vsel %vm3636_vm2, 4294967295, %v4685_v41  ;;  %4687 = vst [vmem:[#allocation37_spill] sm:$0xff] %v3640_v52 }
 0x17c   :  { %1557 = vmatpush.msrb.mxu2 %v1554_v36  ;;  %v2326_v36 = vsel %vm339_vm12, 1.0, %v4657_v18  ;;  %vm4701_vm12 = vcmask 523264  }
 0x17d   :  { %v825_v51 = vpop.f32.mrf.mxu0  ;;  %v1040_v63 = vpop.f32.mrf.mxu2 }
 0x17e   :  { %v934_v56 = vpop.f32.mrf.mxu1  ;;  %v1041_v24 = vadd.f32 %v1040_v63, %v932_v21 }
 0x17f   :  { %v935_v21 = vadd.f32 %v934_v56, %v825_v51  ;;  %v1551_v56 = vld [vmem:[%s4471_s6 + $0x58] sm:$0xff] }
 0x180   :  { %2375 = vmatmul.msk.bf16.gmra.mxu0 %vm3636_vm2, %v4650_v13  ;;  %v1318_v29 = vmul.f32 %v3649_v57, %v1041_v24  ;;  %v1553_v24 = vld [vmem:[%s4471_s6 + $0x68] sm:$0xff]  ;;  %vm3696_vm2 = vmpackc.low %vm340_vm8, %vm337_vm14  ;;  %vm348_vm8 = vcmp.eq.s32.totalorder %v3615_v34, %v2931_v45  ;;  %vm343_vm14 = vcmp.eq.s32.totalorder %v3587_v11, %v2939_v48 }
 0x181   :  { %2415 = vmatmul.msk.bf16.gmra.mxu1 %vm3645_vm9, %v4650_v13  ;;  %1558 = vmatpush.msrb.mxu2 %v1553_v24  ;;  %vm338_vm9 = vcmp.eq.s32.totalorder %v3550_v40, %v2941_v49  ;;  %v1550_v40 = vld [vmem:[%s4471_s6 + $0x50] sm:$0xff] }
 0x182   :  { %2438 = vmatmul.msk.bf16.gmra.mxu2 %vm4692_vm11, %v3640_v52  ;;  %1424 = vmatmul.f32.gmra.mxu3 %v1318_v29  ;;  %v3665_v52 = vpop.permute.xlu2 %1185  ;;  %vm341_vm11 = vcmp.eq.s32.totalorder %v3573_v0, %v2941_v49 }
 0x183   :  { %4693 = vst [vmem:[#allocation40_spill] sm:$0xff] %v3665_v52 }
 0x185   :  { %v827_v38 = vpop.f32.mrf.mxu0  ;;  %v1043_v31 = vpop.f32.mrf.mxu2 }
 0x186   :  { %v936_v63 = vpop.f32.mrf.mxu1  ;;  %v1044_v61 = vadd.f32 %v1043_v31, %v935_v21  ;;  %v1552_v31 = vld [vmem:[%s4471_s6 + $0x60] sm:$0xff] }
 0x187   :  { %1559 = vmatpush.msrb.mxu2 %v1552_v31  ;;  %v937_v29 = vadd.f32 %v936_v63, %v827_v38  ;;  %v4694_v31 = vmov 0  ;;  %v4697_v63 = vmov 0 }
 0x188   :  { %v1319_v51 = vmul.f32 %v3665_v52, %v1044_v61  ;;  %v2329_v61 = vsel %vm342_vm0, 1.0, %v4657_v18  ;;  %v4695_v31 = vsel %vm3696_vm2, 4294967295, %v4694_v31  ;;  %vm3711_vm0 = vmpackc.low %vm341_vm11, %vm338_vm9  ;;  %vm345_vm9 = vcmp.eq.s32.totalorder %v3587_v11, %v2931_v45 }
 0x189   :  { %1560 = vmatpush.msrb.mxu2 %v1551_v56  ;;  %v3703_v52 = vpack.c.bf16 %v2329_v61, %v2326_v36  ;;  %v4698_v63 = vsel %vm3711_vm0, 4294967295, %v4697_v63  ;;  %v3715_v56 = vpop.permute.xlu0 %1190  ;;  %v1549_v61 = vld [vmem:[%s4471_s6 + $0x48] sm:$0xff]  ;;  %v1548_v36 = vld [vmem:[%s4471_s6 + $0x40] sm:$0xff]  ;;  %vm344_vm11 = vcmp.eq.s32.totalorder %v3587_v11, %v2941_v49 }
 0x18a   :  { %1427 = vmatmul.f32.gmra.mxu3 %v1319_v51  ;;  %4699 = vst [vmem:[#allocation42_spill] sm:$0xff] %v4698_v63 }
 0x18b   :  { %4696 = vst [vmem:[#allocation41_spill] sm:$0xff] %v3703_v52  ;;  %1561 = vmatpush.msrb.mxu2 %v1550_v40 }
 0x18c   :  { %4700 = vst [vmem:[#allocation43_spill] sm:$0xff] %v3715_v56 }
 0x18d   :  { %v830_v54 = vpop.f32.mrf.mxu0  ;;  %v1045_v24 = vpop.f32.mrf.mxu2  ;;  %1562 = vmatpush.msrb.mxu2 %v1549_v61  ;;  %v1545_v61 = vld [vmem:[%s4471_s6 + $0x28] sm:$0xff] }
 0x18e   :  { %v939_v21 = vpop.f32.mrf.mxu1  ;;  %v3691_v51 = vpop.f32.mrf.mxu3  ;;  %v1046_v38 = vadd.f32 %v1045_v24, %v937_v29  ;;  %v1547_v29 = vld [vmem:[%s4471_s6 + $0x38] sm:$0xff] }
 0x18f   :  { %1563 = vmatpush.msrb.mxu2 %v1548_v36  ;;  %v940_v24 = vadd.f32 %v939_v21, %v830_v54  ;;  %v1544_v21 = vld [vmem:[%s4471_s6 + $0x20] sm:$0xff] }
 0x190   :  { %2377 = vmatmul.msk.bf16.gmra.mxu0 %vm3696_vm2, %v4650_v13  ;;  %v1320_v0 = vmul.f32 %v3715_v56, %v1046_v38  ;;  %v1546_v38 = vld [vmem:[%s4471_s6 + $0x30] sm:$0xff]  ;;  %v3737_v56 = vpop.permute.xlu1 %1195 }
 0x191   :  { %2417 = vmatmul.msk.bf16.gmra.mxu1 %vm3711_vm0, %v4650_v13  ;;  %1564 = vmatpush.msrb.mxu2 %v1547_v29  ;;  %4702 = vst [vmem:[#allocation44_spill] sm:$0xff] %v3737_v56  ;;  %vm347_vm0 = vcmp.eq.s32.totalorder %v3615_v34, %v2941_v49  ;;  %v3800_v9 = vpop.permute.xlu0 %1205 }
 0x192   :  { %2439 = vmatmul.msk.bf16.gmra.mxu2 %vm4701_vm12, %v3703_v52  ;;  %1430 = vmatmul.f32.gmra.mxu3 %v1320_v0  ;;  %vm346_vm12 = vcmp.eq.s32.totalorder %v3615_v34, %v2939_v48  ;;  %v4707_v34 = vmov 0  ;;  %4712 = vst [vmem:[#allocation49_spill] sm:$0xff] %v3800_v9 }
 0x193   :  { %1565 = vmatpush.msrb.mxu2 %v1546_v38  ;;  %vm3765_vm2 = vmpackc.low %vm346_vm12, %vm343_vm14  ;;  %vm351_vm14 = vcmp.eq.s32.totalorder %v3634_v15, %v2931_v45  ;;  %vm353_vm12 = vcmp.eq.s32.totalorder %v3660_v16, %v2941_v49 }
 0x195   :  { %v832_v40 = vpop.f32.mrf.mxu0  ;;  %v1048_v63 = vpop.f32.mrf.mxu2  ;;  %1566 = vmatpush.msrb.mxu2 %v1545_v61 }
 0x196   :  { %v941_v57 = vpop.f32.mrf.mxu1  ;;  %v3732_v39 = vpop.f32.mrf.mxu3  ;;  %v1049_v52 = vadd.f32 %v1048_v63, %v940_v24  ;;  %v1543_v63 = vld [vmem:[%s4471_s6 + $0x18] sm:$0xff]  ;;  %v2335_v24 = vsel %vm348_vm8, 1.0, %v4657_v18  ;;  %vm4711_vm8 = vcmask 523264  }
 0x197   :  { %1567 = vmatpush.msrb.mxu2 %v1544_v21  ;;  %v942_v0 = vadd.f32 %v941_v57, %v832_v40  ;;  %v1542_v21 = vld [vmem:[%s4471_s6 + $0x10] sm:$0xff] }
 0x198   :  { %v1321_v54 = vmul.f32 %v3737_v56, %v1049_v52  ;;  %v2332_v52 = vsel %vm345_vm9, 1.0, %v4657_v18  ;;  %vm3780_vm9 = vmpackc.low %vm347_vm0, %vm344_vm11  ;;  %v3784_v56 = vpop.permute.xlu2 %1200  ;;  %vm354_vm0 = vcmp.eq.s32.totalorder %v3660_v16, %v2931_v45  ;;  %vm352_vm11 = vcmp.eq.s32.totalorder %v3660_v16, %v2939_v48 }
 0x199   :  { %1568 = vmatpush.msrb.mxu2 %v1543_v63  ;;  %v3772_v57 = vpack.c.bf16 %v2335_v24, %v2332_v52  ;;  %v4708_v34 = vsel %vm3780_vm9, 4294967295, %v4707_v34  ;;  %4710 = vst [vmem:[#allocation48_spill] sm:$0xff] %v3784_v56  ;;  %v1541_v63 = vld [vmem:[%s4471_s6 + $0x8] sm:$0xff]  ;;  %v1540_v52 = vld [vmem:[%s4471_s6] sm:$0xff]  ;;  %v2338_v45 = vsel %vm351_vm14, 1.0, %v4657_v18  ;;  %vm4721_vm14 = vcmask 523264  }
 0x19a   :  { %1433 = vmatmul.f32.gmra.mxu3 %v1321_v54  ;;  %v4703_v54 = vmov 0  ;;  %4709 = vst [vmem:[#allocation47_spill] sm:$0xff] %v4708_v34 }
 0x19b   :  { %v4704_v54 = vsel %vm3765_vm2, 4294967295, %v4703_v54  ;;  %4706 = vst [vmem:[#allocation46_spill] sm:$0xff] %v3772_v57  ;;  %1569 = vmatpush.msrb.mxu2 %v1542_v21 }
 0x19c   :  { %4705 = vst [vmem:[#allocation45_spill] sm:$0xff] %v4704_v54 }
 0x19d   :  { %v835_v36 = vpop.f32.mrf.mxu0  ;;  %v1050_v38 = vpop.f32.mrf.mxu2  ;;  %1570 = vmatpush.msrb.mxu2 %v1541_v63 }
 0x19e   :  { %v944_v29 = vpop.f32.mrf.mxu1  ;;  %v3763_v61 = vpop.f32.mrf.mxu3  ;;  %v1051_v40 = vadd.f32 %v1050_v38, %v942_v0 }
 0x19f   :  { %1571 = vmatpush.msrb.mxu2 %v1540_v52  ;;  %v945_v0 = vadd.f32 %v944_v29, %v835_v36  ;;  %v2341_v36 = vsel %vm354_vm0, 1.0, %v4657_v18 }
 0x1a0   :  { %2379 = vmatmul.msk.bf16.gmra.mxu0 %vm3765_vm2, %v4650_v13  ;;  %v1322_v11 = vmul.f32 %v3784_v56, %v1051_v40  ;;  %v3823_v16 = vpack.c.bf16 %v2341_v36, %v2338_v45 }
 0x1a1   :  { %2419 = vmatmul.msk.bf16.gmra.mxu1 %vm3780_vm9, %v4650_v13  ;;  %vm350_vm9 = vcmp.eq.s32.totalorder %v3634_v15, %v2941_v49  ;;  %v3832_v49 = vpop.permute.xlu1 %1210 }
 0x1a2   :  { %2440 = vmatmul.msk.bf16.gmra.mxu2 %vm4711_vm8, %v3772_v57  ;;  %1436 = vmatmul.f32.gmra.mxu3 %v1322_v11  ;;  %vm349_vm8 = vcmp.eq.s32.totalorder %v3634_v15, %v2939_v48  ;;  %4716 = vst [vmem:[#allocation51_spill] sm:$0xff] %v3823_v16  ;;  %vm3828_vm0 = vmpackc.low %vm353_vm12, %vm350_vm9  ;;  %v4717_v48 = vmov 0  ;;  %vm4752_vm9 = vnez %v4594_v46  ;;  %vm4754_vm12 = vnez %v4659_v53 }
 0x1a3   :  { %vm3819_vm2 = vmpackc.low %vm352_vm11, %vm349_vm8  ;;  %v4718_v48 = vsel %vm3828_vm0, 4294967295, %v4717_v48  ;;  %4720 = vst [vmem:[#allocation53_spill] sm:$0xff] %v3832_v49  ;;  %vm4755_vm8 = vnez %v4599_v3 }
 0x1a4   :  { %4719 = vst [vmem:[#allocation52_spill] sm:$0xff] %v4718_v48  ;;  %v3854_v48 = vpop.permute.xlu0 %1220 }
 0x1a5   :  { %v837_v24 = vpop.f32.mrf.mxu0  ;;  %v1053_v21 = vpop.f32.mrf.mxu2  ;;  %4723 = vst [vmem:[#allocation55_spill] sm:$0xff] %v3854_v48 }
 0x1a6   :  { %v946_v38 = vpop.f32.mrf.mxu1  ;;  %v3798_v34 = vpop.f32.mrf.mxu3  ;;  %v1054_v14 = vadd.f32 %v1053_v21, %v945_v0  ;;  %v4713_v0 = vmov 0 }
 0x1a7   :  { %v947_v29 = vadd.f32 %v946_v38, %v837_v24  ;;  %v4714_v0 = vsel %vm3819_vm2, 4294967295, %v4713_v0 }
 0x1a8   :  { %v1323_v40 = vmul.f32 %v3800_v9, %v1054_v14  ;;  %4715 = vst [vmem:[#allocation50_spill] sm:$0xff] %v4714_v0 }
 0x1a9   :  { %v3861_v0 = vpop.permute.xlu1 %1225 }
 0x1aa   :  { %1439 = vmatmul.f32.gmra.mxu3 %v1323_v40  ;;  %4724 = vst [vmem:[#allocation56_spill] sm:$0xff] %v3861_v0 }
 0x1ad   :  { %v840_v63 = vpop.f32.mrf.mxu0  ;;  %v1055_v14 = vpop.f32.mrf.mxu2 }
 0x1ae   :  { %v949_v11 = vpop.f32.mrf.mxu1  ;;  %v3817_v52 = vpop.f32.mrf.mxu3  ;;  %v1056_v21 = vadd.f32 %v1055_v14, %v947_v29  ;;  %v3845_v29 = vld [vmem:[%s4470_s5] ss:$0 sm:$0xff]  ;;  %s2623_s5 = smov 128  }
 0x1af   :  { %v950_v15 = vadd.f32 %v949_v11, %v840_v63  ;;  %v3847_v14 = vpop.permute.xlu2 %1215 }
 0x1b0   :  { %2381 = vmatmul.msk.bf16.gmra.mxu0 %vm3819_vm2, %v4650_v13  ;;  %v1324_v18 = vmul.f32 %v3832_v49, %v1056_v21  ;;  %4722 = vst [vmem:[#allocation54_spill] sm:$0xff] %v3847_v14  ;;  %v1381_v21 = vadd.f32 %v3845_v29, %v3691_v51 }
 0x1b1   :  { %2421 = vmatmul.msk.bf16.gmra.mxu1 %vm3828_vm0, %v4650_v13 }
 0x1b2   :  { %2441 = vmatmul.msk.bf16.gmra.mxu2 %vm4721_vm14, %v3823_v16  ;;  %1442 = vmatmul.f32.gmra.mxu3 %v1324_v18  ;;  %v1500_v57 = vmax.f32 %v1381_v21, 0.0 }
 0x1b5   :  { %v842_v24 = vpop.f32.mrf.mxu0  ;;  %v1058_v40 = vpop.f32.mrf.mxu2 }
 0x1b6   :  { %v951_v38 = vpop.f32.mrf.mxu1  ;;  %v3840_v36 = vpop.f32.mrf.mxu3  ;;  %v1059_v45 = vadd.f32 %v1058_v40, %v950_v15  ;;  %v1384_v40 = vadd.f32 %v3845_v29, %v3732_v39 }
 0x1b7   :  { %v952_v63 = vadd.f32 %v951_v38, %v842_v24 }
 0x1b8   :  { %v1325_v9 = vmul.f32 %v3847_v14, %v1059_v45  ;;  %v1501_v14 = vmax.f32 %v1384_v40, 0.0 }
 0x1ba   :  { %1445 = vmatmul.f32.gmra.mxu3 %v1325_v9 }
 0x1bd   :  { %v845_v11 = vpop.f32.mrf.mxu0  ;;  %v1060_v16 = vpop.f32.mrf.mxu2 }
 0x1be   :  { %v954_v18 = vpop.f32.mrf.mxu1  ;;  %v3852_v49 = vpop.f32.mrf.mxu3  ;;  %v1061_v56 = vadd.f32 %v1060_v16, %v952_v63 }
 0x1bf   :  { %v955_v45 = vadd.f32 %v954_v18, %v845_v11 }
 0x1c0   :  { %v1326_v15 = vmul.f32 %v3854_v48, %v1061_v56  ;;  %v1387_v56 = vadd.f32 %v3845_v29, %v3763_v61  ;;  %v3868_v48 = vpop.permute.xlu2 %1230 }
 0x1c1   :  { %4725 = vst [vmem:[#allocation57_spill] sm:$0xff] %v3868_v48 }
 0x1c2   :  { %1572 = vmatmul.f32.vlgmr.msrb.gmra.mxu2 %v1500_v57  ;;  %1448 = vmatmul.f32.gmra.mxu3 %v1326_v15  ;;  %v1502_v18 = vmax.f32 %v1387_v56, 0.0 }
 0x1c5   :  { %v847_v51 = vpop.f32.mrf.mxu0  ;;  %v1063_v24 = vpop.f32.mrf.mxu2 }
 0x1c6   :  { %v956_v9 = vpop.f32.mrf.mxu1  ;;  %v3859_v38 = vpop.f32.mrf.mxu3  ;;  %v1064_v10 = vadd.f32 %v1063_v24, %v955_v45 }
 0x1c7   :  { %v957_v57 = vadd.f32 %v956_v9, %v847_v51 }
 0x1c8   :  { %v1327_v16 = vmul.f32 %v3861_v0, %v1064_v10  ;;  %v1390_v10 = vadd.f32 %v3845_v29, %v3798_v34  ;;  %v3875_v0 = vpop.permute.xlu0 %1235 }
 0x1c9   :  { %4726 = vst [vmem:[#allocation58_spill] sm:$0xff] %v3875_v0 }
 0x1ca   :  { %1575 = vmatmul.f32.gmra.mxu2 %v1501_v14  ;;  %1451 = vmatmul.f32.gmra.mxu3 %v1327_v16  ;;  %v1503_v24 = vmax.f32 %v1390_v10, 0.0 }
 0x1cd   :  { %v850_v39 = vpop.f32.mrf.mxu0  ;;  %v1065_v63 = vpop.f32.mrf.mxu2 }
 0x1ce   :  { %v959_v21 = vpop.f32.mrf.mxu1  ;;  %v3866_v11 = vpop.f32.mrf.mxu3  ;;  %v1066_v15 = vadd.f32 %v1065_v63, %v957_v57  ;;  %v1393_v57 = vadd.f32 %v3845_v29, %v3817_v52 }
 0x1cf   :  { %v960_v14 = vadd.f32 %v959_v21, %v850_v39 }
 0x1d0   :  { %v1328_v40 = vmul.f32 %v3868_v48, %v1066_v15  ;;  %v1504_v15 = vmax.f32 %v1393_v57, 0.0  ;;  %v3882_v48 = vpop.permute.xlu1 %1240 }
 0x1d1   :  { %4727 = vst [vmem:[#allocation59_spill] sm:$0xff] %v3882_v48 }
 0x1d2   :  { %1578 = vmatmul.f32.gmra.mxu2 %v1502_v18  ;;  %1454 = vmatmul.f32.gmra.mxu3 %v1328_v40 }
 0x1d5   :  { %v852_v61 = vpop.f32.mrf.mxu0  ;;  %v1068_v51 = vpop.f32.mrf.mxu2 }
 0x1d6   :  { %v961_v45 = vpop.f32.mrf.mxu1  ;;  %v3873_v9 = vpop.f32.mrf.mxu3  ;;  %v1069_v16 = vadd.f32 %v1068_v51, %v960_v14  ;;  %v1396_v14 = vadd.f32 %v3845_v29, %v3840_v36 }
 0x1d7   :  { %v962_v63 = vadd.f32 %v961_v45, %v852_v61 }
 0x1d8   :  { %v1329_v56 = vmul.f32 %v3875_v0, %v1069_v16  ;;  %v1505_v16 = vmax.f32 %v1396_v14, 0.0  ;;  %v3889_v0 = vpop.permute.xlu2 %1245 }
 0x1d9   :  { %4728 = vst [vmem:[#allocation60_spill] sm:$0xff] %v3889_v0 }
 0x1da   :  { %1581 = vmatmul.f32.gmra.mxu2 %v1503_v24  ;;  %1457 = vmatmul.f32.gmra.mxu3 %v1329_v56 }
 0x1dd   :  { %v855_v34 = vpop.f32.mrf.mxu0  ;;  %v1070_v39 = vpop.f32.mrf.mxu2 }
 0x1de   :  { %v964_v18 = vpop.f32.mrf.mxu1  ;;  %v3880_v21 = vpop.f32.mrf.mxu3  ;;  %v1071_v40 = vadd.f32 %v1070_v39, %v962_v63  ;;  %v1399_v63 = vadd.f32 %v3845_v29, %v3852_v49 }
 0x1df   :  { %v965_v51 = vadd.f32 %v964_v18, %v855_v34 }
 0x1e0   :  { %v1330_v10 = vmul.f32 %v3882_v48, %v1071_v40  ;;  %v1506_v40 = vmax.f32 %v1399_v63, 0.0  ;;  %v3896_v48 = vpop.permute.xlu0 %1250 }
 0x1e1   :  { %4729 = vst [vmem:[#allocation61_spill] sm:$0xff] %v3896_v48 }
 0x1e2   :  { %1584 = vmatmul.f32.gmra.mxu2 %v1504_v15  ;;  %1460 = vmatmul.f32.gmra.mxu3 %v1330_v10 }
 0x1e5   :  { %v857_v52 = vpop.f32.mrf.mxu0  ;;  %v1073_v61 = vpop.f32.mrf.mxu2 }
 0x1e6   :  { %v966_v24 = vpop.f32.mrf.mxu1  ;;  %v3887_v45 = vpop.f32.mrf.mxu3  ;;  %v1074_v56 = vadd.f32 %v1073_v61, %v965_v51  ;;  %v1402_v51 = vadd.f32 %v3845_v29, %v3859_v38 }
 0x1e7   :  { %v967_v39 = vadd.f32 %v966_v24, %v857_v52 }
 0x1e8   :  { %v1331_v57 = vmul.f32 %v3889_v0, %v1074_v56  ;;  %v1507_v56 = vmax.f32 %v1402_v51, 0.0  ;;  %v3903_v0 = vpop.permute.xlu1 %1255 }
 0x1e9   :  { %4730 = vst [vmem:[#allocation62_spill] sm:$0xff] %v3903_v0 }
 0x1ea   :  { %1587 = vmatmul.f32.gmra.mxu2 %v1505_v16  ;;  %1463 = vmatmul.f32.gmra.mxu3 %v1331_v57 }
 0x1ed   :  { %v860_v36 = vpop.f32.mrf.mxu0  ;;  %v1075_v34 = vpop.f32.mrf.mxu2 }
 0x1ee   :  { %v969_v15 = vpop.f32.mrf.mxu1  ;;  %v3894_v18 = vpop.f32.mrf.mxu3  ;;  %v1076_v10 = vadd.f32 %v1075_v34, %v967_v39  ;;  %v1405_v39 = vadd.f32 %v3845_v29, %v3866_v11 }
 0x1ef   :  { %v970_v61 = vadd.f32 %v969_v15, %v860_v36 }
 0x1f0   :  { %v1332_v14 = vmul.f32 %v3896_v48, %v1076_v10  ;;  %v1508_v10 = vmax.f32 %v1405_v39, 0.0  ;;  %v3910_v48 = vpop.permute.xlu2 %1260 }
 0x1f1   :  { %4731 = vst [vmem:[#allocation63_spill] sm:$0xff] %v3910_v48 }
 0x1f2   :  { %1590 = vmatmul.f32.gmra.mxu2 %v1506_v40  ;;  %1466 = vmatmul.f32.gmra.mxu3 %v1332_v14 }
 0x1f5   :  { %v862_v49 = vpop.f32.mrf.mxu0  ;;  %v1078_v52 = vpop.f32.mrf.mxu2 }
 0x1f6   :  { %v971_v16 = vpop.f32.mrf.mxu1  ;;  %v3901_v24 = vpop.f32.mrf.mxu3  ;;  %v1079_v57 = vadd.f32 %v1078_v52, %v970_v61  ;;  %v1408_v61 = vadd.f32 %v3845_v29, %v3873_v9 }
 0x1f7   :  { %v972_v34 = vadd.f32 %v971_v16, %v862_v49 }
 0x1f8   :  { %v1333_v63 = vmul.f32 %v3903_v0, %v1079_v57  ;;  %v1509_v57 = vmax.f32 %v1408_v61, 0.0  ;;  %v3917_v0 = vpop.permute.xlu0 %1265 }
 0x1f9   :  { %4732 = vst [vmem:[#allocation64_spill] sm:$0xff] %v3917_v0 }
 0x1fa   :  { %1593 = vmatmul.f32.gmra.mxu2 %v1507_v56  ;;  %1469 = vmatmul.f32.gmra.mxu3 %v1333_v63 }
 0x1fd   :  { %v865_v38 = vpop.f32.mrf.mxu0  ;;  %v1080_v36 = vpop.f32.mrf.mxu2 }
 0x1fe   :  { %v974_v40 = vpop.f32.mrf.mxu1  ;;  %v3908_v15 = vpop.f32.mrf.mxu3  ;;  %v1081_v14 = vadd.f32 %v1080_v36, %v972_v34  ;;  %v1411_v34 = vadd.f32 %v3845_v29, %v3880_v21 }
 0x1ff   :  { %v975_v52 = vadd.f32 %v974_v40, %v865_v38 }
 0x200   :  { %v1334_v51 = vmul.f32 %v3910_v48, %v1081_v14  ;;  %v1510_v14 = vmax.f32 %v1411_v34, 0.0  ;;  %v3924_v48 = vpop.permute.xlu1 %1270 }
 0x201   :  { %4733 = vst [vmem:[#allocation65_spill] sm:$0xff] %v3924_v48 }
 0x202   :  { %1596 = vmatmul.f32.gmra.mxu2 %v1508_v10  ;;  %1472 = vmatmul.f32.gmra.mxu3 %v1334_v51 }
 0x205   :  { %v867_v11 = vpop.f32.mrf.mxu0  ;;  %v1083_v49 = vpop.f32.mrf.mxu2 }
 0x206   :  { %v976_v56 = vpop.f32.mrf.mxu1  ;;  %v3915_v16 = vpop.f32.mrf.mxu3  ;;  %v1084_v63 = vadd.f32 %v1083_v49, %v975_v52  ;;  %v1414_v52 = vadd.f32 %v3845_v29, %v3887_v45 }
 0x207   :  { %v977_v36 = vadd.f32 %v976_v56, %v867_v11 }
 0x208   :  { %v1335_v39 = vmul.f32 %v3917_v0, %v1084_v63  ;;  %v1511_v63 = vmax.f32 %v1414_v52, 0.0  ;;  %v3931_v0 = vpop.permute.xlu2 %1275 }
 0x209   :  { %4734 = vst [vmem:[#allocation66_spill] sm:$0xff] %v3931_v0 }
 0x20a   :  { %1599 = vmatmul.f32.gmra.mxu2 %v1509_v57  ;;  %1475 = vmatmul.f32.gmra.mxu3 %v1335_v39 }
 0x20d   :  { %v870_v9 = vpop.f32.mrf.mxu0  ;;  %v1085_v38 = vpop.f32.mrf.mxu2 }
 0x20e   :  { %v979_v10 = vpop.f32.mrf.mxu1  ;;  %v3922_v40 = vpop.f32.mrf.mxu3  ;;  %v1086_v51 = vadd.f32 %v1085_v38, %v977_v36  ;;  %v1417_v36 = vadd.f32 %v3845_v29, %v3894_v18 }
 0x20f   :  { %v980_v49 = vadd.f32 %v979_v10, %v870_v9 }
 0x210   :  { %v1336_v61 = vmul.f32 %v3924_v48, %v1086_v51  ;;  %v1512_v51 = vmax.f32 %v1417_v36, 0.0  ;;  %v3936_v48 = vpop.permute.xlu0 %1280 }
 0x211   :  { %4735 = vst [vmem:[#allocation67_spill] sm:$0xff] %v3936_v48 }
 0x212   :  { %1602 = vmatmul.f32.gmra.mxu2 %v1510_v14  ;;  %1478 = vmatmul.f32.gmra.mxu3 %v1336_v61 }
 0x215   :  { %v872_v21 = vpop.f32.mrf.mxu0  ;;  %v1088_v11 = vpop.f32.mrf.mxu2 }
 0x216   :  { %v981_v57 = vpop.f32.mrf.mxu1  ;;  %v3929_v56 = vpop.f32.mrf.mxu3  ;;  %v1089_v39 = vadd.f32 %v1088_v11, %v980_v49  ;;  %v1420_v49 = vadd.f32 %v3845_v29, %v3901_v24 }
 0x217   :  { %v982_v38 = vadd.f32 %v981_v57, %v872_v21  ;;  %v3946_v24 = vpop.permute.xlu2 %1290 }
 0x218   :  { %v1337_v34 = vmul.f32 %v3931_v0, %v1089_v39  ;;  %v1513_v21 = vmax.f32 %v1420_v49, 0.0  ;;  %4737 = vst [vmem:[#allocation69_spill] sm:$0xff] %v3946_v24 }
 0x21a   :  { %1605 = vmatmul.f32.gmra.mxu2 %v1511_v63  ;;  %1481 = vmatmul.f32.gmra.mxu3 %v1337_v34  ;;  %v3941_v34 = vpop.permute.xlu1 %1285 }
 0x21b   :  { %4736 = vst [vmem:[#allocation68_spill] sm:$0xff] %v3941_v34 }
 0x21d   :  { %v875_v45 = vpop.f32.mrf.mxu0  ;;  %v1090_v9 = vpop.f32.mrf.mxu2 }
 0x21e   :  { %v984_v14 = vpop.f32.mrf.mxu1  ;;  %v1434_v10 = vpop.f32.mrf.mxu3  ;;  %v1091_v61 = vadd.f32 %v1090_v9, %v982_v38  ;;  %v1423_v38 = vadd.f32 %v3845_v29, %v3908_v15 }
 0x21f   :  { %v985_v11 = vadd.f32 %v984_v14, %v875_v45 }
 0x220   :  { %v1338_v52 = vmul.f32 %v3936_v48, %v1091_v61  ;;  %v1514_v45 = vmax.f32 %v1423_v38, 0.0 }
 0x222   :  { %1608 = vmatmul.f32.gmra.mxu2 %v1512_v51  ;;  %1484 = vmatmul.f32.gmra.mxu3 %v1338_v52 }
 0x225   :  { %v877_v63 = vpop.f32.mrf.mxu0  ;;  %v1093_v39 = vpop.f32.mrf.mxu2 }
 0x226   :  { %v986_v18 = vpop.f32.mrf.mxu1  ;;  %v1094_v57 = vadd.f32 %v1093_v39, %v985_v11  ;;  %v1437_v0 = vpop.f32.mrf.mxu3  ;;  %v1426_v39 = vadd.f32 %v3845_v29, %v3915_v16 }
 0x227   :  { %v987_v9 = vadd.f32 %v986_v18, %v877_v63  ;;  %v3951_v63 = vpop.permute.xlu0 %1295 }
 0x228   :  { %v1339_v36 = vmul.f32 %v3941_v34, %v1094_v57  ;;  %v1515_v15 = vmax.f32 %v1426_v39, 0.0  ;;  %4738 = vst [vmem:[#allocation70_spill] sm:$0xff] %v3951_v63  ;;  %v1432_v39 = vadd.f32 %v3845_v29, %v3929_v56 }
 0x22a   :  { %1611 = vmatmul.f32.gmra.mxu2 %v1513_v21  ;;  %1487 = vmatmul.f32.gmra.mxu3 %v1339_v36 }
 0x22d   :  { %v1095_v51 = vpop.f32.mrf.mxu2  ;;  %v880_v61 = vpop.f32.mrf.mxu0 }
 0x22e   :  { %v1096_v14 = vadd.f32 %v1095_v51, %v987_v9  ;;  %v989_v52 = vpop.f32.mrf.mxu1  ;;  %v1440_v11 = vpop.f32.mrf.mxu3  ;;  %v1429_v51 = vadd.f32 %v3845_v29, %v3922_v40  ;;  %v1435_v40 = vadd.f32 %v3845_v29, %v1434_v10 }
 0x22f   :  { %v990_v21 = vadd.f32 %v989_v52, %v880_v61  ;;  %v3956_v61 = vpop.permute.xlu1 %1300 }
 0x230   :  { %v1340_v49 = vmul.f32 %v3946_v24, %v1096_v14  ;;  %v1516_v16 = vmax.f32 %v1429_v51, 0.0  ;;  %4739 = vst [vmem:[#allocation71_spill] sm:$0xff] %v3956_v61 }
 0x232   :  { %1614 = vmatmul.f32.gmra.mxu2 %v1514_v45  ;;  %1490 = vmatmul.f32.gmra.mxu3 %v1340_v49 }
 0x235   :  { %v1098_v57 = vpop.f32.mrf.mxu2  ;;  %v882_v38 = vpop.f32.mrf.mxu0 }
 0x236   :  { %v1099_v36 = vadd.f32 %v1098_v57, %v990_v21  ;;  %v991_v9 = vpop.f32.mrf.mxu1  ;;  %v1443_v45 = vpop.f32.mrf.mxu3 }
 0x237   :  { %v992_v14 = vadd.f32 %v991_v9, %v882_v38  ;;  %v1438_v9 = vadd.f32 %v3845_v29, %v1437_v0 }
 0x238   :  { %v1341_v18 = vmul.f32 %v3951_v63, %v1099_v36 }
 0x239   :  { %v1519_v56 = vmax.f32 %v1438_v9, 0.0 }
 0x23a   :  { %1617 = vmatmul.f32.gmra.mxu2 %v1515_v15  ;;  %1493 = vmatmul.f32.gmra.mxu3 %v1341_v18  ;;  %v1517_v15 = vmax.f32 %v1432_v39, 0.0  ;;  %v1518_v18 = vmax.f32 %v1435_v40, 0.0  ;;  %v1444_v39 = vadd.f32 %v3845_v29, %v1443_v45 }
 0x23c   :  { %v1521_v0 = vmax.f32 %v1444_v39, 0.0 }
 0x23d   :  { %v1100_v24 = vpop.f32.mrf.mxu2 }
 0x23e   :  { %v1101_v49 = vadd.f32 %v1100_v24, %v992_v14  ;;  %v1446_v21 = vpop.f32.mrf.mxu3 }
 0x240   :  { %v1342_v52 = vmul.f32 %v3956_v61, %v1101_v49 }
 0x242   :  { %1620 = vmatmul.f32.gmra.mxu2 %v1516_v16  ;;  %1496 = vmatmul.f32.gmra.mxu3 %v1342_v52  ;;  %v1441_v16 = vadd.f32 %v3845_v29, %v1440_v11 }
 0x244   :  { %v1520_v10 = vmax.f32 %v1441_v16, 0.0 }
 0x245   :  { %v3961_v57 = vpop.f32.mrf.mxu2 }
 0x246   :  { %v1449_v38 = vpop.f32.mrf.mxu3 }
 0x247   :  { %v1450_v24 = vadd.f32 %v3845_v29, %v1449_v38 }
 0x249   :  { %v1523_v45 = vmax.f32 %v1450_v24, 0.0 }
 0x24a   :  { %1623 = vmatmul.f32.gmra.mxu2 %v1517_v15 }
 0x24d   :  { %v3964_v36 = vpop.f32.mrf.mxu2 }
 0x24e   :  { %v1452_v14 = vpop.f32.mrf.mxu3 }
 0x24f   :  { %v1453_v39 = vadd.f32 %v3845_v29, %v1452_v14 }
 0x251   :  { %v1524_v61 = vmax.f32 %v1453_v39, 0.0 }
 0x252   :  { %1626 = vmatmul.f32.gmra.mxu2 %v1518_v18  ;;  %v1447_v18 = vadd.f32 %v3845_v29, %v1446_v21 }
 0x254   :  { %v1522_v11 = vmax.f32 %v1447_v18, 0.0 }
 0x255   :  { %v3969_v51 = vpop.f32.mrf.mxu2 }
 0x256   :  { %v1455_v15 = vpop.f32.mrf.mxu3 }
 0x257   :  { %v1456_v18 = vadd.f32 %v3845_v29, %v1455_v15 }
 0x259   :  { %v1525_v16 = vmax.f32 %v1456_v18, 0.0 }
 0x25a   :  { %1629 = vmatmul.f32.gmra.mxu2 %v1519_v56 }
 0x25d   :  { %v3972_v49 = vpop.f32.mrf.mxu2 }
 0x25e   :  { %v1458_v9 = vpop.f32.mrf.mxu3 }
 0x25f   :  { %v1459_v38 = vadd.f32 %v3845_v29, %v1458_v9 }
 0x261   :  { %v1526_v24 = vmax.f32 %v1459_v38, 0.0 }
 0x262   :  { %1632 = vmatmul.f32.gmra.mxu2 %v1520_v10 }
 0x265   :  { %v3977_v40 = vpop.f32.mrf.mxu2 }
 0x266   :  { %v1461_v52 = vpop.f32.mrf.mxu3 }
 0x26a   :  { %1635 = vmatmul.f32.gmra.mxu2 %v1521_v0 }
 0x26d   :  { %v3980_v56 = vpop.f32.mrf.mxu2 }
 0x26e   :  { %v1464_v63 = vpop.f32.mrf.mxu3 }
 0x272   :  { %1638 = vmatmul.f32.gmra.mxu2 %v1522_v11 }
 0x275   :  { %v3985_v10 = vpop.f32.mrf.mxu2 }
 0x276   :  { %v1467_v11 = vpop.f32.mrf.mxu3 }
 0x27a   :  { %1641 = vmatmul.f32.gmra.mxu2 %v1523_v45  ;;  %v1462_v45 = vadd.f32 %v3845_v29, %v1461_v52 }
 0x27c   :  { %v1527_v39 = vmax.f32 %v1462_v45, 0.0 }
 0x27d   :  { %v1594_v0 = vpop.f32.mrf.mxu2 }
 0x27e   :  { %v1696_v21 = vpack.c.bf16 %v1594_v0, %v3985_v10  ;;  %v1470_v14 = vpop.f32.mrf.mxu3 }
 0x27f   :  { %v1471_v38 = vadd.f32 %v3845_v29, %v1470_v14 }
 0x281   :  { %v1530_v52 = vmax.f32 %v1471_v38, 0.0 }
 0x282   :  { %1644 = vmatmul.f32.gmra.mxu2 %v1524_v61  ;;  %v1465_v61 = vadd.f32 %v3845_v29, %v1464_v63 }
 0x284   :  { %v1528_v0 = vmax.f32 %v1465_v61, 0.0 }
 0x285   :  { %v1597_v34 = vpop.f32.mrf.mxu2 }
 0x286   :  { %v1473_v15 = vpop.f32.mrf.mxu3 }
 0x287   :  { %v1474_v45 = vadd.f32 %v3845_v29, %v1473_v15 }
 0x289   :  { %v1531_v63 = vmax.f32 %v1474_v45, 0.0 }
 0x28a   :  { %1647 = vmatmul.f32.gmra.mxu2 %v1525_v16  ;;  %v1468_v16 = vadd.f32 %v3845_v29, %v1467_v11 }
 0x28c   :  { %v1529_v9 = vmax.f32 %v1468_v16, 0.0 }
 0x28d   :  { %v1600_v48 = vpop.f32.mrf.mxu2 }
 0x28e   :  { %v1476_v60 = vpop.f32.mrf.mxu3 }
 0x28f   :  { %v1477_v61 = vadd.f32 %v3845_v29, %v1476_v60  ;;  %v1697_v60 = vpack.c.bf16 %v1600_v48, %v1597_v34  ;;  %v4741_v48 = vpack.c.bf16 %v3972_v49, %v3969_v51 }
 0x291   :  { %v1532_v11 = vmax.f32 %v1477_v61, 0.0 }
 0x292   :  { %1650 = vmatmul.f32.gmra.mxu2 %v1526_v24 }
 0x295   :  { %v1603_v50 = vpop.f32.mrf.mxu2 }
 0x29a   :  { %1653 = vmatmul.f32.gmra.mxu2 %v1527_v39  ;;  %v1479_v39 = vpop.f32.mrf.mxu3 }
 0x29b   :  { %v1480_v16 = vadd.f32 %v3845_v29, %v1479_v39 }
 0x29d   :  { %v1606_v10 = vpop.f32.mrf.mxu2  ;;  %v1533_v38 = vmax.f32 %v1480_v16, 0.0 }
 0x29e   :  { %v1698_v15 = vpack.c.bf16 %v1606_v10, %v1603_v50  ;;  %v4740_v50 = vpack.c.bf16 %v3980_v56, %v3977_v40 }
 0x2a2   :  { %1656 = vmatmul.f32.gmra.mxu2 %v1528_v0  ;;  %v1482_v0 = vpop.f32.mrf.mxu3 }
 0x2a3   :  { %v1483_v45 = vadd.f32 %v3845_v29, %v1482_v0 }
 0x2a5   :  { %v1609_v18 = vpop.f32.mrf.mxu2 }
 0x2aa   :  { %1659 = vmatmul.f32.gmra.mxu2 %v1529_v9 }
 0x2ad   :  { %v1612_v24 = vpop.f32.mrf.mxu2 }
 0x2ae   :  { %v1699_v14 = vpack.c.bf16 %v1612_v24, %v1609_v18 }
 0x2b2   :  { %1662 = vmatmul.f32.gmra.mxu2 %v1530_v52  ;;  %v1485_v52 = vpop.f32.mrf.mxu3 }
 0x2b3   :  { %v1486_v18 = vadd.f32 %v3845_v29, %v1485_v52 }
 0x2b5   :  { %v1615_v54 = vpop.f32.mrf.mxu2  ;;  %v1535_v24 = vmax.f32 %v1486_v18, 0.0 }
 0x2ba   :  { %1665 = vmatmul.f32.gmra.mxu2 %v1531_v63 }
 0x2bd   :  { %v1618_v28 = vpop.f32.mrf.mxu2 }
 0x2be   :  { %v1700_v37 = vpack.c.bf16 %v1618_v28, %v1615_v54  ;;  %v1534_v28 = vmax.f32 %v1483_v45, 0.0  ;;  %v1488_v54 = vpop.f32.mrf.mxu3 }
 0x2bf   :  { %v1489_v34 = vadd.f32 %v3845_v29, %v1488_v54 }
 0x2c0   :  { %1713 = vmatpush.bf16.msrb.mxu0 %v1700_v37 }
 0x2c1   :  { %v1536_v0 = vmax.f32 %v1489_v34, 0.0 }
 0x2c2   :  { %1668 = vmatmul.f32.gmra.mxu2 %v1532_v11 }
 0x2c4   :  { %1714 = vmatpush.bf16.msrb.mxu0 %v1699_v14 }
 0x2c5   :  { %v3998_v9 = vpop.f32.mrf.mxu2 }
 0x2c6   :  { %v1491_v39 = vpop.f32.mrf.mxu3 }
 0x2c7   :  { %v1492_v40 = vadd.f32 %v3845_v29, %v1491_v39 }
 0x2c8   :  { %1715 = vmatpush.bf16.msrb.mxu0 %v1698_v15 }
 0x2c9   :  { %v1537_v56 = vmax.f32 %v1492_v40, 0.0 }
 0x2ca   :  { %1671 = vmatmul.f32.gmra.mxu2 %v1533_v38 }
 0x2cc   :  { %1716 = vmatpush.bf16.msrb.mxu0 %v1697_v60 }
 0x2cd   :  { %v4001_v63 = vpop.f32.mrf.mxu2 }
 0x2ce   :  { %v1701_v37 = vpack.c.bf16 %v4001_v63, %v3998_v9  ;;  %v1494_v51 = vpop.f32.mrf.mxu3 }
 0x2cf   :  { %v1495_v16 = vadd.f32 %v3845_v29, %v1494_v51 }
 0x2d0   :  { %1717 = vmatpush.bf16.msrb.mxu0 %v1696_v21  ;;  %v4742_v21 = vpack.c.bf16 %v3964_v36, %v3961_v57 }
 0x2d1   :  { %v1538_v38 = vmax.f32 %v1495_v16, 0.0  ;;  %v4778_v16 = vld [vmem:[#allocation17_spill] sm:$0xff] }
 0x2d2   :  { %1674 = vmatmul.f32.gmra.mxu2 %v1534_v28 }
 0x2d4   :  { %1718 = vmatpush.bf16.msrb.mxu0 %v4740_v50 }
 0x2d5   :  { %v1627_v10 = vpop.f32.mrf.mxu2 }
 0x2d6   :  { %v1497_v36 = vpop.f32.mrf.mxu3 }
 0x2d7   :  { %v1498_v55 = vadd.f32 %v3845_v29, %v1497_v36 }
 0x2d8   :  { %1719 = vmatpush.bf16.msrb.mxu0 %v4741_v48 }
 0x2d9   :  { %v1539_v52 = vmax.f32 %v1498_v55, 0.0 }
 0x2da   :  { %1677 = vmatmul.f32.gmra.mxu2 %v1535_v24 }
 0x2dc   :  { %1720 = vmatpush.bf16.msrb.mxu0 %v4742_v21 }
 0x2dd   :  { %v1630_v61 = vpop.f32.mrf.mxu2 }
 0x2de   :  { %v1702_v11 = vpack.c.bf16 %v1630_v61, %v1627_v10 }
 0x2df   :  { %2443 = vmatmul.msk.bf16.vlgmr.msrb.gmra.mxu0 %vm2949_vm5, %v4650_v13  ;;  %vm4744_vm5 = vnez %v4621_v35 }
 0x2e2   :  { %1680 = vmatmul.f32.gmra.mxu2 %v1536_v0 }
 0x2e5   :  { %v1633_v49 = vpop.f32.mrf.mxu2 }
 0x2ea   :  { %1683 = vmatmul.f32.gmra.mxu2 %v1537_v56  ;;  %v4794_v56 = vld [vmem:[#allocation16_spill] sm:$0xff] }
 0x2ed   :  { %v1636_v14 = vpop.f32.mrf.mxu2 }
 0x2ee   :  { %v1703_v57 = vpack.c.bf16 %v1636_v14, %v1633_v49  ;;  %v4780_v14 = vld [vmem:[#allocation7_spill] sm:$0xff] }
 0x2ef   :  { %2445 = vmatmul.msk.bf16.gmra.mxu0 %vm2995_vm15, %v4650_v13  ;;  %vm4745_vm15 = vnez %v4582_v7 }
 0x2f2   :  { %1686 = vmatmul.f32.gmra.mxu2 %v1538_v38 }
 0x2f5   :  { %v1639_v15 = vpop.f32.mrf.mxu2 }
 0x2fa   :  { %1689 = vmatmul.f32.gmra.mxu2 %v1539_v52 }
 0x2fd   :  { %v1642_v45 = vpop.f32.mrf.mxu2 }
 0x2fe   :  { %v1704_v60 = vpack.c.bf16 %v1642_v45, %v1639_v15  ;;  %v4782_v15 = vld [vmem:[#allocation8_spill] sm:$0xff]  ;;  %v4172_v45 = vld [vmem:[%s4472_s7] ss:$0 sm:$0xff] }
 0x2ff   :  { %2447 = vmatmul.msk.bf16.gmra.mxu0 %vm3039_vm10, %v4650_v13  ;;  %vm4746_vm10 = vnez %v4630_v23 }
 0x305   :  { %v1645_v28 = vpop.f32.mrf.mxu2 }
 0x30d   :  { %v1648_v54 = vpop.f32.mrf.mxu2 }
 0x30e   :  { %v1705_v43 = vpack.c.bf16 %v1648_v54, %v1645_v28 }
 0x30f   :  { %2449 = vmatmul.msk.bf16.gmra.mxu0 %vm3083_vm6, %v4650_v13  ;;  %vm4747_vm6 = vnez %v4586_v19 }
 0x315   :  { %v1651_v5 = vpop.f32.mrf.mxu2 }
 0x31d   :  { %v1654_v18 = vpop.f32.mrf.mxu2 }
 0x31e   :  { %v1706_v34 = vpack.c.bf16 %v1654_v18, %v1651_v5 }
 0x31f   :  { %2451 = vmatmul.msk.bf16.gmra.mxu0 %vm3127_vm3, %v4650_v13  ;;  %vm4749_vm3 = vnez %v4590_v32 }
 0x325   :  { %v1657_v29 = vpop.f32.mrf.mxu2 }
 0x32d   :  { %v1660_v50 = vpop.f32.mrf.mxu2 }
 0x32e   :  { %v1707_v30 = vpack.c.bf16 %v1660_v50, %v1657_v29 }
 0x32f   :  { %2453 = vmatmul.msk.bf16.gmra.mxu0 %vm3177_vm4, %v4650_v13  ;;  %vm4743_vm4 = vnez %v4578_v58 }
 0x335   :  { %v1663_v17 = vpop.f32.mrf.mxu2 }
 0x33d   :  { %v1666_v10 = vpop.f32.mrf.mxu2 }
 0x33e   :  { %v1708_v24 = vpack.c.bf16 %v1666_v10, %v1663_v17  ;;  %v4783_v17 = vld [vmem:[#allocation11_spill] sm:$0xff] }
 0x33f   :  { %2455 = vmatmul.msk.bf16.gmra.mxu0 %vm3233_vm7, %v4650_v13  ;;  %vm4748_vm7 = vnez %v4639_v26  ;;  %v4767_v26 = vld [vmem:[#allocation9_spill] sm:$0xff] }
 0x340   :  { %1822 = vmatpush.bf16.msrb.mxu1 %v1708_v24  ;;  %v4784_v24 = vld [vmem:[#allocation22_spill] sm:$0xff] }
 0x344   :  { %1823 = vmatpush.bf16.msrb.mxu1 %v1707_v30  ;;  %v2554_v30 = vld [vmem:[%s4468_s3 + $0x8] sm:$0xff] }
 0x345   :  { %v1669_v48 = vpop.f32.mrf.mxu2 }
 0x348   :  { %1824 = vmatpush.bf16.msrb.mxu1 %v1706_v34  ;;  %v4786_v34 = vld [vmem:[#allocation10_spill] sm:$0xff] }
 0x34c   :  { %1825 = vmatpush.bf16.msrb.mxu1 %v1705_v43 }
 0x34d   :  { %v1672_v39 = vpop.f32.mrf.mxu2 }
 0x34e   :  { %v1709_v7 = vpack.c.bf16 %v1672_v39, %v1669_v48 }
 0x34f   :  { %2457 = vmatmul.msk.bf16.gmra.mxu0 %vm3276_vm13, %v4650_v13  ;;  %vm4750_vm13 = vmmov %vm4721_vm14 }
 0x350   :  { %1826 = vmatpush.bf16.msrb.mxu1 %v1704_v60  ;;  %vm4753_vm11 = vmmov %vm4750_vm13  ;;  %v2553_v60 = vld [vmem:[%s4468_s3] sm:$0xff] }
 0x351   :  { %vm4756_vm14 = vmmov %vm4753_vm11 }
 0x354   :  { %1827 = vmatpush.bf16.msrb.mxu1 %v1703_v57 }
 0x355   :  { %v1675_v2 = vpop.f32.mrf.mxu2 }
 0x358   :  { %1828 = vmatpush.bf16.msrb.mxu1 %v1702_v11 }
 0x35c   :  { %1829 = vmatpush.bf16.msrb.mxu1 %v1701_v37  ;;  %v1722_v63 = vpop.f32.mrf.mxu0 }
 0x35d   :  { %v1678_v25 = vpop.f32.mrf.mxu2 }
 0x35e   :  { %v1710_v35 = vpack.c.bf16 %v1678_v25, %v1675_v2 }
 0x35f   :  { %2459 = vmatmul.msk.bf16.gmra.mxu0 %vm3306_vm1, %v4650_v13  ;;  %2483 = vmatmul.msk.bf16.vlgmr.msrb.gmra.mxu1 %vm4743_vm4, %v4650_v13  ;;  %vm4751_vm1 = vnez %v4648_v22  ;;  %vm4757_vm4 = vnez %v4668_v62  ;;  %v4769_v22 = vld [vmem:[#allocation5_spill] sm:$0xff] }
 0x364   :  { %v1724_v1 = vpop.f32.mrf.mxu0 }
 0x365   :  { %v1681_v21 = vpop.f32.mrf.mxu2 }
 0x36c   :  { %v4064_v0 = vpop.f32.mrf.mxu0 }
 0x36d   :  { %v1684_v42 = vpop.f32.mrf.mxu2 }
 0x36e   :  { %v1711_v58 = vpack.c.bf16 %v1684_v42, %v1681_v21  ;;  %v4788_v42 = vld [vmem:[#allocation12_spill] sm:$0xff] }
 0x36f   :  { %2461 = vmatmul.msk.bf16.gmra.mxu0 %vm4744_vm5, %v4650_v13  ;;  %2485 = vmatmul.msk.bf16.gmra.mxu1 %vm4745_vm15, %v4650_v13  ;;  %vm4758_vm5 = vnez %v4604_v27  ;;  %vm4759_vm15 = vmmov %vm4753_vm11 }
 0x374   :  { %v4074_v19 = vpop.f32.mrf.mxu0 }
 0x375   :  { %v1687_v9 = vpop.f32.mrf.mxu2 }
 0x37c   :  { %v4084_v23 = vpop.f32.mrf.mxu0 }
 0x37d   :  { %v1690_v37 = vpop.f32.mrf.mxu2 }
 0x37e   :  { %v1712_v61 = vpack.c.bf16 %v1690_v37, %v1687_v9 }
 0x37f   :  { %2463 = vmatmul.msk.bf16.gmra.mxu0 %vm4746_vm10, %v4650_v13  ;;  %2487 = vmatmul.msk.bf16.gmra.mxu1 %vm4747_vm6, %v4650_v13  ;;  %vm4760_vm10 = vnez %v4677_v12  ;;  %vm4761_vm6 = vnez %v4610_v44  ;;  %v4771_v12 = vld [vmem:[#allocation45_spill] sm:$0xff] }
 0x380   :  { %1935 = vmatpush.bf16.msrb.mxu3 %v1712_v61 }
 0x384   :  { %1936 = vmatpush.bf16.msrb.mxu3 %v1711_v58  ;;  %v4086_v32 = vpop.f32.mrf.mxu0 }
 0x388   :  { %1937 = vmatpush.bf16.msrb.mxu3 %v1710_v35 }
 0x38c   :  { %1938 = vmatpush.bf16.msrb.mxu3 %v1709_v7 }
 0x38f   :  { %2465 = vmatmul.msk.bf16.gmra.mxu0 %vm4748_vm7, %v4650_v13  ;;  %2489 = vmatmul.msk.bf16.gmra.mxu1 %vm4749_vm3, %v4650_v13  ;;  %vm4762_vm7 = vmmov %vm4753_vm11  ;;  %vm4763_vm3 = vnez %v4686_v41  ;;  %v4773_v41 = vld [vmem:[#allocation13_spill] sm:$0xff] }
 0x390   :  { %2522 = vmatmul.msk.bf16.vlgmr.msrb.gmra.mxu3 %vm4750_vm13, %v2965_v59  ;;  %v4096_v59 = vpop.f32.mrf.mxu0  ;;  %vm4764_vm13 = vnez %v4616_v6 }
 0x398   :  { %v4098_v46 = vpop.f32.mrf.mxu0 }
 0x39f   :  { %2467 = vmatmul.msk.bf16.gmra.mxu0 %vm4751_vm1, %v4650_v13  ;;  %2491 = vmatmul.msk.bf16.gmra.mxu1 %vm4752_vm9, %v4650_v13  ;;  %vm4765_vm1 = vmmov %vm4762_vm7  ;;  %vm4766_vm9 = vnez %v4695_v31  ;;  %v4775_v31 = vld [vmem:[#allocation6_spill] sm:$0xff] }
 0x3a0   :  { %2523 = vmatmul.msk.bf16.gmra.mxu3 %vm4753_vm11, %v3009_v8  ;;  %v4108_v8 = vpop.f32.mrf.mxu0  ;;  %vm4768_vm11 = vnez %v4767_v26 }
 0x3af   :  { %2469 = vmatmul.msk.bf16.gmra.mxu0 %vm4754_vm12, %v4650_v13  ;;  %2493 = vmatmul.msk.bf16.gmra.mxu1 %vm4755_vm8, %v4650_v13  ;;  %vm4770_vm12 = vmmov %vm4765_vm1  ;;  %vm4772_vm8 = vnez %v4771_v12 }
 0x3b0   :  { %2524 = vmatmul.msk.bf16.gmra.mxu3 %vm4756_vm14, %v3053_v20  ;;  %v4118_v20 = vpop.f32.mrf.mxu0  ;;  %vm4774_vm14 = vnez %v4773_v41 }
 0x3b8   :  { %v4120_v27 = vpop.f32.mrf.mxu0 }
 0x3bf   :  { %2471 = vmatmul.msk.bf16.gmra.mxu0 %vm4757_vm4, %v4650_v13  ;;  %2495 = vmatmul.msk.bf16.gmra.mxu1 %vm4758_vm5, %v4650_v13  ;;  %vm4776_vm4 = vmmov %vm4765_vm1  ;;  %vm4779_vm5 = vnez %v4778_v16 }
 0x3c0   :  { %2525 = vmatmul.msk.bf16.gmra.mxu3 %vm4759_vm15, %v3097_v33  ;;  %v4130_v44 = vpop.f32.mrf.mxu0  ;;  %vm4781_vm15 = vmmov %vm4765_vm1 }
 0x3c8   :  { %v4140_v6 = vpop.f32.mrf.mxu0 }
 0x3cf   :  { %2473 = vmatmul.msk.bf16.gmra.mxu0 %vm4760_vm10, %v4650_v13  ;;  %2497 = vmatmul.msk.bf16.gmra.mxu1 %vm4761_vm6, %v4650_v13  ;;  %vm4787_vm10 = vmmov %vm4765_vm1 }
 0x3d0   :  { %2526 = vmatmul.msk.bf16.gmra.mxu3 %vm4762_vm7, %v3141_v47  ;;  %v4142_v53 = vpop.f32.mrf.mxu0  ;;  %vm4793_vm7 = vmmov %vm4765_vm1 }
 0x3d8   :  { %v4152_v40 = vpop.f32.mrf.mxu0 }
 0x3dc   :  { %v1831_v3 = vpop.f32.mrf.mxu1 }
 0x3dd   :  { %v1832_v38 = vadd.f32 %v1831_v3, %v1722_v63  ;;  %v2555_v63 = vld [vmem:[%s4468_s3 + $0x10] sm:$0xff] }
 0x3df   :  { %2475 = vmatmul.msk.bf16.gmra.mxu0 %vm4763_vm3, %v4650_v13  ;;  %2499 = vmatmul.msk.bf16.gmra.mxu1 %vm4764_vm13, %v4650_v13  ;;  %vm4799_vm13 = vmmov %vm4765_vm1 }
 0x3e0   :  { %2527 = vmatmul.msk.bf16.gmra.mxu3 %vm4765_vm1, %v3188_v4  ;;  %v4156_v49 = vpop.f32.mrf.mxu0 }
 0x3e4   :  { %v1833_v33 = vpop.f32.mrf.mxu1 }
 0x3e5   :  { %v1834_v54 = vadd.f32 %v1833_v33, %v1724_v1  ;;  %v4790_v33 = vld [vmem:[#allocation26_spill] sm:$0xff] }
 0x3e6   :  { %vm4791_vm6 = vnez %v4790_v33  ;;  %v2561_v33 = vld [vmem:[%s4468_s3 + $0x40] sm:$0xff] }
 0x3ec   :  { %v1836_v47 = vpop.f32.mrf.mxu1 }
 0x3ed   :  { %v1837_v43 = vadd.f32 %v1836_v47, %v4064_v0  ;;  %v4789_v0 = vld [vmem:[#allocation15_spill] sm:$0xff]  ;;  %v2556_v47 = vld [vmem:[%s4468_s3 + $0x18] sm:$0xff] }
 0x3ef   :  { %2477 = vmatmul.msk.bf16.gmra.mxu0 %vm4766_vm9, %v4650_v13  ;;  %2501 = vmatmul.msk.bf16.gmra.mxu1 %vm4768_vm11, %v4650_v13  ;;  %vm4805_vm9 = vmmov %vm4776_vm4 }
 0x3f0   :  { %2528 = vmatmul.msk.bf16.gmra.mxu3 %vm4770_vm12, %v4769_v22  ;;  %v4792_v22 = vld [vmem:[#allocation14_spill] sm:$0xff]  ;;  %vm4811_vm12 = vmmov %vm4776_vm4 }
 0x3f4   :  { %v1838_v62 = vpop.f32.mrf.mxu1 }
 0x3f5   :  { %v1839_v61 = vadd.f32 %v1838_v62, %v4074_v19 }
 0x3fc   :  { %v1841_v4 = vpop.f32.mrf.mxu1 }
 0x3fd   :  { %v1842_v19 = vadd.f32 %v1841_v4, %v4084_v23 }
 0x3ff   :  { %2479 = vmatmul.msk.bf16.gmra.mxu0 %vm4772_vm8, %v4650_v13  ;;  %2503 = vmatmul.msk.bf16.gmra.mxu1 %vm4774_vm14, %v4650_v13  ;;  %vm4817_vm14 = vmmov %vm4776_vm4 }
 0x400   :  { %2529 = vmatmul.msk.bf16.gmra.mxu3 %vm4776_vm4, %v4775_v31 }
 0x404   :  { %v1843_v11 = vpop.f32.mrf.mxu1 }
 0x40c   :  { %v4154_v51 = vpop.f32.mrf.mxu1 }
 0x40f   :  { %2481 = vmatmul.msk.bf16.gmra.mxu0 %vm3819_vm2, %v4650_v13  ;;  %2505 = vmatmul.msk.bf16.gmra.mxu1 %vm4779_vm5, %v4650_v13  ;;  %vm4785_vm2 = vnez %v4784_v24  ;;  %v4800_v24 = vld [vmem:[#allocation20_spill] sm:$0xff]  ;;  %vm4823_vm5 = vmmov %vm4793_vm7 }
 0x410   :  { %2530 = vmatmul.msk.bf16.gmra.mxu3 %vm4781_vm15, %v4780_v14  ;;  %v2557_v14 = vld [vmem:[%s4468_s3 + $0x20] sm:$0xff]  ;;  %vm4828_vm15 = vmmov %vm4823_vm5 }
 0x413   :  { %v1940_v57 = vpop.f32.mrf.mxu3 }
 0x414   :  { %v1941_v36 = vadd.f32 %v1940_v57, %v1832_v38  ;;  %v4166_v55 = vpop.f32.mrf.mxu1  ;;  %v1844_v57 = vadd.f32 %v1843_v11, %v4086_v32  ;;  %v1847_v32 = vadd.f32 %v4154_v51, %v4096_v59 }
 0x416   :  { %v2040_v52 = vmul.f32 %v1941_v36, %v4782_v15 }
 0x418   :  { %v2080_v28 = vadd.f32 %v2553_v60, %v2040_v52  ;;  %v4795_v52 = vld [vmem:[#allocation19_spill] sm:$0xff] }
 0x41a   :  { %v2124_v5 = vadd.f32 %v4172_v45, %v2080_v28  ;;  %v4796_v28 = vld [vmem:[#allocation30_spill] sm:$0xff] }
 0x41b   :  { %v1942_v18 = vpop.f32.mrf.mxu3  ;;  %vm4797_vm3 = vnez %v4796_v28 }
 0x41c   :  { %2164 = vst [vmem:[#allocation2] sm:$0xff] %v2124_v5  ;;  %v1943_v29 = vadd.f32 %v1942_v18, %v1834_v54  ;;  %v4178_v50 = vpop.f32.mrf.mxu1  ;;  %v2558_v54 = vld [vmem:[%s4468_s3 + $0x28] sm:$0xff] }
 0x41d   :  { %v4798_v18 = vld [vmem:[#allocation18_spill] sm:$0xff] }
 0x41e   :  { %v2041_v10 = vmul.f32 %v1943_v29, %v4783_v17 }
 0x41f   :  { %2507 = vmatmul.msk.bf16.gmra.mxu1 %vm4785_vm2, %v4650_v13 }
 0x420   :  { %v2081_v48 = vadd.f32 %v2554_v30, %v2041_v10  ;;  %2531 = vmatmul.msk.bf16.gmra.mxu3 %vm4787_vm10, %v4786_v34 }
 0x422   :  { %v2125_v39 = vadd.f32 %v4172_v45, %v2081_v48  ;;  %v2559_v48 = vld [vmem:[%s4468_s3 + $0x30] sm:$0xff] }
 0x423   :  { %v1945_v2 = vpop.f32.mrf.mxu3 }
 0x424   :  { %2165 = vst [vmem:[#allocation2 + $0x8] sm:$0xff] %v2125_v39  ;;  %v1946_v25 = vadd.f32 %v1945_v2, %v1837_v43  ;;  %v4191_v21 = vpop.f32.mrf.mxu1  ;;  %v1849_v43 = vadd.f32 %v4166_v55, %v4098_v46  ;;  %v1852_v46 = vadd.f32 %v4178_v50, %v4108_v8 }
 0x426   :  { %v2042_v9 = vmul.f32 %v1946_v25, %v4788_v42  ;;  %v4801_v25 = vld [vmem:[#allocation23_spill] sm:$0xff] }
 0x428   :  { %v2082_v37 = vadd.f32 %v2555_v63, %v2042_v9  ;;  %v4802_v9 = vld [vmem:[#allocation34_spill] sm:$0xff]  ;;  %v2560_v63 = vld [vmem:[%s4468_s3 + $0x38] sm:$0xff] }
 0x429   :  { %vm4803_vm1 = vnez %v4802_v9 }
 0x42a   :  { %v2126_v58 = vadd.f32 %v4172_v45, %v2082_v37 }
 0x42b   :  { %v1947_v1 = vpop.f32.mrf.mxu3 }
 0x42c   :  { %2166 = vst [vmem:[#allocation2 + $0x10] sm:$0xff] %v2126_v58  ;;  %v1948_v35 = vadd.f32 %v1947_v1, %v1839_v61  ;;  %v4199_v7 = vpop.f32.mrf.mxu1  ;;  %v4804_v61 = vld [vmem:[#allocation21_spill] sm:$0xff] }
 0x42e   :  { %v2043_v3 = vmul.f32 %v1948_v35, %v4789_v0  ;;  %v4806_v35 = vld [vmem:[#allocation24_spill] sm:$0xff] }
 0x42f   :  { %2509 = vmatmul.msk.bf16.gmra.mxu1 %vm4791_vm6, %v4650_v13 }
 0x430   :  { %v2083_v26 = vadd.f32 %v2556_v47, %v2043_v3  ;;  %2532 = vmatmul.msk.bf16.gmra.mxu3 %vm4793_vm7, %v4792_v22 }
 0x432   :  { %v2127_v62 = vadd.f32 %v4172_v45, %v2083_v26  ;;  %v1854_v26 = vadd.f32 %v4191_v21, %v4118_v20  ;;  %v1857_v21 = vadd.f32 %v4199_v7, %v4120_v27 }
 0x433   :  { %v1950_v12 = vpop.f32.mrf.mxu3 }
 0x434   :  { %2167 = vst [vmem:[#allocation2 + $0x18] sm:$0xff] %v2127_v62  ;;  %v1951_v41 = vadd.f32 %v1950_v12, %v1842_v19  ;;  %v4212_v31 = vpop.f32.mrf.mxu1  ;;  %v4807_v19 = vld [vmem:[#allocation27_spill] sm:$0xff]  ;;  %v4808_v12 = vld [vmem:[#allocation38_spill] sm:$0xff] }
 0x435   :  { %vm4809_vm11 = vnez %v4808_v12  ;;  %v1859_v28 = vadd.f32 %v4212_v31, %v4130_v44 }
 0x436   :  { %v2044_v16 = vmul.f32 %v1951_v41, %v4794_v56  ;;  %v2562_v41 = vld [vmem:[%s4468_s3 + $0x48] sm:$0xff] }
 0x438   :  { %v2084_v38 = vadd.f32 %v2557_v14, %v2044_v16  ;;  %v4810_v16 = vld [vmem:[#allocation25_spill] sm:$0xff] }
 0x43a   :  { %v2128_v36 = vadd.f32 %v4172_v45, %v2084_v38  ;;  %v1762_v38 = vpop.f32.mrf.mxu0 }
 0x43b   :  { %v1952_v15 = vpop.f32.mrf.mxu3 }
 0x43c   :  { %2168 = vst [vmem:[#allocation2 + $0x20] sm:$0xff] %v2128_v36  ;;  %v1953_v23 = vadd.f32 %v1952_v15, %v1844_v57  ;;  %v4220_v4 = vpop.f32.mrf.mxu1  ;;  %v4812_v15 = vld [vmem:[#allocation28_spill] sm:$0xff] }
 0x43d   :  { %v1862_v44 = vadd.f32 %v4220_v4, %v4140_v6 }
 0x43e   :  { %v2045_v60 = vmul.f32 %v1953_v23, %v4795_v52  ;;  %v2563_v52 = vld [vmem:[%s4468_s3 + $0x50] sm:$0xff] }
 0x43f   :  { %2511 = vmatmul.msk.bf16.gmra.mxu1 %vm4797_vm3, %v4650_v13 }
 0x440   :  { %v2085_v5 = vadd.f32 %v2558_v54, %v2045_v60  ;;  %2533 = vmatmul.msk.bf16.gmra.mxu3 %vm4799_vm13, %v4798_v18 }
 0x442   :  { %v2129_v11 = vadd.f32 %v4172_v45, %v2085_v5  ;;  %v1764_v18 = vpop.f32.mrf.mxu0 }
 0x443   :  { %v1955_v29 = vpop.f32.mrf.mxu3 }
 0x444   :  { %2169 = vst [vmem:[#allocation2 + $0x28] sm:$0xff] %v2129_v11  ;;  %v1956_v17 = vadd.f32 %v1955_v29, %v1847_v32  ;;  %v4234_v10 = vpop.f32.mrf.mxu1  ;;  %v4813_v32 = vld [vmem:[#allocation31_spill] sm:$0xff]  ;;  %v4814_v29 = vld [vmem:[#allocation42_spill] sm:$0xff] }
 0x445   :  { %vm4815_vm8 = vnez %v4814_v29  ;;  %v1864_v9 = vadd.f32 %v4234_v10, %v4142_v53  ;;  %v4830_v29 = vld [vmem:[#allocation43_spill] sm:$0xff] }
 0x446   :  { %v2046_v30 = vmul.f32 %v1956_v17, %v4800_v24  ;;  %v2564_v17 = vld [vmem:[%s4468_s3 + $0x58] sm:$0xff] }
 0x448   :  { %v2086_v34 = vadd.f32 %v2559_v48, %v2046_v30  ;;  %v4816_v30 = vld [vmem:[#allocation29_spill] sm:$0xff] }
 0x44a   :  { %v2130_v39 = vadd.f32 %v4172_v45, %v2086_v34 }
 0x44b   :  { %v1957_v59 = vpop.f32.mrf.mxu3 }
 0x44c   :  { %2170 = vst [vmem:[#allocation2 + $0x30] sm:$0xff] %v2130_v39  ;;  %v1958_v51 = vadd.f32 %v1957_v59, %v1849_v43  ;;  %v4243_v2 = vpop.f32.mrf.mxu1  ;;  %v4818_v39 = vld [vmem:[#allocation32_spill] sm:$0xff] }
 0x44d   :  { %v1867_v10 = vadd.f32 %v4243_v2, %v4152_v40 }
 0x44e   :  { %v2047_v42 = vmul.f32 %v1958_v51, %v4801_v25  ;;  %v1767_v51 = vpop.f32.mrf.mxu0  ;;  %v2565_v25 = vld [vmem:[%s4468_s3 + $0x60] sm:$0xff] }
 0x44f   :  { %2513 = vmatmul.msk.bf16.gmra.mxu1 %vm4803_vm1, %v4650_v13 }
 0x450   :  { %v2087_v37 = vadd.f32 %v2560_v63, %v2047_v42  ;;  %2534 = vmatmul.msk.bf16.gmra.mxu3 %vm4805_vm9, %v4804_v61 }
 0x452   :  { %v2131_v55 = vadd.f32 %v4172_v45, %v2087_v37  ;;  %v4819_v37 = vld [vmem:[#allocation35_spill] sm:$0xff] }
 0x453   :  { %v1960_v58 = vpop.f32.mrf.mxu3 }
 0x454   :  { %2171 = vst [vmem:[#allocation2 + $0x38] sm:$0xff] %v2131_v55  ;;  %v1961_v1 = vadd.f32 %v1960_v58, %v1852_v46  ;;  %v4258_v3 = vpop.f32.mrf.mxu1  ;;  %v4820_v55 = vld [vmem:[#allocation47_spill] sm:$0xff]  ;;  %v2566_v58 = vld [vmem:[%s4468_s3 + $0x68] sm:$0xff] }
 0x455   :  { %vm4821_vm4 = vnez %v4820_v55  ;;  %v2572_v55 = vld [vmem:[%s4468_s3 + $0x98] sm:$0xff] }
 0x456   :  { %v2048_v0 = vmul.f32 %v1961_v1, %v4806_v35  ;;  %v4822_v35 = vld [vmem:[#allocation33_spill] sm:$0xff]  ;;  %v1769_v53 = vpop.f32.mrf.mxu0 }
 0x458   :  { %v2088_v47 = vadd.f32 %v2561_v33, %v2048_v0 }
 0x45a   :  { %v2132_v22 = vadd.f32 %v4172_v45, %v2088_v47 }
 0x45b   :  { %v1962_v8 = vpop.f32.mrf.mxu3 }
 0x45c   :  { %2172 = vst [vmem:[#allocation2 + $0x40] sm:$0xff] %v2132_v22  ;;  %v1963_v50 = vadd.f32 %v1962_v8, %v1854_v26  ;;  %v4275_v20 = vpop.f32.mrf.mxu1  ;;  %v4824_v26 = vld [vmem:[#allocation36_spill] sm:$0xff]  ;;  %v2567_v8 = vld [vmem:[%s4468_s3 + $0x70] sm:$0xff] }
 0x45e   :  { %v2049_v62 = vmul.f32 %v1963_v50, %v4807_v19 }
 0x45f   :  { %2515 = vmatmul.msk.bf16.gmra.mxu1 %vm4809_vm11, %v4650_v13 }
 0x460   :  { %v2089_v56 = vadd.f32 %v2562_v41, %v2049_v62  ;;  %2535 = vmatmul.msk.bf16.gmra.mxu3 %vm4811_vm12, %v4810_v16  ;;  %v1869_v62 = vadd.f32 %v4258_v3, %v4156_v49  ;;  %v1772_v41 = vpop.f32.mrf.mxu0  ;;  %v1872_v49 = vadd.f32 %v4275_v20, %v1762_v38 }
 0x462   :  { %v2133_v14 = vadd.f32 %v4172_v45, %v2089_v56  ;;  %v4825_v56 = vld [vmem:[#allocation39_spill] sm:$0xff] }
 0x463   :  { %v1965_v57 = vpop.f32.mrf.mxu3 }
 0x464   :  { %2173 = vst [vmem:[#allocation2 + $0x48] sm:$0xff] %v2133_v14  ;;  %v1966_v36 = vadd.f32 %v1965_v57, %v1857_v21  ;;  %v1873_v5 = vpop.f32.mrf.mxu1  ;;  %v2568_v14 = vld [vmem:[%s4468_s3 + $0x78] sm:$0xff] }
 0x466   :  { %v2050_v23 = vmul.f32 %v1966_v36, %v4812_v15  ;;  %v4827_v36 = vld [vmem:[#allocation37_spill] sm:$0xff] }
 0x468   :  { %v2090_v60 = vadd.f32 %v2563_v52, %v2050_v23 }
 0x46a   :  { %v2134_v54 = vadd.f32 %v4172_v45, %v2090_v60  ;;  %v1774_v60 = vpop.f32.mrf.mxu0 }
 0x46b   :  { %v1967_v27 = vpop.f32.mrf.mxu3 }
 0x46c   :  { %2174 = vst [vmem:[#allocation2 + $0x50] sm:$0xff] %v2134_v54  ;;  %v1968_v7 = vadd.f32 %v1967_v27, %v1859_v28  ;;  %v1876_v43 = vpop.f32.mrf.mxu1  ;;  %v4829_v28 = vld [vmem:[#allocation40_spill] sm:$0xff] }
 0x46e   :  { %v2051_v11 = vmul.f32 %v1968_v7, %v4813_v32  ;;  %v1874_v7 = vadd.f32 %v1873_v5, %v1764_v18 }
 0x46f   :  { %2517 = vmatmul.msk.bf16.gmra.mxu1 %vm4815_vm8, %v4650_v13 }
 0x470   :  { %v2091_v24 = vadd.f32 %v2564_v17, %v2051_v11  ;;  %2536 = vmatmul.msk.bf16.gmra.mxu3 %vm4817_vm14, %v4816_v30  ;;  %v2570_v30 = vld [vmem:[%s4468_s3 + $0x88] sm:$0xff] }
 0x472   :  { %v2135_v31 = vadd.f32 %v4172_v45, %v2091_v24  ;;  %v1777_v24 = vpop.f32.mrf.mxu0 }
 0x473   :  { %v1970_v48 = vpop.f32.mrf.mxu3 }
 0x474   :  { %2175 = vst [vmem:[#allocation2 + $0x58] sm:$0xff] %v2135_v31  ;;  %v1971_v34 = vadd.f32 %v1970_v48, %v1862_v44  ;;  %v1878_v46 = vpop.f32.mrf.mxu1  ;;  %v4831_v31 = vld [vmem:[#allocation41_spill] sm:$0xff]  ;;  %v1877_v48 = vadd.f32 %v1876_v43, %v1767_v51  ;;  %v4834_v51 = vld [vmem:[#allocation48_spill] sm:$0xff] }
 0x476   :  { %v2052_v59 = vmul.f32 %v1971_v34, %v4818_v39  ;;  %v4833_v39 = vld [vmem:[#allocation44_spill] sm:$0xff] }
 0x478   :  { %v2092_v42 = vadd.f32 %v2565_v25, %v2052_v59 }
 0x47a   :  { %v2136_v63 = vadd.f32 %v4172_v45, %v2092_v42  ;;  %v2571_v42 = vld [vmem:[%s4468_s3 + $0x90] sm:$0xff] }
 0x47b   :  { %v1972_v6 = vpop.f32.mrf.mxu3 }
 0x47c   :  { %2176 = vst [vmem:[#allocation2 + $0x60] sm:$0xff] %v2136_v63  ;;  %v1973_v4 = vadd.f32 %v1972_v6, %v1864_v9  ;;  %v1881_v19 = vpop.f32.mrf.mxu1  ;;  %v1779_v63 = vpop.f32.mrf.mxu0  ;;  %v1879_v6 = vadd.f32 %v1878_v46, %v1769_v53 }
 0x47e   :  { %v2053_v61 = vmul.f32 %v1973_v4, %v4819_v37 }
 0x47f   :  { %2519 = vmatmul.msk.bf16.gmra.mxu1 %vm4821_vm4, %v4650_v13 }
 0x480   :  { %v2093_v1 = vadd.f32 %v2566_v58, %v2053_v61  ;;  %2537 = vmatmul.msk.bf16.gmra.mxu3 %vm4823_vm5, %v4822_v35 }
 0x482   :  { %v2137_v0 = vadd.f32 %v4172_v45, %v2093_v1  ;;  %v4835_v1 = vld [vmem:[#allocation46_spill] sm:$0xff] }
 0x483   :  { %v1975_v33 = vpop.f32.mrf.mxu3 }
 0x484   :  { %2177 = vst [vmem:[#allocation2 + $0x68] sm:$0xff] %v2137_v0  ;;  %v1976_v47 = vadd.f32 %v1975_v33, %v1867_v10  ;;  %v1883_v15 = vpop.f32.mrf.mxu1  ;;  %v1882_v10 = vadd.f32 %v1881_v19, %v1772_v41  ;;  %v1782_v46 = vpop.f32.mrf.mxu0 }
 0x486   :  { %v2054_v22 = vmul.f32 %v1976_v47, %v4824_v26  ;;  %v4837_v47 = vld [vmem:[#allocation49_spill] sm:$0xff] }
 0x488   :  { %v2094_v50 = vadd.f32 %v2567_v8, %v2054_v22  ;;  %v2573_v22 = vld [vmem:[%s4468_s3 + $0xa0] sm:$0xff] }
 0x48a   :  { %v2138_v12 = vadd.f32 %v4172_v45, %v2094_v50  ;;  %v1884_v50 = vadd.f32 %v1883_v15, %v1774_v60 }
 0x48b   :  { %v1977_v40 = vpop.f32.mrf.mxu3 }
 0x48c   :  { %2178 = vst [vmem:[#allocation2 + $0x70] sm:$0xff] %v2138_v12  ;;  %v1978_v2 = vadd.f32 %v1977_v40, %v1869_v62  ;;  %v1886_v38 = vpop.f32.mrf.mxu1  ;;  %v1784_v41 = vpop.f32.mrf.mxu0 }
 0x48e   :  { %v2055_v16 = vmul.f32 %v1978_v2, %v4825_v56  ;;  %v4838_v2 = vld [vmem:[#allocation53_spill] sm:$0xff] }
 0x48f   :  { %2521 = vmatmul.msk.bf16.gmra.mxu1 %vm3828_vm0, %v4650_v13  ;;  %v2569_v13 = vld [vmem:[%s4468_s3 + $0x80] sm:$0xff]  ;;  %vm4832_vm0 = vmmov %vm4823_vm5 }
 0x490   :  { %v2095_v57 = vadd.f32 %v2568_v14, %v2055_v16  ;;  %2538 = vmatmul.msk.bf16.gmra.mxu3 %vm4828_vm15, %v4827_v36  ;;  %vm4836_vm2 = vmmov %vm4832_vm0  ;;  %v2574_v16 = vld [vmem:[%s4468_s3 + $0xa8] sm:$0xff]  ;;  %v4839_v14 = vld [vmem:[#allocation51_spill] sm:$0xff] }
 0x491   :  { %vm4840_vm10 = vmmov %vm4832_vm0 }
 0x492   :  { %v2139_v3 = vadd.f32 %v4172_v45, %v2095_v57  ;;  %v1887_v57 = vadd.f32 %v1886_v38, %v1777_v24 }
 0x493   :  { %v1980_v23 = vpop.f32.mrf.mxu3 }
 0x494   :  { %2179 = vst [vmem:[#allocation2 + $0x78] sm:$0xff] %v2139_v3  ;;  %v1981_v52 = vadd.f32 %v1980_v23, %v1872_v49  ;;  %v1888_v25 = vpop.f32.mrf.mxu1  ;;  %v4841_v23 = vld [vmem:[#allocation54_spill] sm:$0xff]  ;;  %v1787_v60 = vpop.f32.mrf.mxu0 }
 0x496   :  { %v2056_v54 = vmul.f32 %v1981_v52, %v4829_v28  ;;  %v2575_v28 = vld [vmem:[%s4468_s3 + $0xb0] sm:$0xff] }
 0x498   :  { %v2096_v27 = vadd.f32 %v2569_v13, %v2056_v54  ;;  %v1889_v13 = vadd.f32 %v1888_v25, %v1779_v63 }
 0x49a   :  { %v2140_v32 = vadd.f32 %v4172_v45, %v2096_v27 }
 0x49b   :  { %v1982_v11 = vpop.f32.mrf.mxu3 }
 0x49c   :  { %2180 = vst [vmem:[#allocation2 + $0x80] sm:$0xff] %v2140_v32  ;;  %v1983_v20 = vadd.f32 %v1982_v11, %v1874_v7  ;;  %v1891_v35 = vpop.f32.mrf.mxu1  ;;  %v4842_v11 = vld [vmem:[#allocation55_spill] sm:$0xff]  ;;  %v1789_v24 = vpop.f32.mrf.mxu0 }
 0x49e   :  { %v2057_v17 = vmul.f32 %v1983_v20, %v4830_v29  ;;  %v2576_v29 = vld [vmem:[%s4468_s3 + $0xb8] sm:$0xff] }
 0x4a0   :  { %v2097_v44 = vadd.f32 %v2570_v30, %v2057_v17  ;;  %2539 = vmatmul.msk.bf16.gmra.mxu3 %vm4832_vm0, %v4831_v31  ;;  %v1892_v30 = vadd.f32 %v1891_v35, %v1782_v46 }
 0x4a2   :  { %v2141_v5 = vadd.f32 %v4172_v45, %v2097_v44 }
 0x4a3   :  { %v1985_v18 = vpop.f32.mrf.mxu3 }
 0x4a4   :  { %2181 = vst [vmem:[#allocation2 + $0x88] sm:$0xff] %v2141_v5  ;;  %v1986_v34 = vadd.f32 %v1985_v18, %v1877_v48  ;;  %v1893_v12 = vpop.f32.mrf.mxu1  ;;  %v4843_v5 = vld [vmem:[#allocation56_spill] sm:$0xff] }
 0x4a5   :  { %v1894_v25 = vadd.f32 %v1893_v12, %v1784_v41 }
 0x4a6   :  { %v2058_v59 = vmul.f32 %v1986_v34, %v4833_v39  ;;  %v2577_v34 = vld [vmem:[%s4468_s3 + $0xc0] sm:$0xff] }
 0x4a8   :  { %v2098_v9 = vadd.f32 %v2571_v42, %v2058_v59 }
 0x4aa   :  { %v2142_v4 = vadd.f32 %v4172_v45, %v2098_v9  ;;  %v1792_v9 = vpop.f32.mrf.mxu0 }
 0x4ab   :  { %v1987_v37 = vpop.f32.mrf.mxu3 }
 0x4ac   :  { %2182 = vst [vmem:[#allocation2 + $0x90] sm:$0xff] %v2142_v4  ;;  %v1988_v43 = vadd.f32 %v1987_v37, %v1879_v6  ;;  %v1896_v15 = vpop.f32.mrf.mxu1  ;;  %v4844_v4 = vld [vmem:[#allocation57_spill] sm:$0xff] }
 0x4ae   :  { %v2059_v61 = vmul.f32 %v1988_v43, %v4834_v51  ;;  %v2578_v43 = vld [vmem:[%s4468_s3 + $0xc8] sm:$0xff] }
 0x4b0   :  { %v2099_v58 = vadd.f32 %v2572_v55, %v2059_v61  ;;  %2540 = vmatmul.msk.bf16.gmra.mxu3 %vm4836_vm2, %v4835_v1  ;;  %v1897_v61 = vadd.f32 %v1896_v15, %v1787_v60 }
 0x4b2   :  { %v2143_v0 = vadd.f32 %v4172_v45, %v2099_v58 }
 0x4b3   :  { %v1990_v53 = vpop.f32.mrf.mxu3 }
 0x4b4   :  { %2183 = vst [vmem:[#allocation2 + $0x98] sm:$0xff] %v2143_v0  ;;  %v1991_v33 = vadd.f32 %v1990_v53, %v1882_v10  ;;  %v1898_v38 = vpop.f32.mrf.mxu1  ;;  %v1794_v10 = vpop.f32.mrf.mxu0  ;;  %v4845_v0 = vld [vmem:[#allocation58_spill] sm:$0xff]  ;;  %v2579_v53 = vld [vmem:[%s4468_s3 + $0xd0] sm:$0xff] }
 0x4b6   :  { %v2060_v26 = vmul.f32 %v1991_v33, %v4837_v47  ;;  %v1899_v47 = vadd.f32 %v1898_v38, %v1789_v24  ;;  %v4849_v24 = vld [vmem:[#allocation62_spill] sm:$0xff] }
 0x4b8   :  { %v2100_v8 = vadd.f32 %v2573_v22, %v2060_v26 }
 0x4ba   :  { %v2144_v62 = vadd.f32 %v4172_v45, %v2100_v8 }
 0x4bb   :  { %v1992_v40 = vpop.f32.mrf.mxu3 }
 0x4bc   :  { %2184 = vst [vmem:[#allocation2 + $0xa0] sm:$0xff] %v2144_v62  ;;  %v1993_v19 = vadd.f32 %v1992_v40, %v1884_v50  ;;  %v1901_v59 = vpop.f32.mrf.mxu1  ;;  %v4846_v62 = vld [vmem:[#allocation59_spill] sm:$0xff]  ;;  %v1797_v40 = vpop.f32.mrf.mxu0 }
 0x4be   :  { %v2061_v56 = vmul.f32 %v1993_v19, %v4838_v2  ;;  %v2580_v19 = vld [vmem:[%s4468_s3 + $0xd8] sm:$0xff]  ;;  %v1902_v2 = vadd.f32 %v1901_v59, %v1792_v9 }
 0x4bf   :  { %v2584_v9 = vld [vmem:[%s4468_s3 + $0xf8] sm:$0xff] }
 0x4c0   :  { %v2101_v21 = vadd.f32 %v2574_v16, %v2061_v56  ;;  %2541 = vmatmul.msk.bf16.gmra.mxu3 %vm4840_vm10, %v4839_v14  ;;  %v4847_v14 = vld [vmem:[#allocation60_spill] sm:$0xff] }
 0x4c2   :  { %v2145_v36 = vadd.f32 %v4172_v45, %v2101_v21 }
 0x4c3   :  { %v1995_v49 = vpop.f32.mrf.mxu3 }
 0x4c4   :  { %2185 = vst [vmem:[#allocation2 + $0xa8] sm:$0xff] %v2145_v36  ;;  %v1996_v3 = vadd.f32 %v1995_v49, %v1887_v57  ;;  %v1903_v58 = vpop.f32.mrf.mxu1  ;;  %v2581_v49 = vld [vmem:[%s4468_s3 + $0xe0] sm:$0xff]  ;;  %v1799_v15 = vpop.f32.mrf.mxu0 }
 0x4c6   :  { %v2062_v52 = vmul.f32 %v1996_v3, %v4841_v23  ;;  %v1904_v23 = vadd.f32 %v1903_v58, %v1794_v10 }
 0x4c8   :  { %v2102_v54 = vadd.f32 %v2575_v28, %v2062_v52 }
 0x4ca   :  { %v2146_v27 = vadd.f32 %v4172_v45, %v2102_v54  ;;  %v4848_v54 = vld [vmem:[#allocation61_spill] sm:$0xff] }
 0x4cb   :  { %v1997_v7 = vpop.f32.mrf.mxu3 }
 0x4cc   :  { %2186 = vst [vmem:[#allocation2 + $0xb0] sm:$0xff] %v2146_v27  ;;  %v1998_v32 = vadd.f32 %v1997_v7, %v1889_v13  ;;  %v1906_v50 = vpop.f32.mrf.mxu1  ;;  %v2582_v27 = vld [vmem:[%s4468_s3 + $0xe8] sm:$0xff]  ;;  %v1802_v38 = vpop.f32.mrf.mxu0 }
 0x4ce   :  { %v2063_v20 = vmul.f32 %v1998_v32, %v4842_v11  ;;  %v1907_v11 = vadd.f32 %v1906_v50, %v1797_v40 }
 0x4d0   :  { %v2103_v17 = vadd.f32 %v2576_v29, %v2063_v20 }
 0x4d2   :  { %v2147_v44 = vadd.f32 %v4172_v45, %v2103_v17 }
 0x4d3   :  { %v2000_v31 = vpop.f32.mrf.mxu3 }
 0x4d4   :  { %2187 = vst [vmem:[#allocation2 + $0xb8] sm:$0xff] %v2147_v44  ;;  %v2001_v48 = vadd.f32 %v2000_v31, %v1892_v30  ;;  %v1908_v36 = vpop.f32.mrf.mxu1  ;;  %v2583_v44 = vld [vmem:[%s4468_s3 + $0xf0] sm:$0xff]  ;;  %v1804_v59 = vpop.f32.mrf.mxu0 }
 0x4d6   :  { %v2064_v18 = vmul.f32 %v2001_v48, %v4843_v5  ;;  %v1909_v48 = vadd.f32 %v1908_v36, %v1799_v15  ;;  %v4854_v15 = vld [vmem:[#allocation67_spill] sm:$0xff] }
 0x4d8   :  { %v2104_v39 = vadd.f32 %v2577_v34, %v2064_v18 }
 0x4da   :  { %v2148_v42 = vadd.f32 %v4172_v45, %v2104_v39 }
 0x4db   :  { %v2002_v63 = vpop.f32.mrf.mxu3 }
 0x4dc   :  { %2188 = vst [vmem:[#allocation2 + $0xc0] sm:$0xff] %v2148_v42  ;;  %v2003_v6 = vadd.f32 %v2002_v63, %v1894_v25  ;;  %v1911_v32 = vpop.f32.mrf.mxu1  ;;  %v4850_v25 = vld [vmem:[#allocation63_spill] sm:$0xff]  ;;  %v1807_v58 = vpop.f32.mrf.mxu0 }
 0x4de   :  { %v2065_v37 = vmul.f32 %v2003_v6, %v4844_v4  ;;  %v1912_v6 = vadd.f32 %v1911_v32, %v1802_v38  ;;  %v2589_v38 = vld [vmem:[%s4468_s3 + $0x120] sm:$0xff] }
 0x4e0   :  { %v2105_v51 = vadd.f32 %v2578_v43, %v2065_v37 }
 0x4e2   :  { %v2149_v55 = vadd.f32 %v4172_v45, %v2105_v51 }
 0x4e3   :  { %v2005_v1 = vpop.f32.mrf.mxu3 }
 0x4e4   :  { %2189 = vst [vmem:[#allocation2 + $0xc8] sm:$0xff] %v2149_v55  ;;  %v2006_v35 = vadd.f32 %v2005_v1, %v1897_v61  ;;  %v1913_v18 = vpop.f32.mrf.mxu1  ;;  %v4851_v61 = vld [vmem:[#allocation64_spill] sm:$0xff]  ;;  %v2585_v1 = vld [vmem:[%s4468_s3 + $0x100] sm:$0xff]  ;;  %v1809_v50 = vpop.f32.mrf.mxu0 }
 0x4e5   :  { %v1914_v10 = vadd.f32 %v1913_v18, %v1804_v59 }
 0x4e6   :  { %v2066_v46 = vmul.f32 %v2006_v35, %v4845_v0 }
 0x4e8   :  { %v2106_v33 = vadd.f32 %v2579_v53, %v2066_v46 }
 0x4ea   :  { %v2150_v26 = vadd.f32 %v4172_v45, %v2106_v33  ;;  %v4852_v33 = vld [vmem:[#allocation65_spill] sm:$0xff] }
 0x4eb   :  { %v2007_v22 = vpop.f32.mrf.mxu3 }
 0x4ec   :  { %2190 = vst [vmem:[#allocation2 + $0xd0] sm:$0xff] %v2150_v26  ;;  %v2008_v8 = vadd.f32 %v2007_v22, %v1899_v47  ;;  %v1916_v51 = vpop.f32.mrf.mxu1  ;;  %v2586_v22 = vld [vmem:[%s4468_s3 + $0x108] sm:$0xff]  ;;  %v1812_v36 = vpop.f32.mrf.mxu0 }
 0x4ee   :  { %v2067_v12 = vmul.f32 %v2008_v8, %v4846_v62  ;;  %v1917_v62 = vadd.f32 %v1916_v51, %v1807_v58 }
 0x4f0   :  { %v2107_v41 = vadd.f32 %v2580_v19, %v2067_v12 }
 0x4f2   :  { %v2151_v56 = vadd.f32 %v4172_v45, %v2107_v41  ;;  %v4853_v41 = vld [vmem:[#allocation66_spill] sm:$0xff] }
 0x4f3   :  { %v2010_v16 = vpop.f32.mrf.mxu3 }
 0x4f4   :  { %2191 = vst [vmem:[#allocation2 + $0xd8] sm:$0xff] %v2151_v56  ;;  %v2011_v21 = vadd.f32 %v2010_v16, %v1902_v2  ;;  %v1918_v26 = vpop.f32.mrf.mxu1  ;;  %v2587_v56 = vld [vmem:[%s4468_s3 + $0x110] sm:$0xff]  ;;  %v1814_v32 = vpop.f32.mrf.mxu0 }
 0x4f6   :  { %v2068_v57 = vmul.f32 %v2011_v21, %v4847_v14  ;;  %v1919_v14 = vadd.f32 %v1918_v26, %v1809_v50 }
 0x4f8   :  { %v2108_v3 = vadd.f32 %v2581_v49, %v2068_v57 }
 0x4fa   :  { %v2152_v52 = vadd.f32 %v4172_v45, %v2108_v3 }
 0x4fb   :  { %v2012_v60 = vpop.f32.mrf.mxu3 }
 0x4fc   :  { %2192 = vst [vmem:[#allocation2 + $0xe0] sm:$0xff] %v2152_v52  ;;  %v2013_v28 = vadd.f32 %v2012_v60, %v1904_v23  ;;  %v1921_v21 = vpop.f32.mrf.mxu1  ;;  %v2588_v52 = vld [vmem:[%s4468_s3 + $0x118] sm:$0xff]  ;;  %v1817_v18 = vpop.f32.mrf.mxu0 }
 0x4fe   :  { %v2069_v13 = vmul.f32 %v2013_v28, %v4848_v54  ;;  %v1922_v28 = vadd.f32 %v1921_v21, %v1812_v36 }
 0x500   :  { %v2109_v7 = vadd.f32 %v2582_v27, %v2069_v13 }
 0x502   :  { %v2153_v20 = vadd.f32 %v4172_v45, %v2109_v7 }
 0x503   :  { %v2015_v29 = vpop.f32.mrf.mxu3 }
 0x504   :  { %2193 = vst [vmem:[#allocation2 + $0xe8] sm:$0xff] %v2153_v20  ;;  %v2016_v17 = vadd.f32 %v2015_v29, %v1907_v11  ;;  %v1923_v13 = vpop.f32.mrf.mxu1  ;;  %v4855_v11 = vld [vmem:[#allocation68_spill] sm:$0xff]  ;;  %v1819_v51 = vpop.f32.mrf.mxu0 }
 0x506   :  { %v2070_v30 = vmul.f32 %v2016_v17, %v4849_v24  ;;  %v1924_v17 = vadd.f32 %v1923_v13, %v1814_v32 }
 0x508   :  { %v2110_v31 = vadd.f32 %v2583_v44, %v2070_v30 }
 0x50a   :  { %v2154_v5 = vadd.f32 %v4172_v45, %v2110_v31 }
 0x50b   :  { %v2017_v34 = vpop.f32.mrf.mxu3 }
 0x50c   :  { %2194 = vst [vmem:[#allocation2 + $0xf0] sm:$0xff] %v2154_v5  ;;  %v2018_v39 = vadd.f32 %v2017_v34, %v1909_v48  ;;  %v1926_v31 = vpop.f32.mrf.mxu1  ;;  %v4856_v48 = vld [vmem:[#allocation69_spill] sm:$0xff]  ;;  %v2590_v34 = vld [vmem:[%s4468_s3 + $0x128] sm:$0xff] }
 0x50d   :  { %v1927_v59 = vadd.f32 %v1926_v31, %v1817_v18 }
 0x50e   :  { %v2071_v42 = vmul.f32 %v2018_v39, %v4850_v25 }
 0x510   :  { %v2111_v63 = vadd.f32 %v2584_v9, %v2071_v42 }
 0x512   :  { %v2155_v4 = vadd.f32 %v4172_v45, %v2111_v63  ;;  %v4857_v63 = vld [vmem:[#allocation70_spill] sm:$0xff] }
 0x513   :  { %v2020_v37 = vpop.f32.mrf.mxu3 }
 0x514   :  { %2195 = vst [vmem:[#allocation2 + $0xf8] sm:$0xff] %v2155_v4  ;;  %v2021_v43 = vadd.f32 %v2020_v37, %v1912_v6  ;;  %v1928_v4 = vpop.f32.mrf.mxu1  ;;  %v2591_v37 = vld [vmem:[%s4468_s3 + $0x130] sm:$0xff] }
 0x516   :  { %v2072_v55 = vmul.f32 %v2021_v43, %v4851_v61  ;;  %v1929_v61 = vadd.f32 %v1928_v4, %v1819_v51 }
 0x518   :  { %v2112_v35 = vadd.f32 %v2585_v1, %v2072_v55 }
 0x51a   :  { %v2156_v0 = vadd.f32 %v4172_v45, %v2112_v35  ;;  %v4858_v35 = vld [vmem:[#allocation71_spill] sm:$0xff] }
 0x51b   :  { %v2022_v46 = vpop.f32.mrf.mxu3 }
 0x51c   :  { %2196 = vst [vmem:[#allocation2 + $0x100] sm:$0xff] %v2156_v0  ;;  %v2023_v53 = vadd.f32 %v2022_v46, %v1914_v10  ;;  %v2592_v0 = vld [vmem:[%s4468_s3 + $0x138] sm:$0xff] }
 0x51e   :  { %v2073_v47 = vmul.f32 %v2023_v53, %v4852_v33 }
 0x520   :  { %v2113_v8 = vadd.f32 %v2586_v22, %v2073_v47 }
 0x522   :  { %v2157_v12 = vadd.f32 %v4172_v45, %v2113_v8 }
 0x523   :  { %v2025_v40 = vpop.f32.mrf.mxu3 }
 0x524   :  { %2197 = vst [vmem:[#allocation2 + $0x108] sm:$0xff] %v2157_v12  ;;  %v2026_v19 = vadd.f32 %v2025_v40, %v1917_v62 }
 0x526   :  { %v2074_v2 = vmul.f32 %v2026_v19, %v4853_v41 }
 0x528   :  { %v2114_v16 = vadd.f32 %v2587_v56, %v2074_v2 }
 0x52a   :  { %v2158_v57 = vadd.f32 %v4172_v45, %v2114_v16 }
 0x52b   :  { %v2027_v49 = vpop.f32.mrf.mxu3 }
 0x52c   :  { %2198 = vst [vmem:[#allocation2 + $0x110] sm:$0xff] %v2158_v57  ;;  %v2028_v3 = vadd.f32 %v2027_v49, %v1919_v14 }
 0x52e   :  { %v2075_v23 = vmul.f32 %v2028_v3, %v4854_v15 }
 0x530   :  { %v2115_v60 = vadd.f32 %v2588_v52, %v2075_v23 }
 0x532   :  { %v2159_v54 = vadd.f32 %v4172_v45, %v2115_v60 }
 0x533   :  { %v2030_v27 = vpop.f32.mrf.mxu3 }
 0x534   :  { %2199 = vst [vmem:[#allocation2 + $0x118] sm:$0xff] %v2159_v54  ;;  %v2031_v7 = vadd.f32 %v2030_v27, %v1922_v28 }
 0x536   :  { %v2076_v20 = vmul.f32 %v2031_v7, %v4855_v11 }
 0x538   :  { %v2116_v29 = vadd.f32 %v2589_v38, %v2076_v20 }
 0x53a   :  { %v2160_v24 = vadd.f32 %v4172_v45, %v2116_v29 }
 0x53b   :  { %v2032_v30 = vpop.f32.mrf.mxu3 }
 0x53c   :  { %2200 = vst [vmem:[#allocation2 + $0x120] sm:$0xff] %v2160_v24  ;;  %v2033_v44 = vadd.f32 %v2032_v30, %v1924_v17 }
 0x53e   :  { %v2077_v5 = vmul.f32 %v2033_v44, %v4856_v48 }
 0x540   :  { %v2117_v39 = vadd.f32 %v2590_v34, %v2077_v5 }
 0x542   :  { %v2161_v25 = vadd.f32 %v4172_v45, %v2117_v39 }
 0x543   :  { %v2035_v42 = vpop.f32.mrf.mxu3 }
 0x544   :  { %2201 = vst [vmem:[#allocation2 + $0x128] sm:$0xff] %v2161_v25  ;;  %v2036_v9 = vadd.f32 %v2035_v42, %v1927_v59 }
 0x546   :  { %v2078_v6 = vmul.f32 %v2036_v9, %v4857_v63 }
 0x548   :  { %v2118_v43 = vadd.f32 %v2591_v37, %v2078_v6 }
 0x54a   :  { %v2162_v55 = vadd.f32 %v4172_v45, %v2118_v43 }
 0x54b   :  { %v2037_v58 = vpop.f32.mrf.mxu3 }
 0x54c   :  { %2202 = vst [vmem:[#allocation2 + $0x130] sm:$0xff] %v2162_v55  ;;  %v2038_v1 = vadd.f32 %v2037_v58, %v1929_v61 }
 0x54e   :  { %v2079_v10 = vmul.f32 %v2038_v1, %v4858_v35 }
 0x550   :  { %v2119_v46 = vadd.f32 %v2592_v0, %v2079_v10 }
 0x552   :  { %v2163_v53 = vadd.f32 %v4172_v45, %v2119_v46 }
 0x554   :  { %2203 = vst [vmem:[#allocation2 + $0x138] sm:$0xff] %v2163_v53 }
 0x555   :  { %2216 = dma.vmem_to_hbm [thread:$0]  %s2209_s0, 5120, %s2211_s30, [#allocation3], %s2623_s5, %s2623_s5, %s2624_s10  }
 0x556   :  { %2617 = dma.done.wait [#allocation3], 5120  }
 0x557   :  { %2618 = vsyncadd [#allocation3], 4294962176 }
 0x558   :  { %2221 = vsyncpa [#allocation3], 1 }

</bundles_post_ra>
